<compile_context>
chip_gen: v6e
topology: v6e:2x2x1
jax: 0.10.0
libtpu: 0.0.40
codegen_flags: <defaults>
</compile_context>

<pallas_src>
import numpy as np
import jax
import jax.numpy as jnp
from jax import lax
from jax.experimental import pallas as pl
from jax.experimental.pallas import tpu as pltpu

N_BINS = 361
KT = 10          # conv kernel size
CPAD = 4         # conv padding (reference only)
N_OUT = 513
HALO_L = 12      # 3 chained convs * 4 frames of left context
HALO_R = 15      # 3 chained convs * 5 frames of right context (4 pad + F.pad(0,1))


def gaussian_kernel1d(sigma=1.0, truncate=4.0):
    radius = int(truncate * sigma + 0.5)
    x = np.arange(-radius, radius + 1)
    phi = np.exp(-0.5 / (sigma * sigma) * x ** 2)
    return (phi / phi.sum()).astype(np.float32)   # length 9 for sigma=1


def gaussian_band_matrix_normalized():
    """Gn[i, c] = g[i-c+4] / g[4]:  onehot @ Gn  ==  conv1d(onehot, g, pad=4)
    followed by the per-frame max-normalisation (for an exact one-hot the row
    max is always the center tap g[4], so the divide is folded in here)."""
    g = gaussian_kernel1d(1.0)
    i = np.arange(N_BINS)[:, None]
    c = np.arange(N_BINS)[None, :]
    d = i - c + 4
    ok = (d >= 0) & (d <= 8)
    G = np.where(ok, g[np.clip(d, 0, 8)], 0.0).astype(np.float32)
    return (G / g[4]).astype(np.float32)


# ----------------------------------------------------------------------------
# Pallas kernel
# ----------------------------------------------------------------------------
def _make_kernel(TT, T_real):
    """TT output frames per grid step; halo frames are recomputed so the three
    chained convs are exact at tile edges."""
    W0 = TT + HALO_L + HALO_R          # blurred-window rows        (TT + 27)
    W1 = TT + 18                       # conv1 rows needed by conv2
    W2 = TT + 9                        # conv2 rows needed by conv3
    f32, bf16 = jnp.float32, jnp.bfloat16

    def kernel(k_ref, g_ref, w1_ref, b1_ref, w2_ref, b2_ref, w3_ref, b3_ref,
               wbg_ref, bbg_ref, out_ref):
        t0 = pl.program_id(1) * TT

        # ---- one-hot built in-kernel (VPU iota compare; no HBM one-hot) ----
        kcol = k_ref[0, 0]                                        # (W0, 1) i32
        bins = lax.broadcasted_iota(jnp.int32, (W0, N_BINS), 1)
        oh = jnp.where(bins == kcol, 1.0, 0.0)                    # f32, exact
        # frames outside [0,T) carry k = -1 -> all-zero rows (= conv padding)

        # ---- gaussian blur + folded max-normalisation (one MXU matmul) ----
        x = jnp.dot(oh.astype(bf16), g_ref[...],
                    preferred_element_type=f32)                   # (W0, 361)

        def conv_im2col(x_f32, rows, w_ref, b_ref, frame_off):
            # im2col: single (rows, 10*Cin) @ (10*Cin, Cout) matmul instead of
            # 10 thin tap-matmuls -> full MXU K-fill, 10x fewer pushes.
            cols = jnp.concatenate(
                [x_f32[tap:tap + rows, :] for tap in range(KT)], axis=-1)
            y = jnp.dot(cols.astype(bf16), w_ref[...],
                        preferred_element_type=f32) + b_ref[...]
            # rows whose global frame is outside [0, T) are the zero padding
            # the next conv layer expects -> mask them to zero (cheap VPU).
            gidx = t0 + frame_off + lax.broadcasted_iota(jnp.int32, (rows, 1), 0)
            valid = jnp.logical_and(gidx >= 0, gidx < T_real).astype(f32)
            return y * valid

        h1 = conv_im2col(x, W1, w1_ref, b1_ref, -8)               # (W1, 16)
        h2 = conv_im2col(h1, W2, w2_ref, b2_ref, -4)              # (W2, 64)

        cols3 = jnp.concatenate(
            [h2[tap:tap + TT, :] for tap in range(KT)], axis=-1)
        h3 = jnp.dot(cols3.astype(bf16), w3_ref[...],
                     preferred_element_type=f32) + b3_ref[...]    # (TT, 256)

        # ---- fused linear_beta | linear_gamma -> one contiguous store ----
        out_ref[0] = (jnp.dot(h3.astype(bf16), wbg_ref[...],
                              preferred_element_type=f32) + bbg_ref[...])

    return kernel


# ----------------------------------------------------------------------------
# Wrapper
# ----------------------------------------------------------------------------
def condition_generator_pallas(f0_hz, params, channels_last=False):
    """f0_hz: (B, T, 1) float32.  Returns (beta, gamma): (B, 513, T) by default
    (PyTorch layout); pass channels_last=True to get (B, T, 513) and skip the
    layout transpose entirely."""
    (w1, b1, w2, b2, w3, b3, wlg, blg, wlb, blb) = params
    B, T, _ = f0_hz.shape

    # ---- glue: quantise f0 -> bin index (int32).  Clamp the upper end to
    #      avoid the NaN / scatter-OOB the torch code hits for very high f0. ----
    k = jnp.round(jnp.log2(f0_hz[..., 0] / 32.7 + 1e-08) * 60.0) + 1.0
    k = jnp.clip(k, 0.0, N_BINS - 1).astype(jnp.int32)            # (B, T)

    # ---- time tiling: TT output frames per grid step (+27-frame halo) ----
    if T <= 256:
        TT = ((T + 7) // 8) * 8
        n_tiles = 1
    else:
        TT = 256
        n_tiles = pl.cdiv(T, TT)
    T_pad = TT * n_tiles
    W0 = TT + HALO_L + HALO_R

    # windowed bin indices; out-of-range frames -> -1 (all-zero one-hot row)
    kp = jnp.pad(k, ((0, 0), (HALO_L, (T_pad - T) + HALO_R)), constant_values=-1)
    idx = jnp.arange(n_tiles)[:, None] * TT + jnp.arange(W0)[None, :]
    k_win = kp[:, idx][..., None]                                 # (B, n_tiles, W0, 1)

    # ---- glue: fold / reshape weights once (bf16 for the MXU, f32 biases) ----
    bf16 = jnp.bfloat16
    gmat = jnp.asarray(gaussian_band_matrix_normalized(), dtype=bf16)   # (361, 361)
    # im2col weight layout: column = tap * Cin + cin
    w1k = jnp.transpose(w1, (2, 1, 0)).reshape(KT * N_BINS, 16).astype(bf16)
    w2k = jnp.transpose(w2, (2, 1, 0)).reshape(KT * 16, 64).astype(bf16)
    w3k = jnp.transpose(w3, (2, 1, 0)).reshape(KT * 64, 256).astype(bf16)
    b1r, b2r, b3r = b1.reshape(1, -1), b2.reshape(1, -1), b3.reshape(1, -1)
    # fused beta|gamma projection: (256, 1026), bias (1, 1026)
    wbg = jnp.concatenate([jnp.transpose(wlb), jnp.transpose(wlg)], axis=1).astype(bf16)
    bbg = jnp.concatenate([blb, blg]).reshape(1, 2 * N_OUT)

    args = (k_win, gmat, w1k, b1r, w2k, b2r, w3k, b3r, wbg, bbg)

    def full_spec(a):
        nd = a.ndim
        return pl.BlockSpec(a.shape, lambda b, s, _nd=nd: (0,) * _nd)

    in_specs = [pl.BlockSpec((1, 1, W0, 1), lambda b, s: (b, s, 0, 0))] + \
               [full_spec(a) for a in args[1:]]
    out_spec = pl.BlockSpec((1, TT, 2 * N_OUT), lambda b, s: (b, s, 0))

    out = pl.pallas_call(
        _make_kernel(TT, T),
        out_shape=jax.ShapeDtypeStruct((B, T_pad, 2 * N_OUT), jnp.float32),
        grid_spec=pltpu.PrefetchScalarGridSpec(
            num_scalar_prefetch=0,
            grid=(B, n_tiles),
            in_specs=in_specs,
            out_specs=out_spec),
        compiler_params=pltpu.CompilerParams(
            dimension_semantics=("parallel", "parallel"),
            vmem_limit_bytes=32 * 1024 * 1024),
    )(*args)

    bg = out[:, :T, :]
    beta, gamma = bg[..., :N_OUT], bg[..., N_OUT:]
    if channels_last:
        return beta, gamma                                        # (B, T, 513)
    # PyTorch layout (B, 513, T); use channels_last=True to avoid this copy.
    return jnp.transpose(beta, (0, 2, 1)), jnp.transpose(gamma, (0, 2, 1))


# ----------------------------------------------------------------------------
# Pure-JAX reference (mirrors the torch forward op-for-op) for validation
# ----------------------------------------------------------------------------
def _conv1d_ref(x_ncw, w_oik, b, pad):
    y = lax.conv_general_dilated(x_ncw, w_oik, window_strides=(1,),
                                 padding=[(pad, pad)],
                                 dimension_numbers=("NCH", "OIH", "NCH"),
                                 precision=lax.Precision.HIGHEST)
    return y + b[None, :, None]


def condition_generator_reference(f0_hz, params):
    (w1, b1, w2, b2, w3, b3, wlg, blg, wlb, blb) = params
    B, T, _ = f0_hz.shape
    k = jnp.round(jnp.log2(f0_hz / 32.7 + 1e-08) * 60.0) + 1.0
    k = jnp.where(k < 0.0, 0.0, k).astype(jnp.int32)
    oh = jax.nn.one_hot(k[..., 0], N_BINS, dtype=jnp.float32)        # (B,T,361)
    gk = jnp.asarray(gaussian_kernel1d(1.0))[None, None, :]          # (1,1,9)
    blur = lax.conv_general_dilated(oh.reshape(B * T, 1, N_BINS), gk, (1,),
                                    [(4, 4)],
                                    dimension_numbers=("NCH", "OIH", "NCH"),
                                    precision=lax.Precision.HIGHEST)
    blur = blur.reshape(B, T, N_BINS)
    blur = blur / jnp.max(blur, axis=2, keepdims=True)
    x = jnp.transpose(blur, (0, 2, 1))                               # (B,361,T)
    x = jnp.pad(x, ((0, 0), (0, 0), (0, 1)))
    x = _conv1d_ref(x, w1, b1, CPAD)
    x = jnp.pad(x, ((0, 0), (0, 0), (0, 1)))
    x = _conv1d_ref(x, w2, b2, CPAD)
    x = jnp.pad(x, ((0, 0), (0, 0), (0, 1)))
    x = _conv1d_ref(x, w3, b3, CPAD)                                 # (B,256,T)
    x = jnp.transpose(x, (0, 2, 1))                                  # (B,T,256)
    beta = jnp.einsum("btc,dc->btd", x, wlb, precision="highest") + blb
    gamma = jnp.einsum("btc,dc->btd", x, wlg, precision="highest") + blg
    return jnp.transpose(beta, (0, 2, 1)), jnp.transpose(gamma, (0, 2, 1))


# ----------------------------------------------------------------------------
def _make_params(key):
    def uinit(k, shape, fan_in):
        bound = 1.0 / np.sqrt(fan_in)
        return jax.random.uniform(k, shape, jnp.float32, -bound, bound)

    ks = jax.random.split(key, 10)
    w1 = uinit(ks[0], (16, N_BINS, KT), N_BINS * KT); b1 = uinit(ks[1], (16,), N_BINS * KT)
    w2 = uinit(ks[2], (64, 16, KT), 16 * KT);         b2 = uinit(ks[3], (64,), 16 * KT)
    w3 = uinit(ks[4], (256, 64, KT), 64 * KT);        b3 = uinit(ks[5], (256,), 64 * KT)
    wlg = uinit(ks[6], (N_OUT, 256), 256);            blg = uinit(ks[7], (N_OUT,), 256)
    wlb = uinit(ks[8], (N_OUT, 256), 256);            blb = uinit(ks[9], (N_OUT,), 256)
    return (w1, b1, w2, b2, w3, b3, wlg, blg, wlb, blb)


if __name__ == "__main__":
    key = jax.random.PRNGKey(0)
    pkey, fkey = jax.random.split(key)

    params = _make_params(pkey)

    B, T = 2, 8                                   # small shapes: batch=2, frames=8
    f0_hz = jax.random.uniform(fkey, (B, T, 1), jnp.float32,
                               minval=80.0, maxval=900.0)

    beta, gamma = condition_generator_pallas(f0_hz, params)
    beta = jax.block_until_ready(beta)
    gamma = jax.block_until_ready(gamma)

    beta_ref, gamma_ref = condition_generator_reference(f0_hz, params)
    beta_ref = jax.block_until_ready(beta_ref)
    gamma_ref = jax.block_until_ready(gamma_ref)

    scale_b = float(jnp.max(jnp.abs(beta_ref))) + 1e-6
    scale_g = float(jnp.max(jnp.abs(gamma_ref))) + 1e-6
    np.testing.assert_allclose(np.asarray(beta), np.asarray(beta_ref),
                               rtol=5e-2, atol=5e-2 * scale_b)
    np.testing.assert_allclose(np.asarray(gamma), np.asarray(gamma_ref),
                               rtol=5e-2, atol=5e-2 * scale_g)

    assert beta.shape == (B, N_OUT, T) and gamma.shape == (B, N_OUT, T)
    print("KERNEL_OK")
</pallas_src>

<mosaic_0001>
module attributes {stable_mosaic.version = 11 : i64} {
  func.func @kernel(%arg0: i32, %arg1: i32, %arg2: memref<1x1x35x1xi32, #tpu.memory_space<vmem>>, %arg3: memref<361x361xbf16, #tpu.memory_space<vmem>>, %arg4: memref<3610x16xbf16, #tpu.memory_space<vmem>>, %arg5: memref<1x16xf32, #tpu.memory_space<vmem>>, %arg6: memref<160x64xbf16, #tpu.memory_space<vmem>>, %arg7: memref<1x64xf32, #tpu.memory_space<vmem>>, %arg8: memref<640x256xbf16, #tpu.memory_space<vmem>>, %arg9: memref<1x256xf32, #tpu.memory_space<vmem>>, %arg10: memref<256x1026xbf16, #tpu.memory_space<vmem>>, %arg11: memref<1x1026xf32, #tpu.memory_space<vmem>>, %arg12: memref<1x8x1026xf32, #tpu.memory_space<vmem>>) attributes {dimension_semantics = [#tpu.dimension_semantics<parallel>, #tpu.dimension_semantics<parallel>], iteration_bounds = array<i64: 2, 1>, scalar_prefetch = 0 : i64, scratch_operands = 0 : i64, tpu.core_type = #tpu.core_type<tc>, window_params = [{transform_indices = @transform_0, window_bounds = array<i64: 1, 1, 35, 1>}, {pipeline_mode = #tpu.pipeline_mode<synchronous>, transform_indices = @transform_1, window_bounds = array<i64: 361, 361>}, {pipeline_mode = #tpu.pipeline_mode<synchronous>, transform_indices = @transform_2, window_bounds = array<i64: 3610, 16>}, {pipeline_mode = #tpu.pipeline_mode<synchronous>, transform_indices = @transform_3, window_bounds = array<i64: 1, 16>}, {pipeline_mode = #tpu.pipeline_mode<synchronous>, transform_indices = @transform_4, window_bounds = array<i64: 160, 64>}, {pipeline_mode = #tpu.pipeline_mode<synchronous>, transform_indices = @transform_5, window_bounds = array<i64: 1, 64>}, {pipeline_mode = #tpu.pipeline_mode<synchronous>, transform_indices = @transform_6, window_bounds = array<i64: 640, 256>}, {pipeline_mode = #tpu.pipeline_mode<synchronous>, transform_indices = @transform_7, window_bounds = array<i64: 1, 256>}, {pipeline_mode = #tpu.pipeline_mode<synchronous>, transform_indices = @transform_8, window_bounds = array<i64: 256, 1026>}, {pipeline_mode = #tpu.pipeline_mode<synchronous>, transform_indices = @transform_9, window_bounds = array<i64: 1, 1026>}, {transform_indices = @transform_10, window_bounds = array<i64: 1, 8, 1026>}]} {
    %c8_i32 = arith.constant 8 : i32
    %0 = arith.muli %arg1, %c8_i32 : i32
    %c0 = arith.constant 0 : index
    %c0_0 = arith.constant 0 : index
    %c0_1 = arith.constant 0 : index
    %c0_2 = arith.constant 0 : index
    %1 = vector.load %arg2[%c0, %c0_0, %c0_1, %c0_2] : memref<1x1x35x1xi32, #tpu.memory_space<vmem>>, vector<1x1x35x1xi32>
    %2 = vector.shape_cast %1 : vector<1x1x35x1xi32> to vector<35x1xi32>
    %3 = tpu.iota {dimensions = array<i32: 1>} : vector<35x361xi32>
    %4 = vector.broadcast %2 : vector<35x1xi32> to vector<35x361xi32>
    %5 = arith.cmpi eq, %3, %4 : vector<35x361xi32>
    %cst = arith.constant 1.000000e+00 : f32
    %cst_3 = arith.constant 0.000000e+00 : f32
    %6 = vector.broadcast %cst : f32 to vector<35x361xf32>
    %7 = vector.broadcast %cst_3 : f32 to vector<35x361xf32>
    %8 = arith.select %5, %6, %7 : vector<35x361xi1>, vector<35x361xf32>
    %9 = arith.truncf %8 : vector<35x361xf32> to vector<35x361xbf16>
    %c0_4 = arith.constant 0 : index
    %c0_5 = arith.constant 0 : index
    %10 = vector.load %arg3[%c0_4, %c0_5] : memref<361x361xbf16, #tpu.memory_space<vmem>>, vector<361x361xbf16>
    %cst_6 = arith.constant dense<0.000000e+00> : vector<35x361xf32>
    %11 = tpu.matmul %9, %10, %cst_6 {dimension_numbers = #tpu.dot_dimension_numbers<[1], [0], [0], [1], [0, 0, 1, 1], [], []>} : vector<35x361xbf16>, vector<361x361xbf16>, vector<35x361xf32> -> vector<35x361xf32>
    %12 = vector.extract_strided_slice %11 {offsets = [0, 0], sizes = [26, 361], strides = [1, 1]} : vector<35x361xf32> to vector<26x361xf32>
    %13 = vector.extract_strided_slice %11 {offsets = [1, 0], sizes = [26, 361], strides = [1, 1]} : vector<35x361xf32> to vector<26x361xf32>
    %14 = vector.extract_strided_slice %11 {offsets = [2, 0], sizes = [26, 361], strides = [1, 1]} : vector<35x361xf32> to vector<26x361xf32>
    %15 = vector.extract_strided_slice %11 {offsets = [3, 0], sizes = [26, 361], strides = [1, 1]} : vector<35x361xf32> to vector<26x361xf32>
    %16 = vector.extract_strided_slice %11 {offsets = [4, 0], sizes = [26, 361], strides = [1, 1]} : vector<35x361xf32> to vector<26x361xf32>
    %17 = vector.extract_strided_slice %11 {offsets = [5, 0], sizes = [26, 361], strides = [1, 1]} : vector<35x361xf32> to vector<26x361xf32>
    %18 = vector.extract_strided_slice %11 {offsets = [6, 0], sizes = [26, 361], strides = [1, 1]} : vector<35x361xf32> to vector<26x361xf32>
    %19 = vector.extract_strided_slice %11 {offsets = [7, 0], sizes = [26, 361], strides = [1, 1]} : vector<35x361xf32> to vector<26x361xf32>
    %20 = vector.extract_strided_slice %11 {offsets = [8, 0], sizes = [26, 361], strides = [1, 1]} : vector<35x361xf32> to vector<26x361xf32>
    %21 = vector.extract_strided_slice %11 {offsets = [9, 0], sizes = [26, 361], strides = [1, 1]} : vector<35x361xf32> to vector<26x361xf32>
    %22 = tpu.concatenate %12, %13, %14, %15, %16, %17, %18, %19, %20, %21 in 1 : vector<26x361xf32>, vector<26x361xf32>, vector<26x361xf32>, vector<26x361xf32>, vector<26x361xf32>, vector<26x361xf32>, vector<26x361xf32>, vector<26x361xf32>, vector<26x361xf32>, vector<26x361xf32> -> vector<26x3610xf32>
    %23 = arith.truncf %22 : vector<26x3610xf32> to vector<26x3610xbf16>
    %c0_7 = arith.constant 0 : index
    %c0_8 = arith.constant 0 : index
    %24 = vector.load %arg4[%c0_7, %c0_8] : memref<3610x16xbf16, #tpu.memory_space<vmem>>, vector<3610x16xbf16>
    %cst_9 = arith.constant dense<0.000000e+00> : vector<26x16xf32>
    %25 = tpu.matmul %23, %24, %cst_9 {dimension_numbers = #tpu.dot_dimension_numbers<[1], [0], [0], [1], [0, 0, 1, 1], [], []>} : vector<26x3610xbf16>, vector<3610x16xbf16>, vector<26x16xf32> -> vector<26x16xf32>
    %c0_10 = arith.constant 0 : index
    %c0_11 = arith.constant 0 : index
    %26 = vector.load %arg5[%c0_10, %c0_11] : memref<1x16xf32, #tpu.memory_space<vmem>>, vector<1x16xf32>
    %27 = vector.broadcast %26 : vector<1x16xf32> to vector<26x16xf32>
    %28 = arith.addf %25, %27 : vector<26x16xf32>
    %c-8_i32 = arith.constant -8 : i32
    %29 = arith.addi %0, %c-8_i32 : i32
    %30 = tpu.iota {dimensions = array<i32: 0>} : vector<26x1xi32>
    %31 = vector.broadcast %29 : i32 to vector<26x1xi32>
    %32 = arith.addi %31, %30 : vector<26x1xi32>
    %c0_i32 = arith.constant 0 : i32
    %33 = vector.broadcast %c0_i32 : i32 to vector<26x1xi32>
    %34 = arith.cmpi sge, %32, %33 : vector<26x1xi32>
    %c8_i32_12 = arith.constant 8 : i32
    %35 = vector.broadcast %c8_i32_12 : i32 to vector<26x1xi32>
    %36 = arith.cmpi slt, %32, %35 : vector<26x1xi32>
    %37 = arith.andi %34, %36 : vector<26x1xi1>
    %38 = arith.extui %37 : vector<26x1xi1> to vector<26x1xi32>
    %39 = arith.sitofp %38 : vector<26x1xi32> to vector<26x1xf32>
    %40 = vector.broadcast %39 : vector<26x1xf32> to vector<26x16xf32>
    %41 = arith.mulf %28, %40 : vector<26x16xf32>
    %42 = vector.extract_strided_slice %41 {offsets = [0, 0], sizes = [17, 16], strides = [1, 1]} : vector<26x16xf32> to vector<17x16xf32>
    %43 = vector.extract_strided_slice %41 {offsets = [1, 0], sizes = [17, 16], strides = [1, 1]} : vector<26x16xf32> to vector<17x16xf32>
    %44 = vector.extract_strided_slice %41 {offsets = [2, 0], sizes = [17, 16], strides = [1, 1]} : vector<26x16xf32> to vector<17x16xf32>
    %45 = vector.extract_strided_slice %41 {offsets = [3, 0], sizes = [17, 16], strides = [1, 1]} : vector<26x16xf32> to vector<17x16xf32>
    %46 = vector.extract_strided_slice %41 {offsets = [4, 0], sizes = [17, 16], strides = [1, 1]} : vector<26x16xf32> to vector<17x16xf32>
    %47 = vector.extract_strided_slice %41 {offsets = [5, 0], sizes = [17, 16], strides = [1, 1]} : vector<26x16xf32> to vector<17x16xf32>
    %48 = vector.extract_strided_slice %41 {offsets = [6, 0], sizes = [17, 16], strides = [1, 1]} : vector<26x16xf32> to vector<17x16xf32>
    %49 = vector.extract_strided_slice %41 {offsets = [7, 0], sizes = [17, 16], strides = [1, 1]} : vector<26x16xf32> to vector<17x16xf32>
    %50 = vector.extract_strided_slice %41 {offsets = [8, 0], sizes = [17, 16], strides = [1, 1]} : vector<26x16xf32> to vector<17x16xf32>
    %51 = vector.extract_strided_slice %41 {offsets = [9, 0], sizes = [17, 16], strides = [1, 1]} : vector<26x16xf32> to vector<17x16xf32>
    %52 = tpu.concatenate %42, %43, %44, %45, %46, %47, %48, %49, %50, %51 in 1 : vector<17x16xf32>, vector<17x16xf32>, vector<17x16xf32>, vector<17x16xf32>, vector<17x16xf32>, vector<17x16xf32>, vector<17x16xf32>, vector<17x16xf32>, vector<17x16xf32>, vector<17x16xf32> -> vector<17x160xf32>
    %53 = arith.truncf %52 : vector<17x160xf32> to vector<17x160xbf16>
    %c0_13 = arith.constant 0 : index
    %c0_14 = arith.constant 0 : index
    %54 = vector.load %arg6[%c0_13, %c0_14] : memref<160x64xbf16, #tpu.memory_space<vmem>>, vector<160x64xbf16>
    %cst_15 = arith.constant dense<0.000000e+00> : vector<17x64xf32>
    %55 = tpu.matmul %53, %54, %cst_15 {dimension_numbers = #tpu.dot_dimension_numbers<[1], [0], [0], [1], [0, 0, 1, 1], [], []>} : vector<17x160xbf16>, vector<160x64xbf16>, vector<17x64xf32> -> vector<17x64xf32>
    %c0_16 = arith.constant 0 : index
    %c0_17 = arith.constant 0 : index
    %56 = vector.load %arg7[%c0_16, %c0_17] : memref<1x64xf32, #tpu.memory_space<vmem>>, vector<1x64xf32>
    %57 = vector.broadcast %56 : vector<1x64xf32> to vector<17x64xf32>
    %58 = arith.addf %55, %57 : vector<17x64xf32>
    %c-4_i32 = arith.constant -4 : i32
    %59 = arith.addi %0, %c-4_i32 : i32
    %60 = tpu.iota {dimensions = array<i32: 0>} : vector<17x1xi32>
    %61 = vector.broadcast %59 : i32 to vector<17x1xi32>
    %62 = arith.addi %61, %60 : vector<17x1xi32>
    %c0_i32_18 = arith.constant 0 : i32
    %63 = vector.broadcast %c0_i32_18 : i32 to vector<17x1xi32>
    %64 = arith.cmpi sge, %62, %63 : vector<17x1xi32>
    %c8_i32_19 = arith.constant 8 : i32
    %65 = vector.broadcast %c8_i32_19 : i32 to vector<17x1xi32>
    %66 = arith.cmpi slt, %62, %65 : vector<17x1xi32>
    %67 = arith.andi %64, %66 : vector<17x1xi1>
    %68 = arith.extui %67 : vector<17x1xi1> to vector<17x1xi32>
    %69 = arith.sitofp %68 : vector<17x1xi32> to vector<17x1xf32>
    %70 = vector.broadcast %69 : vector<17x1xf32> to vector<17x64xf32>
    %71 = arith.mulf %58, %70 : vector<17x64xf32>
    %72 = vector.extract_strided_slice %71 {offsets = [0, 0], sizes = [8, 64], strides = [1, 1]} : vector<17x64xf32> to vector<8x64xf32>
    %73 = vector.extract_strided_slice %71 {offsets = [1, 0], sizes = [8, 64], strides = [1, 1]} : vector<17x64xf32> to vector<8x64xf32>
    %74 = vector.extract_strided_slice %71 {offsets = [2, 0], sizes = [8, 64], strides = [1, 1]} : vector<17x64xf32> to vector<8x64xf32>
    %75 = vector.extract_strided_slice %71 {offsets = [3, 0], sizes = [8, 64], strides = [1, 1]} : vector<17x64xf32> to vector<8x64xf32>
    %76 = vector.extract_strided_slice %71 {offsets = [4, 0], sizes = [8, 64], strides = [1, 1]} : vector<17x64xf32> to vector<8x64xf32>
    %77 = vector.extract_strided_slice %71 {offsets = [5, 0], sizes = [8, 64], strides = [1, 1]} : vector<17x64xf32> to vector<8x64xf32>
    %78 = vector.extract_strided_slice %71 {offsets = [6, 0], sizes = [8, 64], strides = [1, 1]} : vector<17x64xf32> to vector<8x64xf32>
    %79 = vector.extract_strided_slice %71 {offsets = [7, 0], sizes = [8, 64], strides = [1, 1]} : vector<17x64xf32> to vector<8x64xf32>
    %80 = vector.extract_strided_slice %71 {offsets = [8, 0], sizes = [8, 64], strides = [1, 1]} : vector<17x64xf32> to vector<8x64xf32>
    %81 = vector.extract_strided_slice %71 {offsets = [9, 0], sizes = [8, 64], strides = [1, 1]} : vector<17x64xf32> to vector<8x64xf32>
    %82 = tpu.concatenate %72, %73, %74, %75, %76, %77, %78, %79, %80, %81 in 1 : vector<8x64xf32>, vector<8x64xf32>, vector<8x64xf32>, vector<8x64xf32>, vector<8x64xf32>, vector<8x64xf32>, vector<8x64xf32>, vector<8x64xf32>, vector<8x64xf32>, vector<8x64xf32> -> vector<8x640xf32>
    %83 = arith.truncf %82 : vector<8x640xf32> to vector<8x640xbf16>
    %c0_20 = arith.constant 0 : index
    %c0_21 = arith.constant 0 : index
    %84 = vector.load %arg8[%c0_20, %c0_21] : memref<640x256xbf16, #tpu.memory_space<vmem>>, vector<640x256xbf16>
    %cst_22 = arith.constant dense<0.000000e+00> : vector<8x256xf32>
    %85 = tpu.matmul %83, %84, %cst_22 {dimension_numbers = #tpu.dot_dimension_numbers<[1], [0], [0], [1], [0, 0, 1, 1], [], []>} : vector<8x640xbf16>, vector<640x256xbf16>, vector<8x256xf32> -> vector<8x256xf32>
    %c0_23 = arith.constant 0 : index
    %c0_24 = arith.constant 0 : index
    %86 = vector.load %arg9[%c0_23, %c0_24] : memref<1x256xf32, #tpu.memory_space<vmem>>, vector<1x256xf32>
    %87 = vector.broadcast %86 : vector<1x256xf32> to vector<8x256xf32>
    %88 = arith.addf %85, %87 : vector<8x256xf32>
    %89 = arith.truncf %88 : vector<8x256xf32> to vector<8x256xbf16>
    %c0_25 = arith.constant 0 : index
    %c0_26 = arith.constant 0 : index
    %90 = vector.load %arg10[%c0_25, %c0_26] : memref<256x1026xbf16, #tpu.memory_space<vmem>>, vector<256x1026xbf16>
    %cst_27 = arith.constant dense<0.000000e+00> : vector<8x1026xf32>
    %91 = tpu.matmul %89, %90, %cst_27 {dimension_numbers = #tpu.dot_dimension_numbers<[1], [0], [0], [1], [0, 0, 1, 1], [], []>} : vector<8x256xbf16>, vector<256x1026xbf16>, vector<8x1026xf32> -> vector<8x1026xf32>
    %c0_28 = arith.constant 0 : index
    %c0_29 = arith.constant 0 : index
    %92 = vector.load %arg11[%c0_28, %c0_29] : memref<1x1026xf32, #tpu.memory_space<vmem>>, vector<1x1026xf32>
    %93 = vector.broadcast %92 : vector<1x1026xf32> to vector<8x1026xf32>
    %94 = arith.addf %91, %93 : vector<8x1026xf32>
    %c0_30 = arith.constant 0 : index
    %c0_31 = arith.constant 0 : index
    %c0_32 = arith.constant 0 : index
    %95 = vector.load %arg12[%c0_30, %c0_31, %c0_32] : memref<1x8x1026xf32, #tpu.memory_space<vmem>>, vector<1x8x1026xf32>
    %96 = vector.shape_cast %95 : vector<1x8x1026xf32> to vector<8x1026xf32>
    %97 = vector.shape_cast %94 : vector<8x1026xf32> to vector<1x8x1026xf32>
    tpu.vector_store %arg12[%c0_30, %c0_31, %c0_32], %97 {strides = array<i32>} : memref<1x8x1026xf32, #tpu.memory_space<vmem>>, vector<1x8x1026xf32>,
    return
  }
  func.func @transform_0(%arg0: i32, %arg1: i32) -> (i32, i32, i32, i32) {
    %c0_i32 = arith.constant 0 : i32
    %c0_i32_0 = arith.constant 0 : i32
    %c0_i32_1 = arith.constant 0 : i32
    return %arg0, %arg1, %c0_i32, %c0_i32_0 : i32, i32, i32, i32
  }
  func.func @transform_1(%arg0: i32, %arg1: i32) -> (i32, i32) {
    %c0_i32 = arith.constant 0 : i32
    %c0_i32_0 = arith.constant 0 : i32
    %c0_i32_1 = arith.constant 0 : i32
    return %c0_i32, %c0_i32_0 : i32, i32
  }
  func.func @transform_2(%arg0: i32, %arg1: i32) -> (i32, i32) {
    %c0_i32 = arith.constant 0 : i32
    %c0_i32_0 = arith.constant 0 : i32
    %c0_i32_1 = arith.constant 0 : i32
    return %c0_i32, %c0_i32_0 : i32, i32
  }
  func.func @transform_3(%arg0: i32, %arg1: i32) -> (i32, i32) {
    %c0_i32 = arith.constant 0 : i32
    %c0_i32_0 = arith.constant 0 : i32
    %c0_i32_1 = arith.constant 0 : i32
    return %c0_i32, %c0_i32_0 : i32, i32
  }
  func.func @transform_4(%arg0: i32, %arg1: i32) -> (i32, i32) {
    %c0_i32 = arith.constant 0 : i32
    %c0_i32_0 = arith.constant 0 : i32
    %c0_i32_1 = arith.constant 0 : i32
    return %c0_i32, %c0_i32_0 : i32, i32
  }
  func.func @transform_5(%arg0: i32, %arg1: i32) -> (i32, i32) {
    %c0_i32 = arith.constant 0 : i32
    %c0_i32_0 = arith.constant 0 : i32
    %c0_i32_1 = arith.constant 0 : i32
    return %c0_i32, %c0_i32_0 : i32, i32
  }
  func.func @transform_6(%arg0: i32, %arg1: i32) -> (i32, i32) {
    %c0_i32 = arith.constant 0 : i32
    %c0_i32_0 = arith.constant 0 : i32
    %c0_i32_1 = arith.constant 0 : i32
    return %c0_i32, %c0_i32_0 : i32, i32
  }
  func.func @transform_7(%arg0: i32, %arg1: i32) -> (i32, i32) {
    %c0_i32 = arith.constant 0 : i32
    %c0_i32_0 = arith.constant 0 : i32
    %c0_i32_1 = arith.constant 0 : i32
    return %c0_i32, %c0_i32_0 : i32, i32
  }
  func.func @transform_8(%arg0: i32, %arg1: i32) -> (i32, i32) {
    %c0_i32 = arith.constant 0 : i32
    %c0_i32_0 = arith.constant 0 : i32
    %c0_i32_1 = arith.constant 0 : i32
    return %c0_i32, %c0_i32_0 : i32, i32
  }
  func.func @transform_9(%arg0: i32, %arg1: i32) -> (i32, i32) {
    %c0_i32 = arith.constant 0 : i32
    %c0_i32_0 = arith.constant 0 : i32
    %c0_i32_1 = arith.constant 0 : i32
    return %c0_i32, %c0_i32_0 : i32, i32
  }
  func.func @transform_10(%arg0: i32, %arg1: i32) -> (i32, i32, i32) {
    %c0_i32 = arith.constant 0 : i32
    %c0_i32_0 = arith.constant 0 : i32
    return %arg0, %arg1, %c0_i32 : i32, i32, i32
  }
}

</mosaic_0001>

<bundles_post_ra>
// kernel: tpu_custom_call.1
= control target key start
LH: loop header
LB: loop body
LE: loop exit
PB: predicated region body
PF: predicated region fallthrough
CT: control target
= control target key end

     0   :  { %15 = vsyncpa [#allocation3], 0  ;;  %s12168_s0 = inlined_call_operand.vmem [shape: s32[2,1,35,1], index: 0, kind: input, shape index: {}]   ;;  %s12169_s1 = inlined_call_operand.vmem [shape: bf16[361,361], index: 1, kind: input, shape index: {}]   ;;  %s12170_s2 = inlined_call_operand.vmem [shape: bf16[3610,16], index: 2, kind: input, shape index: {}]   ;;  %s12171_s3 = inlined_call_operand.vmem [shape: f32[1,16], index: 3, kind: input, shape index: {}]   ;;  %s12172_s4 = inlined_call_operand.vmem [shape: bf16[160,64], index: 4, kind: input, shape index: {}]   ;;  %s12173_s5 = inlined_call_operand.vmem [shape: f32[1,64], index: 5, kind: input, shape index: {}]   ;;  %s12174_s6 = inlined_call_operand.vmem [shape: bf16[640,256], index: 6, kind: input, shape index: {}]   ;;  %s12175_s7 = inlined_call_operand.vmem [shape: f32[1,256], index: 7, kind: input, shape index: {}]   ;;  %s12176_s8 = inlined_call_operand.vmem [shape: bf16[256,1026], index: 8, kind: input, shape index: {}]   ;;  %s12177_s9 = inlined_call_operand.vmem [shape: f32[1,1026], index: 9, kind: input, shape index: {}]   ;;  %s12178_s10 = inlined_call_operand.hbm [shape: f32[2,8,1026], index: 10, kind: output, shape index: {}]  }
   0x1   :  { %17 = vsyncpa [#allocation3 + $0x1], 0  ;;  %s8983_s13 = smov 0   ;;  %s8985_s14 = smov 0  }
   0x2   :  { %s8987_s15 = smov 0   ;;  %s8989_s16 = smov 0  }
   0x3   :  { %s8991_s17 = smov 0   ;;  %s8993_s18 = smov 0  }
   0x4 LB: > { %s6702_s19 = sadd.s32 4294967295, %s8904_s18   ;;  %s6703_s20 = sadd.s32 4294967294, %s8904_s18   ;;  %s8904_s18 = sphi %s8993_s18, %s23_s18   ;;  %s8900_s17 = sphi %s8991_s17, %s12266_s17   ;;  %s8896_s16 = sphi %s8989_s16, %s12265_s16   ;;  %s8892_s15 = sphi %s8987_s15, %s12264_s15   ;;  %s8888_s14 = sphi %s8985_s14, %s12263_s14   ;;  %s8884_s13 = sphi %s8983_s13, %s12262_s13  }
   0x5   : > { %s35_s21 = sadd.s32 1, %s8900_s17  ;;  %s261_s22 = sadd.s32 1, %s8892_s15 }
   0x6   : > { %p37_p0 = scmp.ge.s32.totalorder %s35_s21, 2  ;;  %p271_p1 = scmp.ne.s32.totalorder %s8892_s15, %s8888_s14 }
   0x7   : > { %p272_p2 = scmp.eq.s32.totalorder %s6702_s19, 1  ;;  %p277_p3 = scmp.ne.s32.totalorder %s8888_s14, %s8884_s13 }
   0x8   : > { %s12268_s21 = smov (%p37_p0, %s35_s21), 0  ;;  %p278_p5 = scmp.eq.s32.totalorder %s6703_s20, 1 }
   0x9   : > { %12199 = sst [smem:[#allocation5_spill]] %s12268_s21  ;;  %p9023_p4 = por %p272_p2, %p271_p1 }
   0xa   : > { %s256_s24 = ssub.s32 %s8900_s17, %s12268_s21  ;;  %p6706_p6 = scmp.ge.s32.totalorder %s8904_s18, 1 }
   0xb   : > { %p259_p7 = scmp.eq.s32.totalorder %s256_s24, 0  ;;  %p9030_p8 = por %p278_p5, %p277_p3 }
   0xc   : > { %p335_p9 = scmp.lt.s32.totalorder %s8904_s18, 3 }
   0xd   : > { %s9036_s26 = scalar_select %p259_p7, %s8892_s15, %s261_s22  }
   0xe   : > { %p336_p10 = pnand %p6706_p6, %p335_p9 }
  0x10   : > { %339 = sbr.rel (%p336_p10) target bundleno = 1932 (0x78c), region = 60 }
  0x15   : > { %p377_p11 = scmp.lt.s32.totalorder %s8896_s16, 1  ;;  %v8172_v0 = vld [vmem:[%s12169_s1 + $0xac] ss:$12 sps:$4 sm:$0xff]   ;;  %v12183_v1 = vmov 0   ;;  %v8174_v2 = vld [vmem:[%s12169_s1 + $0xa8] ss:$12 sps:$4 sm:$0xff]   ;;  %v12182_v58 = vlaneseq }
  0x16   : > { %7855 = vset.pattern.permute.xlu0 %v12183_v1  ;;  %7856 = vset.pattern.permute.xlu1 %v12183_v1  ;;  %v8175_v3 = vld [vmem:[%s12169_s1 + $0x94] ss:$12 sps:$4 sm:$0xff]   ;;  %v8177_v4 = vld [vmem:[%s12169_s1 + $0x90] ss:$12 sps:$4 sm:$0xff]   ;;  %v8180_v8 = vld [vmem:[%s12169_s1 + $0x78] ss:$12 sps:$4 sm:$0xff]  }
  0x17   : > { %s378_s11 = scalar_select %p377_p11, %s8896_s16, 1  ;;  %931 = vmatprep.subr.bf16.mxu0 %v8172_v0  ;;  %1024 = vmatprep.mubr.bf16.mxu1 %v12183_v1  ;;  %v8178_v5 = vld [vmem:[%s12169_s1 + $0x7c] ss:$12 sps:$4 sm:$0xff]   ;;  %v8181_v9 = vld [vmem:[%s12169_s1 + $0x64] ss:$12 sps:$4 sm:$0xff]   ;;  %vm918_vm0 = vcmask 1043456  }
  0x18   : > { %932 = vmatpush1.bf16.msra.mxu0 %v8174_v2  ;;  %v8183_v12 = vld [vmem:[%s12169_s1 + $0x60] ss:$12 sps:$4 sm:$0xff]   ;;  %vm919_vm1 = vcmask 1044480   ;;  %v8907_v13 = vmov 65535   ;;  %v8186_v17 = vld [vmem:[%s12169_s1 + $0x48] ss:$12 sps:$4 sm:$0xff]  }
  0x19   : > { %s7777_s24 = smul.u32 40, %s378_s11  ;;  %933 = vmatprep.subr.bf16.mxu0 %v8175_v3  ;;  %v920_v14 = vsel %vm918_vm0, 4294967295, %v8907_v13  ;;  %v8184_v15 = vld [vmem:[%s12169_s1 + $0x4c] ss:$12 sps:$4 sm:$0xff]   ;;  %v8187_v19 = vld [vmem:[%s12169_s1 + $0x34] ss:$12 sps:$4 sm:$0xff]  }
  0x1a   : > { %v9078_v18 = vsel %vm919_vm1, %v920_v14, 0  ;;  %v8201_v20 = vld [vmem:[%s12169_s1 + $0x214] ss:$12 sps:$4 sm:$0x1f]   ;;  %v8189_v23 = vld [vmem:[%s12169_s1 + $0x30] ss:$12 sps:$4 sm:$0xff]  }
  0x1b   : > { %s385_s21 = scalar_lea.vmem %s12168_s0, %s7777_s24  ;;  %v8205_v21 = vld [vmem:[%s12169_s1 + $0x210] ss:$12 sps:$4 sm:$0x1f]   ;;  %v926_v22 = vand.u32 %v8201_v20, %v9078_v18  ;;  %v8211_v27 = vld [vmem:[%s12169_s1 + $0x1f8] ss:$12 sps:$4 sm:$0xff]   ;;  %v9194_v59 = vand.u32 127, %v12182_v58 }
  0x1c   : > { %v388_v6 = vld [vmem:[%s385_s21] sm:$0xff]  ;;  %v390_v7 = vld [vmem:[%s385_s21 + $0x10] sm:$0xff]  ;;  %934 = vmatpush1.bf16.msra.mxu0 %v8177_v4  ;;  %v389_v10 = vld [vmem:[%s385_s21 + $0x8] sm:$0xff]  ;;  %v923_v24 = vand.u32 %v8205_v21, %v9078_v18  ;;  %vm908_vm3 = vcmask 859136   ;;  %v8909_v13 = vmov 1.0|1.0  }
  0x1d   : > { %398 = vperm.xlu0 %7855, %v388_v6   ;;  %404 = vperm.xlu1 %7856, %v390_v7   ;;  %v391_v11 = vld [vmem:[%s385_s21 + $0x18] sm:$0xff]  ;;  %v392_v16 = vld [vmem:[%s385_s21 + $0x20] sm:$0x7]  ;;  %v8214_v28 = vld [vmem:[%s12169_s1 + $0x1e4] ss:$12 sps:$4 sm:$0xff]   ;;  %v396_v61 = vadd.s32 256, %v9194_v59 }
  0x1e   : > { %935 = vmatprep.subr.bf16.mxu0 %v8178_v5  ;;  %v8208_v25 = vld [vmem:[%s12169_s1 + $0x1fc] ss:$12 sps:$4 sm:$0xff]   ;;  %994 = vmatprep.subr.bf16.mxu1 %v926_v22  ;;  %v8192_v29 = vld [vmem:[%s12169_s1 + $0x18] ss:$12 sps:$4 sm:$0xff]   ;;  %v8217_v31 = vld [vmem:[%s12169_s1 + $0x1e0] ss:$12 sps:$4 sm:$0xff]  }
  0x1f   : > { %v8190_v26 = vld [vmem:[%s12169_s1 + $0x1c] ss:$12 sps:$4 sm:$0xff]   ;;  %995 = vmatpush1.bf16.msra.mxu1 %v923_v24  ;;  %v8193_v30 = vld [vmem:[%s12169_s1 + $0x4] ss:$12 sps:$4 sm:$0xff]   ;;  %v8220_v32 = vld [vmem:[%s12169_s1 + $0x1cc] ss:$12 sps:$4 sm:$0xff]  }
  0x20   : > { %936 = vmatpush1.bf16.msra.mxu0 %v8180_v8  ;;  %996 = vmatprep.subr.bf16.mxu1 %v8208_v25  ;;  %v8195_v33 = vld [vmem:[%s12169_s1] ss:$12 sps:$4 sm:$0xff]   ;;  %v8223_v35 = vld [vmem:[%s12169_s1 + $0x1c8] ss:$12 sps:$4 sm:$0xff]   ;;  %v8229_v39 = vld [vmem:[%s12169_s1 + $0x1b0] ss:$12 sps:$4 sm:$0xff]  }
  0x21   : > { %401 = vperm.xlu0 %7855, %v389_v10   ;;  %407 = vperm.xlu1 %7856, %v391_v11   ;;  %v8196_v34 = vld [vmem:[%s12169_s1 + $0x16c] ss:$12 sps:$4 sm:$0xff]   ;;  %v8226_v36 = vld [vmem:[%s12169_s1 + $0x1b4] ss:$12 sps:$4 sm:$0xff]   ;;  %v8232_v40 = vld [vmem:[%s12169_s1 + $0x19c] ss:$12 sps:$4 sm:$0xff]  }
  0x22   : > { %937 = vmatprep.subr.bf16.mxu0 %v8181_v9  ;;  %v8198_v37 = vld [vmem:[%s12169_s1 + $0x168] ss:$12 sps:$4 sm:$0xff]   ;;  %v8204_v41 = vld [vmem:[%s12169_s1 + $0x150] ss:$12 sps:$4 sm:$0xff]   ;;  %v8235_v43 = vld [vmem:[%s12169_s1 + $0x198] ss:$12 sps:$4 sm:$0xff]  }
  0x23   : > { %997 = vmatpush1.bf16.msra.mxu1 %v8211_v27  ;;  %v8199_v38 = vld [vmem:[%s12169_s1 + $0x154] ss:$12 sps:$4 sm:$0xff]   ;;  %v8206_v42 = vld [vmem:[%s12169_s1 + $0x13c] ss:$12 sps:$4 sm:$0xff]   ;;  %v8238_v44 = vld [vmem:[%s12169_s1 + $0x184] ss:$12 sps:$4 sm:$0xff]  }
  0x24   : > { %938 = vmatpush1.bf16.msra.mxu0 %v8183_v12  ;;  %998 = vmatprep.subr.bf16.mxu1 %v8214_v28  ;;  %v8210_v45 = vld [vmem:[%s12169_s1 + $0x138] ss:$12 sps:$4 sm:$0xff]   ;;  %v8241_v47 = vld [vmem:[%s12169_s1 + $0x180] ss:$12 sps:$4 sm:$0xff]   ;;  %v8242_v48 = vld [vmem:[%s12169_s1 + $0x170] ss:$12 sps:$4 sm:$0xff]  }
  0x25   : > { %410 = vperm.xlu0 %7855, %v392_v16   ;;  %939 = vmatprep.subr.bf16.mxu0 %v8184_v15  ;;  %v8212_v46 = vld [vmem:[%s12169_s1 + $0x124] ss:$12 sps:$4 sm:$0xff]   ;;  %v8216_v49 = vld [vmem:[%s12169_s1 + $0x120] ss:$12 sps:$4 sm:$0xff]   ;;  %v8222_v51 = vld [vmem:[%s12169_s1 + $0x108] ss:$12 sps:$4 sm:$0xff]  }
  0x26   : > { %v8218_v50 = vld [vmem:[%s12169_s1 + $0x10c] ss:$12 sps:$4 sm:$0xff]   ;;  %v8224_v52 = vld [vmem:[%s12169_s1 + $0xf4] ss:$12 sps:$4 sm:$0xff]   ;;  %v8228_v53 = vld [vmem:[%s12169_s1 + $0xf0] ss:$12 sps:$4 sm:$0xff]  }
  0x27   : > { %999 = vmatpush1.bf16.msra.mxu1 %v8217_v31  ;;  %v8230_v54 = vld [vmem:[%s12169_s1 + $0xdc] ss:$12 sps:$4 sm:$0xff]   ;;  %v8234_v55 = vld [vmem:[%s12169_s1 + $0xd8] ss:$12 sps:$4 sm:$0xff]   ;;  %v8240_v57 = vld [vmem:[%s12169_s1 + $0xc0] ss:$12 sps:$4 sm:$0xff]  }
  0x28   : > { %940 = vmatpush1.bf16.msra.mxu0 %v8186_v17  ;;  %1000 = vmatprep.subr.bf16.mxu1 %v8220_v32  ;;  %v8236_v56 = vld [vmem:[%s12169_s1 + $0xc4] ss:$12 sps:$4 sm:$0xff]   ;;  %v8264_v60 = vld [vmem:[%s12170_s2 + $0x78] sm:$0xff]   ;;  %v395_v62 = vadd.s32 128, %v9194_v59  ;;  %v12180_v7 = vmov 0.0   ;;  %v8268_v24 = vld [vmem:[%s12170_s2 + $0x68] sm:$0xff]  }
  0x29   : > { %941 = vmatprep.subr.bf16.mxu0 %v8187_v19  ;;  %v8243_v3 = vld [vmem:[%s12169_s1 + $0xb0] ss:$12 sps:$4 sm:$0xff]   ;;  %v8244_v5 = vld [vmem:[%s12169_s1 + $0x158] ss:$12 sps:$4 sm:$0xff]   ;;  %v8246_v19 = vld [vmem:[%s12169_s1 + $0x140] ss:$12 sps:$4 sm:$0xff]  }
  0x2a   : > { %v8265_v6 = vld [vmem:[%s12170_s2 + $0x38] sm:$0xff]   ;;  %v8266_v11 = vld [vmem:[%s12170_s2 + $0x70] sm:$0xff]   ;;  %v8247_v27 = vld [vmem:[%s12169_s1 + $0x80] ss:$12 sps:$4 sm:$0xff]   ;;  %s8911_s24 = smov 105   ;;  %s8912_s12 = smov 82  }
  0x2b   : > { %1001 = vmatpush1.bf16.msra.mxu1 %v8223_v35  ;;  %v8245_v16 = vld [vmem:[%s12169_s1 + $0x98] ss:$12 sps:$4 sm:$0xff]   ;;  %v8267_v20 = vld [vmem:[%s12170_s2 + $0x30] sm:$0xff]   ;;  %s8913_s11 = smov 59   ;;  %s8914_s21 = smov 36  }
  0x2c   : > { %942 = vmatpush1.bf16.msra.mxu0 %v8189_v23  ;;  %1002 = vmatprep.subr.bf16.mxu1 %v8226_v36  ;;  %v8270_v31 = vld [vmem:[%s12170_s2 + $0x60] sm:$0xff]   ;;  %v8272_v36 = vld [vmem:[%s12170_s2 + $0x58] sm:$0xff]   ;;  %v8291_v14 = vld [vmem:[%s12170_s2 + $0x90] sm:$0xff]   ;;  %s8916_s22 = smov 118   ;;  %s8917_s27 = smov 95  }
  0x2d   : > { %943 = vmatprep.subr.bf16.mxu0 %v8190_v26  ;;  %v8271_v35 = vld [vmem:[%s12170_s2 + $0x20] sm:$0xff]   ;;  %s8918_s19 = smov 72   ;;  %s8919_s30 = smov 49  }
  0x2e   : > { %s8925_s28 = smov 80   ;;  %s8926_s29 = smov 112  }
  0x2f   : > { %1003 = vmatpush1.bf16.msra.mxu1 %v8229_v39  ;;  %v8273_v39 = vld [vmem:[%s12170_s2 + $0x18] sm:$0xff]  }
  0x30   : > { %944 = vmatpush1.bf16.msra.mxu0 %v8192_v29  ;;  %1004 = vmatprep.subr.bf16.mxu1 %v8232_v40  ;;  %v8248_v29 = vld [vmem:[%s12169_s1 + $0x128] ss:$12 sps:$4 sm:$0xff]  }
  0x31   : > { %945 = vmatprep.subr.bf16.mxu0 %v8193_v30  ;;  %v8269_v30 = vld [vmem:[%s12170_s2 + $0x28] sm:$0xff]  }
  0x33   : > { %1005 = vmatpush1.bf16.msra.mxu1 %v8235_v43  ;;  %v8255_v43 = vld [vmem:[%s12169_s1 + $0x20] ss:$12 sps:$4 sm:$0xff]  }
  0x34   : > { %946 = vmatpush1.bf16.msra.mxu0 %v8195_v33  ;;  %1006 = vmatprep.subr.bf16.mxu1 %v8238_v44  ;;  %v8249_v33 = vld [vmem:[%s12169_s1 + $0x68] ss:$12 sps:$4 sm:$0xff]  }
  0x35   : > { %947 = vmatprep.subr.bf16.mxu0 %v8196_v34  ;;  %v8250_v34 = vld [vmem:[%s12169_s1 + $0x110] ss:$12 sps:$4 sm:$0xff]   ;;  %v8256_v44 = vld [vmem:[%s12169_s1 + $0xc8] ss:$12 sps:$4 sm:$0xff]  }
  0x37   : > { %1007 = vmatpush1.bf16.msra.mxu1 %v8241_v47 }
  0x38   : > { %948 = vmatpush2.bf16.msra.mxu0 %v8198_v37  ;;  %7279 = vmatprep.subr.bf16.mxu1 %v8242_v48  ;;  %v8251_v37 = vld [vmem:[%s12169_s1 + $0x50] ss:$12 sps:$4 sm:$0xff]   ;;  %v8258_v48 = vld [vmem:[%s12169_s1 + $0x200] ss:$12 sps:$4 sm:$0xff]  }
  0x39   : > { %949 = vmatprep.subr.bf16.mxu0 %v8199_v38  ;;  %v8252_v38 = vld [vmem:[%s12169_s1 + $0xf8] ss:$12 sps:$4 sm:$0xff]  }
  0x3c   : > { %950 = vmatpush2.bf16.msra.mxu0 %v8204_v41  ;;  %v8253_v41 = vld [vmem:[%s12169_s1 + $0x38] ss:$12 sps:$4 sm:$0xff]  }
  0x3d   : > { %951 = vmatprep.subr.bf16.mxu0 %v8206_v42  ;;  %v8254_v42 = vld [vmem:[%s12169_s1 + $0xe0] ss:$12 sps:$4 sm:$0xff]  }
  0x40   : > { %952 = vmatpush2.bf16.msra.mxu0 %v8210_v45  ;;  %v8203_v45 = vld [vmem:[%s12169_s1 + $0x218] ss:$12 sps:$4 sm:$0x1f]  }
  0x41   : > { %953 = vmatprep.subr.bf16.mxu0 %v8212_v46  ;;  %v8257_v46 = vld [vmem:[%s12169_s1 + $0x8] ss:$12 sps:$4 sm:$0xff]   ;;  %v929_v47 = vand.u32 %v8203_v45, %v9078_v18 }
  0x42   : > { %v8259_v18 = vld [vmem:[%s12169_s1 + $0x1e8] ss:$12 sps:$4 sm:$0xff]  }
  0x44   : > { %954 = vmatpush2.bf16.msra.mxu0 %v8216_v49  ;;  %v8260_v49 = vld [vmem:[%s12169_s1 + $0x1d0] ss:$12 sps:$4 sm:$0xff]  }
  0x45   : > { %955 = vmatprep.subr.bf16.mxu0 %v8218_v50  ;;  %v8261_v50 = vld [vmem:[%s12169_s1 + $0x1b8] ss:$12 sps:$4 sm:$0xff]  }
  0x48   : > { %956 = vmatpush2.bf16.msra.mxu0 %v8222_v51  ;;  %v8262_v51 = vld [vmem:[%s12169_s1 + $0x1a0] ss:$12 sps:$4 sm:$0xff]  }
  0x49   : > { %957 = vmatprep.subr.bf16.mxu0 %v8224_v52  ;;  %v8263_v52 = vld [vmem:[%s12169_s1 + $0x188] ss:$12 sps:$4 sm:$0xff]  }
  0x4c   : > { %958 = vmatpush2.bf16.msra.mxu0 %v8228_v53  ;;  %v8274_v53 = vld [vmem:[%s12170_s2 + $0x50] sm:$0xff]  }
  0x4d   : > { %959 = vmatprep.subr.bf16.mxu0 %v8230_v54  ;;  %v8275_v54 = vld [vmem:[%s12170_s2 + $0x10] sm:$0xff]  }
  0x50   : > { %960 = vmatpush2.bf16.msra.mxu0 %v8234_v55  ;;  %v8276_v55 = vld [vmem:[%s12170_s2 + $0x48] sm:$0xff]  }
  0x51   : > { %961 = vmatprep.subr.bf16.mxu0 %v8236_v56  ;;  %v8277_v56 = vld [vmem:[%s12170_s2 + $0x8] sm:$0xff]  }
  0x54   : > { %962 = vmatpush2.bf16.msra.mxu0 %v8240_v57  ;;  %v8278_v57 = vld [vmem:[%s12170_s2 + $0x40] sm:$0xff]  }
  0x55   : > { %7323 = vmatprep.subr.bf16.mxu0 %v8264_v60  ;;  %v8280_v60 = vld [vmem:[%s12170_s2 + $0xf8] sm:$0xff]  }
  0x98   : > { %v399_v63 = vpop.permute.xlu0 %398  ;;  %v405_v0 = vpop.permute.xlu1 %404 }
  0x99   : > { %vm414_vm2 = vcmp.eq.s32.totalorder %v396_v61, %v399_v63  ;;  %vm412_vm4 = vcmp.eq.s32.totalorder %v9194_v59, %v399_v63  ;;  %vm413_vm5 = vcmp.eq.s32.totalorder %v395_v62, %v399_v63  ;;  %vm419_vm9 = vcmp.eq.s32.totalorder %v395_v62, %v405_v0  ;;  %v8283_v63 = vld [vmem:[%s12170_s2 + $0xb0] sm:$0xff]  }
  0x9a   : > { %v429_v8 = vsel %vm414_vm2, 1.0, %v12180_v7  ;;  %vm418_vm11 = vcmp.eq.s32.totalorder %v9194_v59, %v405_v0  ;;  %vm420_vm13 = vcmp.eq.s32.totalorder %v396_v61, %v405_v0  ;;  %v8284_v0 = vld [vmem:[%s12170_s2 + $0xe8] sm:$0xff]  }
  0x9b   : > { %v435_v21 = vsel %vm420_vm13, 1.0, %v12180_v7  ;;  %vm1458_vm13 = vcmask 1042432  }
  0x9c   : > { %v402_v2 = vpop.permute.xlu0 %401  ;;  %v408_v4 = vpop.permute.xlu1 %407 }
  0x9d   : > { %vm415_vm6 = vcmp.eq.s32.totalorder %v9194_v59, %v402_v2  ;;  %vm417_vm7 = vcmp.eq.s32.totalorder %v396_v61, %v402_v2  ;;  %vm416_vm8 = vcmp.eq.s32.totalorder %v395_v62, %v402_v2  ;;  %vm422_vm12 = vcmp.eq.s32.totalorder %v395_v62, %v408_v4  ;;  %v8285_v2 = vld [vmem:[%s12170_s2 + $0xa8] sm:$0xff]  }
  0x9e   : > { %v432_v9 = vsel %vm417_vm7, 1.0, %v12180_v7  ;;  %vm9214_vm10 = vmpackc.low %vm416_vm8, %vm413_vm5  ;;  %vm421_vm15 = vcmp.eq.s32.totalorder %v9194_v59, %v408_v4  ;;  %vm423_vm2 = vcmp.eq.s32.totalorder %v396_v61, %v408_v4  ;;  %v8287_v4 = vld [vmem:[%s12170_s2 + $0xa0] sm:$0xff]  }
  0x9f   : > { %v9222_v12 = vpack.c.bf16 %v432_v9, %v429_v8  ;;  %6778 = vmatprep.mubr.msk.bf16.mxu0 %vm9214_vm10, %v8909_v13  ;;  %vm9231_vm14 = vmpackc.low %vm415_vm6, %vm412_vm4  ;;  %v438_v22 = vsel %vm423_vm2, 1.0, %v12180_v7  ;;  %v8290_v8 = vld [vmem:[%s12170_s2 + $0xd0] sm:$0xff]   ;;  %vm1247_vm2 = vcmask 1045504  }
  0xa0   : > { %6780 = vmatmul.mubr.msk.bf16.vlgmr.msra.gmra.mxu0 %vm9231_vm14, %v8909_v13  ;;  %v411_v15 = vpop.permute.xlu0 %410  ;;  %vm9243_vm5 = vmpackc.low %vm422_vm12, %vm419_vm9  ;;  %v9281_v28 = vpack.c.bf16 %v438_v22, %v435_v21  ;;  %v8293_v22 = vld [vmem:[%s12170_s2 + $0x88] sm:$0xff]   ;;  %vm1177_vm12 = vcmask 1046528  }
  0xa1   : > { %vm425_vm4 = vcmp.eq.s32.totalorder %v395_v62, %v411_v15  ;;  %vm426_vm6 = vcmp.eq.s32.totalorder %v396_v61, %v411_v15  ;;  %6789 = vmatmul.mubr.msk.bf16.vlgmr.msra.gmra.mxu1 %vm908_vm3, %v9222_v12  ;;  %6782 = vmatprep.mubr.msk.bf16.mxu0 %vm9243_vm5, %v8909_v13  ;;  %vm9264_vm7 = vmpackc.low %vm421_vm15, %vm418_vm11  ;;  %vm424_vm9 = vcmp.eq.s32.totalorder %v9194_v59, %v411_v15  ;;  %v8279_v59 = vld [vmem:[%s12170_s2] sm:$0xff]   ;;  %v8281_v61 = vld [vmem:[%s12170_s2 + $0xb8] sm:$0xff]   ;;  %vm1525_vm15 = vcmask 1041408  }
  0xa2   : > { %7280 = vmatpush3.bf16.msra.mxu1 %v8243_v3  ;;  %1034 = vmatprep.mubr.bf16.mxu1 %v12183_v1  ;;  %v441_v25 = vsel %vm426_vm6, 1.0, %v12180_v7  ;;  %vm9273_vm8 = vmpackc.low %vm425_vm4, %vm425_vm4  ;;  %v8282_v62 = vld [vmem:[%s12170_s2 + $0xf0] sm:$0xff]   ;;  %v8286_v3 = vld [vmem:[%s12170_s2 + $0xe0] sm:$0xff]   ;;  %vm1433_vm4 = vcmask 293888   ;;  %vm1504_vm6 = vcmask 105472  }
  0xa3   : > { %7281 = vmatprep.subr.bf16.mxu1 %v8244_v5  ;;  %7324 = vmatpush3.bf16.msra.mxu0 %v8265_v6  ;;  %vm9292_vm11 = vmpackc.low %vm424_vm9, %vm424_vm9  ;;  %v9326_v40 = vpack.c.bf16 %v441_v25, %v441_v25  ;;  %v8288_v5 = vld [vmem:[%s12170_s2 + $0xd8] sm:$0xff]   ;;  %v8292_v15 = vld [vmem:[%s12170_s2 + $0xc8] sm:$0xff]   ;;  %vm1700_vm9 = vcmask 588800  }
  0xa4   : > { %7325 = vmatprep.subr.bf16.mxu0 %v8266_v11  ;;  %v8289_v6 = vld [vmem:[%s12170_s2 + $0x98] sm:$0xff]  }
  0xa6   : > { %7282 = vmatpush3.bf16.msra.mxu1 %v8245_v16 }
  0xa7   : > { %7283 = vmatprep.subr.bf16.mxu1 %v8246_v19  ;;  %7326 = vmatpush3.bf16.msra.mxu0 %v8267_v20 }
  0xa8   : > { %6784 = vmatmul.mubr.msk.bf16.gmra.mxu0 %vm9264_vm7, %v8909_v13  ;;  %7327 = vmatprep.subr.bf16.mxu0 %v8268_v24 }
  0xa9   : > { %6786 = vmatprep.mubr.msk.bf16.mxu0 %vm9273_vm8, %v8909_v13  ;;  %6790 = vmatmul.mubr.msk.bf16.gmra.mxu1 %vm908_vm3, %v9281_v28 }
  0xaa   : > { %7284 = vmatpush3.bf16.msra.mxu1 %v8247_v27  ;;  %1044 = vmatprep.mubr.bf16.mxu1 %v12183_v1 }
  0xab   : > { %7285 = vmatprep.subr.bf16.mxu1 %v8248_v29  ;;  %7328 = vmatpush3.bf16.msra.mxu0 %v8269_v30 }
  0xac   : > { %7329 = vmatprep.subr.bf16.mxu0 %v8270_v31  ;;  %v8294_v31 = vld [vmem:[%s12170_s2 + $0xc0] sm:$0xff]  }
  0xae   : > { %7286 = vmatpush3.bf16.msra.mxu1 %v8249_v33 }
  0xaf   : > { %7287 = vmatprep.subr.bf16.mxu1 %v8250_v34  ;;  %7330 = vmatpush3.bf16.msra.mxu0 %v8271_v35 }
  0xb0   : > { %6788 = vmatmul.mubr.msk.bf16.gmra.mxu0 %vm9292_vm11, %v8909_v13  ;;  %7331 = vmatprep.subr.bf16.mxu0 %v8272_v36 }
  0xb1   : > { %6791 = vmatmul.mubr.msk.bf16.gmra.mxu1 %vm908_vm3, %v9326_v40 }
  0xb2   : > { %7288 = vmatpush3.bf16.msra.mxu1 %v8251_v37  ;;  %6793 = vmatprep.mubr.msk.bf16.mxu1 %vm9214_vm10, %v8909_v13  ;;  %vm8910_vm10 = vmmov 0  }
  0xb3   : > { %7289 = vmatprep.subr.bf16.mxu1 %v8252_v38  ;;  %7332 = vmatpush3.bf16.msra.mxu0 %v8273_v39 }
  0xb4   : > { %7333 = vmatprep.subr.bf16.mxu0 %v8274_v53 }
  0xb6   : > { %7290 = vmatpush3.bf16.msra.mxu1 %v8253_v41 }
  0xb7   : > { %7291 = vmatprep.subr.bf16.mxu1 %v8254_v42  ;;  %7334 = vmatpush3.bf16.msra.mxu0 %v8275_v54  ;;  %v8295_v42 = vld [vmem:[%s12170_s2 + $0x80] sm:$0xff]  }
  0xb8   : > { %7335 = vmatprep.subr.bf16.mxu0 %v8276_v55 }
  0xba   : > { %7292 = vmatpush3.bf16.msra.mxu1 %v8255_v43 }
  0xbb   : > { %7293 = vmatprep.subr.bf16.mxu1 %v8256_v44  ;;  %7336 = vmatpush3.bf16.msra.mxu0 %v8277_v56 }
  0xbc   : > { %7337 = vmatprep.subr.bf16.mxu0 %v8278_v57 }
  0xbe   : > { %7294 = vmatpush3.bf16.msra.mxu1 %v8257_v46 }
  0xbf   : > { %7741 = vmatprep.subr.bf16.mxu1 %v12180_v7  ;;  %7338 = vmatpush3.bf16.msra.mxu0 %v8279_v59 }
  0xc1   : > { %6795 = vmatmul.mubr.msk.bf16.vlgmr.msra.gmra.mxu1 %vm9231_vm14, %v8909_v13  ;;  %vm1599_vm14 = vcmask 1040384  }
  0xc2   : > { %6797 = vmatprep.mubr.msk.bf16.mxu1 %vm9243_vm5, %v8909_v13  ;;  %7742 = vmatpush3.bf16.msra.mxu1 %v929_v47  ;;  %vm1293_vm5 = vcmask 670720  }
  0xc3   : > { %7743 = vmatprep.subr.bf16.mxu1 %v12180_v7 }
  0xc6   : > { %7744 = vmatpush3.bf16.msra.mxu1 %v8258_v48 }
  0xc7   : > { %7745 = vmatprep.subr.bf16.mxu1 %v12180_v7 }
  0xc9   : > { %6799 = vmatmul.mubr.msk.bf16.gmra.mxu1 %vm9264_vm7, %v8909_v13  ;;  %vm1651_vm7 = vcmask 777216  }
  0xca   : > { %6801 = vmatprep.mubr.msk.bf16.mxu1 %vm9273_vm8, %v8909_v13  ;;  %7746 = vmatpush3.bf16.msra.mxu1 %v8259_v18  ;;  %vm1571_vm8 = vcmask 965632  }
  0xcb   : > { %7747 = vmatprep.subr.bf16.mxu1 %v12180_v7 }
  0xce   : > { %7748 = vmatpush3.bf16.msra.mxu1 %v8260_v49 }
  0xcf   : > { %7749 = vmatprep.subr.bf16.mxu1 %v12180_v7 }
  0xd1   : > { %6803 = vmatmul.mubr.msk.bf16.gmra.mxu1 %vm9292_vm11, %v8909_v13  ;;  %vm1755_vm11 = vcmask 400384  }
  0xd2   : > { %7750 = vmatpush3.bf16.msra.mxu1 %v8261_v50  ;;  %7755 = vmatprep.mubr.msk.bf16.mxu1 %vm8910_vm10, %v12180_v7 }
  0xd3   : > { %7751 = vmatprep.subr.bf16.mxu1 %v12180_v7 }
  0xd6   : > { %7752 = vmatpush3.bf16.msra.mxu1 %v8262_v51 }
  0xd7   : > { %7753 = vmatprep.subr.bf16.mxu1 %v12180_v7 }
  0xda   : > { %7754 = vmatpush3.bf16.msra.mxu1 %v8263_v52 }
  0xdb   : > { %7351 = vmatprep.subr.bf16.mxu1 %v8280_v60 }
  0xdd   : > { %7756 = vmatmul.mubr.msk.bf16.vlgmr.msra.gmra.mxu1 %vm908_vm3, %v9222_v12 }
  0xde   : > { %7759 = vmatprep.mubr.msk.bf16.mxu1 %vm8910_vm10, %v12180_v7  ;;  %7352 = vmatpush3.bf16.msra.mxu1 %v8281_v61 }
  0xdf   : > { %7353 = vmatprep.subr.bf16.mxu1 %v8282_v62 }
  0xe2   : > { %7354 = vmatpush3.bf16.msra.mxu1 %v8283_v63 }
  0xe3   : > { %7355 = vmatprep.subr.bf16.mxu1 %v8284_v0 }
  0xe5   : > { %7760 = vmatmul.mubr.msk.bf16.gmra.mxu1 %vm908_vm3, %v9281_v28 }
  0xe6   : > { %7763 = vmatprep.mubr.msk.bf16.mxu1 %vm8910_vm10, %v12180_v7  ;;  %7356 = vmatpush3.bf16.msra.mxu1 %v8285_v2  ;;  %vm3688_vm10 = vcmask 211968  }
  0xe7   : > { %7357 = vmatprep.subr.bf16.mxu1 %v8286_v3 }
  0xea   : > { %7358 = vmatpush3.bf16.msra.mxu1 %v8287_v4 }
  0xeb   : > { %7359 = vmatprep.subr.bf16.mxu1 %v8288_v5 }
  0xed   : > { %7764 = vmatmul.mubr.msk.bf16.gmra.mxu1 %vm908_vm3, %v9326_v40 }
  0xee   : > { %7360 = vmatpush3.bf16.msra.mxu1 %v8289_v6 }
  0xef   : > { %7361 = vmatprep.subr.bf16.mxu1 %v8290_v8 }
  0xf2   : > { %7362 = vmatpush3.bf16.msra.mxu1 %v8291_v14 }
  0xf3   : > { %7363 = vmatprep.subr.bf16.mxu1 %v8292_v15 }
  0xf6   : > { %7364 = vmatpush3.bf16.msra.mxu1 %v8293_v22 }
  0xf7   : > { %7365 = vmatprep.subr.bf16.mxu1 %v8294_v31 }
  0xfa   : > { %7366 = vmatpush3.bf16.msra.mxu1 %v8295_v42 }
 0x160   : > { %v965_v9 = vpop.f32.mrf.mxu0 }
 0x161   : > { %v1026_v10 = vpop.f32.mrf.mxu1 }
 0x162   : > { %v967_v11 = vpop.f32.mrf.mxu0  ;;  %v9464_v16 = vadd.f32 %v1026_v10, %v965_v9 }
 0x163   : > { %v1028_v12 = vpop.f32.mrf.mxu1 }
 0x164   : > { %v969_v13 = vpop.f32.mrf.mxu0  ;;  %v9466_v19 = vadd.f32 %v1028_v12, %v967_v11  ;;  %v1178_v28 = vrot.slane %v9464_v16, 1  ;;  %v1388_v29 = vrot.slane %v9464_v16, 4  ;;  %v1318_v51 = vrot.slane %v9464_v16, 3 }
 0x165   : > { %v1030_v17 = vpop.f32.mrf.mxu1  ;;  %v1459_v55 = vrot.slane %v9464_v16, 5  ;;  %v1600_v56 = vrot.slane %v9464_v16, 7  ;;  %v1526_v62 = vrot.slane %v9464_v16, 6 }
 0x166   : > { %v9468_v20 = vadd.f32 %v1030_v17, %v969_v13  ;;  %v971_v21 = vpop.f32.mrf.mxu0  ;;  %v1181_v35 = vrot.slane %v9466_v19, 1  ;;  %v1321_v39 = vrot.slane %v9466_v19, 3  ;;  %v1462_v61 = vrot.slane %v9466_v19, 5 }
 0x167   : > { %v1032_v23 = vpop.f32.mrf.mxu1  ;;  %v1391_v4 = vrot.slane %v9466_v19, 4  ;;  %v1529_v15 = vrot.slane %v9466_v19, 6 }
 0x168   : > { %v9473_v24 = vadd.f32 %v1032_v23, %v971_v21  ;;  %v975_v25 = vpop.f32.mrf.mxu0  ;;  %v1179_v26 = vrot.slane %v9468_v20, 1  ;;  %v1389_v30 = vrot.slane %v9468_v20, 4  ;;  %v1816_v38 = vpack.c.bf16 %v9468_v20, %v9464_v16 }
 0x169   : > { %v1036_v27 = vpop.f32.mrf.mxu1  ;;  %v1319_v10 = vrot.slane %v9468_v20, 3 }
 0x16a   : > { %v9482_v32 = vadd.f32 %v1036_v27, %v975_v25  ;;  %v977_v33 = vpop.f32.mrf.mxu0  ;;  %v1817_v34 = vpack.c.bf16 %v9473_v24, %v9466_v19  ;;  %v1182_v36 = vrot.slane %v9473_v24, 1  ;;  %v1322_v40 = vrot.slane %v9473_v24, 3 }
 0x16b   : > { %v1038_v37 = vpop.f32.mrf.mxu1  ;;  %v9493_v41 = vsel %vm918_vm0, %v1388_v29, %v1389_v30  ;;  %v1180_v45 = vsel %vm1177_vm12, %v1178_v28, %v1179_v26  ;;  %v1460_v25 = vrot.slane %v9468_v20, 5  ;;  %v1601_v29 = vrot.slane %v9468_v20, 7 }
 0x16c   : > { %12214 = vst [vmem:[#allocation6_spill] sm:$0xff] %v9482_v32  ;;  %v9498_v43 = vadd.f32 %v1038_v37, %v977_v33  ;;  %v979_v44 = vpop.f32.mrf.mxu0  ;;  %3730 = vmatprep.mubr.bf16.mxu0 %v1817_v34  ;;  %v1183_v46 = vsel %vm1177_vm12, %v1181_v35, %v1182_v36  ;;  %v1187_v47 = vrot.slane %v9482_v32, 1  ;;  %v9504_v49 = vsel %vm919_vm1, %v1321_v39, %v1322_v40 }
 0x16d   : > { %v1040_v48 = vpop.f32.mrf.mxu1  ;;  %3731 = vmatmul.mubr.bf16.vlgmr.msra.gmra.mxu0 %v1816_v38  ;;  %v7857_v18 = vpack.i.bf16 %v1183_v46, %v1180_v45  ;;  %v1397_v50 = vrot.slane %v9482_v32, 4  ;;  %v1327_v42 = vrot.slane %v9482_v32, 3 }
 0x16e   : > { %v9508_v52 = vadd.f32 %v1040_v48, %v979_v44  ;;  %v981_v53 = vpop.f32.mrf.mxu0  ;;  %v1189_v54 = vrot.slane %v9498_v43, 1  ;;  %v1329_v59 = vrot.slane %v9498_v43, 3  ;;  %v9525_v2 = vsel %vm1177_vm12, %v1179_v26, %v1187_v47 }
 0x16f   : > { %v1042_v57 = vpop.f32.mrf.mxu1  ;;  %7858 = vrot.lane.b32.xlu1 %v7857_v18, %s8911_s24  ;;  %v9518_v60 = vsel %vm918_vm0, %v1389_v30, %v1397_v50  ;;  %12216 = vst [vmem:[#allocation8_spill] sm:$0xff] %v9525_v2  ;;  %v1603_v30 = vrot.slane %v9466_v19, 7  ;;  %v1463_v48 = vrot.slane %v9473_v24, 5  ;;  %v9588_v18 = vsel %vm919_vm1, %v1319_v10, %v1327_v42 }
 0x170   : > { %12215 = vst [vmem:[#allocation7_spill] sm:$0xff] %v9508_v52  ;;  %v9522_v63 = vadd.f32 %v1042_v57, %v981_v53  ;;  %v985_v0 = vpop.f32.mrf.mxu0  ;;  %v9528_v3 = vsel %vm1177_vm12, %v1182_v36, %v1189_v54  ;;  %v9534_v8 = vrot.slane %v9508_v52, 1  ;;  %v9537_v9 = vsel %vm919_vm1, %v1322_v40, %v1329_v59 }
 0x171   : > { %12217 = vst [vmem:[#allocation9_spill] sm:$0xff] %v9528_v3  ;;  %v1046_v5 = vpop.f32.mrf.mxu1  ;;  %v7862_v6 = vpack.i.bf16 %v9528_v3, %v9525_v2  ;;  %v1845_v21 = vpack.c.bf16 %v9508_v52, %v9482_v32  ;;  %v9572_v36 = vsel %vm919_vm1, %v1318_v51, %v1319_v10  ;;  %v1403_v46 = vrot.slane %v9508_v52, 4 }
 0x172   : > { %v9540_v11 = vadd.f32 %v1046_v5, %v985_v0  ;;  %v987_v12 = vpop.f32.mrf.mxu0  ;;  %v1846_v13 = vpack.c.bf16 %v9522_v63, %v9498_v43  ;;  %v9545_v14 = vrot.slane %v9522_v63, 1  ;;  %v9565_v34 = vsel %vm1177_vm12, %v1187_v47, %v9534_v8 }
 0x173   : > { %7863 = vrot.lane.b32.xlu0 %v7862_v6, %s8911_s24  ;;  %v1048_v17 = vpop.f32.mrf.mxu1  ;;  %12219 = vst [vmem:[#allocation11_spill] sm:$0xff] %v9565_v34  ;;  %v1335_v45 = vrot.slane %v9522_v63, 3  ;;  %v9583_v47 = vsel %vm1458_vm13, %v1459_v55, %v1460_v25  ;;  %v1333_v51 = vrot.slane %v9508_v52, 3  ;;  %v1468_v53 = vrot.slane %v9482_v32, 5 }
 0x174   : > { %12218 = vst [vmem:[#allocation10_spill] sm:$0xff] %v9540_v11  ;;  %v9556_v26 = vadd.f32 %v1048_v17, %v987_v12  ;;  %v989_v27 = vpop.f32.mrf.mxu0  ;;  %3738 = vmatprep.mubr.bf16.mxu0 %v1846_v13  ;;  %v7872_v28 = vpack.i.bf16 %v9545_v14, %v9534_v8  ;;  %v1621_v31 = vrot.slane %v9540_v11, 7  ;;  %v9569_v35 = vsel %vm1177_vm12, %v1189_v54, %v9545_v14 }
 0x175   : > { %v1050_v33 = vpop.f32.mrf.mxu1  ;;  %3739 = vmatmul.mubr.bf16.gmra.mxu0 %v1845_v21  ;;  %v1725_v37 = vrot.slane %v9540_v11, 1  ;;  %v7867_v40 = vpack.i.bf16 %v9569_v35, %v9565_v34  ;;  %v1470_v54 = vrot.slane %v9498_v43, 5  ;;  %v1336_v0 = vsel %vm919_vm1, %v1329_v59, %v1335_v45  ;;  %v8316_v34 = vld [vmem:[%s12170_s2 + $0x118] sm:$0xff]   ;;  %v8322_v11 = vld [vmem:[%s12170_s2 + $0x148] sm:$0xff]  }
 0x176   : > { %v1623_v38 = vrot.slane %v9556_v26, 7  ;;  %v990_v39 = vpop.f32.mrf.mxu0  ;;  %v1404_v55 = vsel %vm918_vm0, %v1397_v50, %v1403_v46  ;;  %v9600_v5 = vsel %vm1458_vm13, %v1462_v61, %v1463_v48  ;;  %v9602_v6 = vpack.i.bf16 %v1335_v45, %v1336_v0 }
 0x177   : > { %7873 = vrot.lane.b32.xlu0 %v7872_v28, %s8911_s24  ;;  %v1051_v44 = vpop.f32.mrf.mxu1  ;;  %7868 = vrot.lane.b32.xlu1 %v7867_v40, %s8911_s24  ;;  %v9604_v10 = vpack.i.bf16 %v1403_v46, %v1404_v55  ;;  %v1334_v13 = vsel %vm919_vm1, %v1327_v42, %v1333_v51  ;;  %v9612_v59 = vsel %vm1458_vm13, %v1460_v25, %v1468_v53  ;;  %v1474_v50 = vrot.slane %v9508_v52, 5 }
 0x178   : > { %v9609_v17 = vpack.i.bf16 %v1333_v51, %v1334_v13  ;;  %v9615_v21 = vsel %vm1458_vm13, %v1463_v48, %v1470_v54  ;;  %v1476_v27 = vrot.slane %v9522_v63, 5  ;;  %v1392_v28 = vrot.slane %v9473_v24, 4 }
 0x179   : > { %v1399_v33 = vrot.slane %v9498_v43, 4  ;;  %v9624_v39 = vsel %vm1458_vm13, %v1468_v53, %v1474_v50  ;;  %v1405_v25 = vrot.slane %v9522_v63, 4  ;;  %v1530_v40 = vrot.slane %v9473_v24, 6 }
 0x17a   : > { %v1537_v42 = vrot.slane %v9498_v43, 6  ;;  %v9630_v44 = vsel %vm1458_vm13, %v1470_v54, %v1476_v27  ;;  %v9635_v45 = vsel %vm918_vm0, %v1391_v4, %v1392_v28  ;;  %v9640_v48 = vpack.i.bf16 %v1476_v27, %v1474_v50 }
 0x17b   : > { %v9638_v46 = vsel %vm918_vm0, %v1392_v28, %v1399_v33  ;;  %v1406_v0 = vsel %vm918_vm0, %v1399_v33, %v1405_v25  ;;  %v9650_v54 = vsel %vm1525_vm15, %v1529_v15, %v1530_v40  ;;  %v9662_v13 = vsel %vm1599_vm14, %v1600_v56, %v1601_v29 }
 0x17c   : > { %v9652_v4 = vpack.i.bf16 %v1405_v25, %v1406_v0  ;;  %v9655_v55 = vsel %vm1525_vm15, %v1530_v40, %v1537_v42  ;;  %v1609_v50 = vrot.slane %v9482_v32, 7  ;;  %v1527_v28 = vrot.slane %v9468_v20, 6  ;;  %v8296_v40 = vld [vmem:[%s12170_s2 + $0x1f8] sm:$0xff]  }
 0x17d   : > { %v1535_v33 = vrot.slane %v9482_v32, 6  ;;  %v1543_v25 = vrot.slane %v9522_v63, 6  ;;  %v1615_v0 = vrot.slane %v9508_v52, 7  ;;  %v1541_v7 = vrot.slane %v9508_v52, 6  ;;  %7407 = vmatprep.subr.bf16.mxu1 %v8296_v40 }
 0x17e   : > { %v9678_v56 = vsel %vm1599_vm14, %v1601_v29, %v1609_v50  ;;  %v9691_v53 = vsel %vm1525_vm15, %v1526_v62, %v1527_v28  ;;  %v12185_v61 = vrot.slane %v9556_v26, 1  ;;  %v1604_v40 = vrot.slane %v9473_v24, 7 }
 0x17f   : > { %v9694_v29 = vsel %vm1525_vm15, %v1527_v28, %v1535_v33  ;;  %v1544_v51 = vsel %vm1525_vm15, %v1537_v42, %v1543_v25  ;;  %v9703_v15 = vsel %vm1599_vm14, %v1609_v50, %v1615_v0  ;;  %v9708_v62 = vsel %vm1599_vm14, %v1615_v0, %v1621_v31 }
 0x180   : > { %v9700_v12 = vpack.i.bf16 %v1543_v25, %v1544_v51  ;;  %v1542_v28 = vsel %vm1525_vm15, %v1535_v33, %v1541_v7  ;;  %v8298_v51 = vld [vmem:[%s12170_s2 + $0x178] sm:$0xff]   ;;  %v1611_v58 = vrot.slane %v9498_v43, 7  ;;  %v9727_v0 = vsel %vm1599_vm14, %v1603_v30, %v1604_v40 }
 0x181   : > { %v9665_v27 = vpop.f32.mrf.mxu1  ;;  %v9719_v25 = vpack.i.bf16 %v1541_v7, %v1542_v28  ;;  %12220 = vst [vmem:[#allocation12_spill] sm:$0xff] %v9727_v0  ;;  %v1617_v23 = vrot.slane %v9522_v63, 7  ;;  %7379 = vmatprep.subr.bf16.mxu0 %v8298_v51  ;;  %v9741_v31 = vsel %vm1177_vm12, %v9545_v14, %v12185_v61  ;;  %v1726_v30 = vsel %vm1177_vm12, %v9534_v8, %v1725_v37  ;;  %v8300_v8 = vld [vmem:[%s12170_s2 + $0x138] sm:$0xff]   ;;  %v8308_v7 = vld [vmem:[%s12170_s2 + $0x128] sm:$0xff]   ;;  %v8312_v61 = vld [vmem:[%s12170_s2 + $0x120] sm:$0xff]  }
 0x182   : > { %v9735_v28 = vsel %vm1599_vm14, %v1604_v40, %v1611_v58  ;;  %v9759_v14 = vpack.i.bf16 %v1725_v37, %v1726_v30  ;;  %7380 = vmatpush3.bf16.msra.mxu0 %v8300_v8  ;;  %v8304_v37 = vld [vmem:[%s12170_s2 + $0x130] sm:$0xff]   ;;  %v8310_v8 = vld [vmem:[%s12170_s2 + $0x160] sm:$0xff]   ;;  %v1251_v3 = vrot.slane %v9466_v19, 2  ;;  %v1259_v19 = vrot.slane %v9498_v43, 2 }
 0x183   : > { %v9684_v1 = vpop.f32.mrf.mxu1  ;;  %12221 = vst [vmem:[#allocation13_spill] sm:$0xff] %v9735_v28  ;;  %v9750_v51 = vsel %vm1599_vm14, %v1611_v58, %v1617_v23  ;;  %v9755_v40 = vsel %vm1599_vm14, %v1617_v23, %v1623_v38  ;;  %v8302_v58 = vld [vmem:[%s12170_s2 + $0x170] sm:$0xff]   ;;  %v8306_v38 = vld [vmem:[%s12170_s2 + $0x168] sm:$0xff]   ;;  %v8328_v0 = vld [vmem:[%s12170_s2 + $0x100] sm:$0xff]  }
 0x184   : > { %12222 = vst [vmem:[#allocation14_spill] sm:$0xff] %v9750_v51  ;;  %12223 = vst [vmem:[#allocation15_spill] sm:$0xff] %v9755_v40  ;;  %7381 = vmatprep.subr.bf16.mxu0 %v8302_v58  ;;  %v1252_v51 = vrot.slane %v9473_v24, 2 }
 0x185   : > { %v7298_v57 = vpop.f32.mrf.mxu1  ;;  %12224 = vst [vmem:[#allocation16_spill] sm:$0xff] %v9759_v14 }
 0x186   : > { %7382 = vmatpush3.bf16.msra.mxu0 %v8304_v37  ;;  %v8314_v37 = vld [vmem:[%s12170_s2 + $0x158] sm:$0xff]  }
 0x187   : > { %v7299_v33 = vpop.f32.mrf.mxu1  ;;  %7383 = vmatprep.subr.bf16.mxu0 %v8306_v38 }
 0x189   : > { %v7301_v42 = vpop.f32.mrf.mxu1 }
 0x18a   : > { %7384 = vmatpush3.bf16.msra.mxu0 %v8308_v7  ;;  %v8318_v7 = vld [vmem:[%s12170_s2 + $0x150] sm:$0xff]  }
 0x18b   : > { %v7302_v50 = vpop.f32.mrf.mxu1  ;;  %7385 = vmatprep.subr.bf16.mxu0 %v8310_v8 }
 0x18d   : > { %v7304_v23 = vpop.f32.mrf.mxu1 }
 0x18e   : > { %7386 = vmatpush3.bf16.msra.mxu0 %v8312_v61 }
 0x18f   : > { %v7305_v30 = vpop.f32.mrf.mxu1  ;;  %7387 = vmatprep.subr.bf16.mxu0 %v8314_v37 }
 0x191   : > { %v7307_v58 = vpop.f32.mrf.mxu1 }
 0x192   : > { %7388 = vmatpush3.bf16.msra.mxu0 %v8316_v34 }
 0x193   : > { %v7308_v22 = vpop.f32.mrf.mxu1  ;;  %7389 = vmatprep.subr.bf16.mxu0 %v8318_v7  ;;  %v1257_v7 = vrot.slane %v9482_v32, 2 }
 0x194   : > { %v9784_v14 = vadd.f32 %v7308_v22, %v7307_v58  ;;  %v8320_v22 = vld [vmem:[%s12170_s2 + $0x110] sm:$0xff]   ;;  %v7300_v58 = vadd.f32 %v7299_v33, %v7298_v57 }
 0x195   : > { %v7310_v2 = vpop.f32.mrf.mxu1 }
 0x196   : > { %v7297_v2 = vadd.f32 %v9684_v1, %v9665_v27  ;;  %7390 = vmatpush3.bf16.msra.mxu0 %v8320_v22  ;;  %v8324_v1 = vld [vmem:[%s12170_s2 + $0x108] sm:$0xff]   ;;  %v7303_v27 = vadd.f32 %v7302_v50, %v7301_v42 }
 0x197   : > { %v7311_v38 = vpop.f32.mrf.mxu1  ;;  %7391 = vmatprep.subr.bf16.mxu0 %v8322_v11  ;;  %v7306_v11 = vadd.f32 %v7305_v30, %v7304_v23 }
 0x19a   : > { %7392 = vmatpush3.bf16.msra.mxu0 %v8324_v1 }
 0x19d   : > { %v1143_v8 = vpop.f32.mrf.mxu1 }
 0x19e   : > { %v9800_v38 = vadd.f32 %v7297_v2, %v1143_v8  ;;  %v1253_v2 = vsel %vm1247_vm2, %v1251_v3, %v1252_v51 }
 0x19f   : > { %v7757_v61 = vpop.f32.mrf.mxu1 }
 0x1a0   : > { %v1254_v57 = vrot.slane %v9800_v38, 2 }
 0x1a1   : > { %v1146_v37 = vpop.f32.mrf.mxu1 }
 0x1a2   : > { %v9802_v34 = vadd.f32 %v7300_v58, %v1146_v37  ;;  %v1248_v58 = vrot.slane %v9464_v16, 2  ;;  %v8326_v37 = vld [vmem:[%s12170_s2 + $0x140] sm:$0xff]  }
 0x1a3   : > { %v7758_v40 = vpop.f32.mrf.mxu1  ;;  %7393 = vmatprep.subr.bf16.mxu0 %v8326_v37 }
 0x1a4   : > { %v1255_v33 = vrot.slane %v9802_v34, 2  ;;  %v1249_v40 = vrot.slane %v9468_v20, 2  ;;  %7394 = vmatpush3.bf16.msra.mxu0 %v8328_v0 }
 0x1a5   : > { %v1151_v22 = vpop.f32.mrf.mxu1 }
 0x1a6   : > { %v9817_v8 = vadd.f32 %v7303_v27, %v1151_v22  ;;  %v1256_v61 = vsel %vm1247_vm2, %v1254_v57, %v1255_v33  ;;  %v1258_v27 = vsel %vm1247_vm2, %v1249_v40, %v1257_v7  ;;  %v1250_v16 = vsel %vm1247_vm2, %v1248_v58, %v1249_v40 }
 0x1a7   : > { %v7761_v42 = vpop.f32.mrf.mxu1  ;;  %v7877_v50 = vpack.i.bf16 %v1256_v61, %v1253_v2  ;;  %v1260_v22 = vsel %vm1247_vm2, %v1252_v51, %v1259_v19  ;;  %v8330_v2 = vld [vmem:[%s12170_s2 + $0x278] sm:$0xff]   ;;  %v1185_v61 = vrot.slane %v9802_v34, 1  ;;  %v7882_v28 = vpack.i.bf16 %v1258_v27, %v1250_v16 }
 0x1a8   : > { %v1261_v3 = vrot.slane %v9817_v8, 2  ;;  %v1191_v57 = vrot.slane %v9817_v8, 1  ;;  %v1265_v42 = vrot.slane %v9522_v63, 2  ;;  %v1263_v40 = vrot.slane %v9508_v52, 2  ;;  %7435 = vmatprep.subr.bf16.mxu0 %v8330_v2 }
 0x1a9   : > { %7878 = vrot.lane.b32.xlu1 %v7877_v50, %s8912_s12  ;;  %v1154_v1 = vpop.f32.mrf.mxu1  ;;  %v1184_v51 = vrot.slane %v9800_v38, 1  ;;  %v1331_v52 = vrot.slane %v9817_v8, 3 }
 0x1aa   : > { %v9837_v23 = vadd.f32 %v7306_v11, %v1154_v1  ;;  %v1262_v30 = vsel %vm1247_vm2, %v1255_v33, %v1261_v3  ;;  %v9845_v58 = vsel %vm1177_vm12, %v1185_v61, %v1191_v57  ;;  %v1266_v1 = vsel %vm1247_vm2, %v1259_v19, %v1265_v42 }
 0x1ab   : > { %v7762_v50 = vpop.f32.mrf.mxu1  ;;  %v7887_v32 = vpack.i.bf16 %v1262_v30, %v1260_v22  ;;  %v1186_v27 = vsel %vm1177_vm12, %v1184_v51, %v1185_v61  ;;  %v1325_v61 = vrot.slane %v9802_v34, 3  ;;  %v1613_v51 = vrot.slane %v9817_v8, 7 }
 0x1ac   : > { %v1267_v37 = vrot.slane %v9837_v23, 2  ;;  %v1197_v33 = vrot.slane %v9837_v23, 1  ;;  %v7892_v2 = vpack.i.bf16 %v9845_v58, %v1186_v27  ;;  %v1264_v50 = vsel %vm1247_vm2, %v1257_v7, %v1263_v40 }
 0x1ad   : > { %7883 = vrot.lane.b32.xlu1 %v7882_v28, %s8912_s12  ;;  %7888 = vrot.lane.b32.xlu0 %v7887_v32, %s8912_s12  ;;  %v1159_v0 = vpop.f32.mrf.mxu1  ;;  %v1619_v7 = vrot.slane %v9837_v23, 7 }
 0x1ae   : > { %v9852_v11 = vadd.f32 %v9784_v14, %v1159_v0  ;;  %v1268_v16 = vsel %vm1247_vm2, %v1261_v3, %v1267_v37  ;;  %v9863_v14 = vsel %vm1177_vm12, %v1191_v57, %v1197_v33  ;;  %v7907_v3 = vpack.i.bf16 %v1263_v40, %v1264_v50 }
 0x1af   : > { %v7765_v22 = vpop.f32.mrf.mxu1  ;;  %v7902_v30 = vpack.i.bf16 %v1268_v16, %v1266_v1  ;;  %v7897_v27 = vpack.i.bf16 %v1267_v37, %v1265_v42  ;;  %v1324_v1 = vrot.slane %v9800_v38, 3  ;;  %v8092_v57 = vpack.i.bf16 %v9863_v14, %v9569_v35  ;;  %v8325_v35 = vld [vmem:[%s12170_s2 + $0x180] sm:$0xff]  }
 0x1b0   : > { %v1625_v28 = vrot.slane %v9852_v11, 7  ;;  %v1729_v32 = vrot.slane %v9852_v11, 1  ;;  %v1332_v22 = vsel %vm919_vm1, %v1325_v61, %v1331_v52  ;;  %v9880_v40 = vsel %vm1599_vm14, %v1613_v51, %v1619_v7 }
 0x1b1   : > { %7893 = vrot.lane.b32.xlu0 %v7892_v2, %s8911_s24  ;;  %7903 = vrot.lane.b32.xlu1 %v7902_v30, %s8912_s12  ;;  %v1162_v19 = vpop.f32.mrf.mxu1  ;;  %v12225_v30 = vrot.slane %v9556_v26, 1  ;;  %v1337_v42 = vrot.slane %v9837_v23, 3 }
 0x1b2   : > { %v9874_v16 = vsel %vm1177_vm12, %v1197_v33, %v1729_v32  ;;  %v9883_v2 = vsel %vm1599_vm14, %v1619_v7, %v1625_v28  ;;  %v1326_v19 = vsel %vm919_vm1, %v1324_v1, %v1325_v61  ;;  %v8122_v28 = vpack.i.bf16 %v9852_v11, %v9837_v23 }
 0x1b3   : > { %v7766_v0 = vpop.f32.mrf.mxu1  ;;  %v8082_v37 = vpack.i.bf16 %v9883_v2, %v9880_v40  ;;  %v9893_v50 = vpack.i.bf16 %v1729_v32, %v12225_v30  ;;  %v7912_v7 = vpack.i.bf16 %v1332_v22, %v1326_v19  ;;  %v12226_v32 = vpack.i.bf16 %v9537_v9, %v9504_v49  ;;  %v12248_v40 = vld [vmem:[#allocation15_spill] sm:$0xff]  ;;  %v12249_v2 = vld [vmem:[#allocation14_spill] sm:$0xff] }
 0x1b4   : > { %v7917_v0 = vpack.i.bf16 %v1197_v33, %v9863_v14  ;;  %v12227_v61 = vpack.i.bf16 %v9518_v60, %v9493_v41  ;;  %v12228_v33 = vpack.i.bf16 %v9588_v18, %v9572_v36  ;;  %v1401_v1 = vrot.slane %v9817_v8, 4 }
 0x1b5   : > { %7898 = vrot.lane.b32.xlu0 %v7897_v27, %s8912_s12  ;;  %7908 = vrot.lane.b32.xlu1 %v7907_v3, %s8912_s12  ;;  %v1338_v3 = vsel %vm919_vm1, %v1331_v52, %v1337_v42  ;;  %v1395_v49 = vrot.slane %v9802_v34, 4  ;;  %v1394_v52 = vrot.slane %v9800_v38, 4  ;;  %v12229_v60 = vpack.i.bf16 %v9600_v5, %v9583_v47  ;;  %s12260_s12 = smov 64  }
 0x1b6   : > { %v7942_v27 = vpack.i.bf16 %v1337_v42, %v1338_v3  ;;  %v1407_v18 = vrot.slane %v9837_v23, 4  ;;  %v1539_v22 = vrot.slane %v9817_v8, 6  ;;  %v12231_v47 = vpack.i.bf16 %v9630_v44, %v9624_v39 }
 0x1b7   : > { %v1402_v41 = vsel %vm918_vm0, %v1395_v49, %v1401_v1  ;;  %v1396_v9 = vsel %vm918_vm0, %v1394_v52, %v1395_v49  ;;  %v12232_v5 = vpack.i.bf16 %v9638_v46, %v9635_v45  ;;  %v1472_v30 = vrot.slane %v9817_v8, 5 }
 0x1b8   : > { %v7967_v36 = vpack.i.bf16 %v1402_v41, %v1396_v9  ;;  %v1466_v45 = vrot.slane %v9802_v34, 5  ;;  %v1465_v46 = vrot.slane %v9800_v38, 5  ;;  %v1545_v3 = vrot.slane %v9837_v23, 6 }
 0x1b9   : > { %7913 = vrot.lane.b32.xlu1 %v7912_v7, %s8913_s11  ;;  %7918 = vrot.lane.b32.xlu0 %v7917_v0, %s8911_s24  ;;  %s8915_s24 = smov 13   ;;  %v12234_v7 = vpack.i.bf16 %v9678_v56, %v9662_v13 }
 0x1ba   : > { %v1473_v19 = vsel %vm1458_vm13, %v1466_v45, %v1472_v30  ;;  %v1467_v0 = vsel %vm1458_vm13, %v1465_v46, %v1466_v45  ;;  %v1546_v56 = vsel %vm1525_vm15, %v1539_v22, %v1545_v3 }
 0x1bb   : > { %v8032_v49 = vpack.i.bf16 %v1545_v3, %v1546_v56  ;;  %v12240_v3 = vld [vmem:[#allocation13_spill] sm:$0xff]  ;;  %v8309_v56 = vld [vmem:[%s12170_s2 + $0x1a0] sm:$0xff]  }
 0x1bd   : > { %7928 = vrot.lane.b32.xlu1 %v12226_v32, %s8913_s11  ;;  %7923 = vrot.lane.b32.xlu0 %v12227_v61, %s8914_s21  ;;  %v1478_v32 = vrot.slane %v9837_v23, 5  ;;  %v12235_v61 = vpack.i.bf16 %v9694_v29, %v9691_v53  ;;  %v12236_v53 = vpack.i.bf16 %v9708_v62, %v9703_v15 }
 0x1c1   : > { %7943 = vrot.lane.b32.xlu1 %v7942_v27, %s8913_s11  ;;  %7933 = vrot.lane.b32.xlu0 %v12228_v33, %s8913_s11  ;;  %v1479_v27 = vsel %vm1458_vm13, %v1472_v30, %v1478_v32 }
 0x1c2   : > { %v8042_v52 = vpack.i.bf16 %v1478_v32, %v1479_v27  ;;  %v12241_v32 = vld [vmem:[#allocation12_spill] sm:$0xff]  ;;  %v8311_v27 = vld [vmem:[%s12170_s2 + $0x1d8] sm:$0xff]  }
 0x1c5   : > { %7948 = vrot.lane.b32.xlu1 %v9602_v6, %s8913_s11  ;;  %7938 = vrot.lane.b32.xlu0 %v9604_v10, %s8914_s21  ;;  %v12230_v6 = vpack.i.bf16 %v9615_v21, %v9612_v59  ;;  %v1408_v10 = vsel %vm918_vm0, %v1401_v1, %v1407_v18  ;;  %v1532_v59 = vrot.slane %v9800_v38, 6 }
 0x1c6   : > { %v7992_v42 = vpack.i.bf16 %v1407_v18, %v1408_v10 }
 0x1c9   : > { %7958 = vrot.lane.b32.xlu1 %v12229_v60, %s8915_s24  ;;  %7953 = vrot.lane.b32.xlu0 %v9609_v17, %s8913_s11  ;;  %v1533_v17 = vrot.slane %v9802_v34, 6  ;;  %s8920_s11 = smov 32  }
 0x1cb   : > { %v1540_v21 = vsel %vm1525_vm15, %v1533_v17, %v1539_v22  ;;  %v1534_v39 = vsel %vm1525_vm15, %v1532_v59, %v1533_v17  ;;  %v1607_v22 = vrot.slane %v9802_v34, 7 }
 0x1cc   : > { %v7997_v44 = vpack.i.bf16 %v1540_v21, %v1534_v39  ;;  %v1606_v21 = vrot.slane %v9800_v38, 7 }
 0x1cd   : > { %7968 = vrot.lane.b32.xlu1 %v7967_v36, %s8914_s21  ;;  %7963 = vrot.lane.b32.xlu0 %v12230_v6, %s8915_s24  ;;  %v1614_v39 = vsel %vm1599_vm14, %v1607_v22, %v1613_v51  ;;  %v8301_v51 = vld [vmem:[%s12170_s2 + $0x1b0] sm:$0xff]  }
 0x1d1   : > { %7978 = vrot.lane.b32.xlu1 %v12231_v47, %s8915_s24  ;;  %7973 = vrot.lane.b32.xlu0 %v12232_v5, %s8914_s21  ;;  %v8297_v47 = vld [vmem:[%s12170_s2 + $0x1b8] sm:$0xff]  }
 0x1d5   : > { %7993 = vrot.lane.b32.xlu1 %v7992_v42, %s8914_s21  ;;  %7983 = vrot.lane.b32.xlu0 %v9640_v48, %s8915_s24  ;;  %v12233_v48 = vpack.i.bf16 %v9655_v55, %v9650_v54  ;;  %v8299_v42 = vld [vmem:[%s12170_s2 + $0x1f0] sm:$0xff]  }
 0x1d9   : > { %7998 = vrot.lane.b32.xlu1 %v7997_v44, %s8916_s22  ;;  %7988 = vrot.lane.b32.xlu0 %v9652_v4, %s8914_s21  ;;  %v8012_v4 = vpack.i.bf16 %v1473_v19, %v1467_v0  ;;  %v12237_v44 = vpack.i.bf16 %v9473_v24, %v9468_v20  ;;  %v8303_v24 = vld [vmem:[%s12170_s2 + $0x1e8] sm:$0xff]   ;;  %v12238_v19 = vld [vmem:[#allocation6_spill] sm:$0xff] }
 0x1da   : > { %v8305_v0 = vld [vmem:[%s12170_s2 + $0x1a8] sm:$0xff]  }
 0x1dd   : > { %8008 = vrot.lane.b32.xlu1 %v12233_v48, %s8916_s22  ;;  %8003 = vrot.lane.b32.xlu0 %v12234_v7, %s8917_s27  ;;  %v12239_v48 = vpack.i.bf16 %v9498_v43, %v12238_v19  ;;  %v12243_v43 = vld [vmem:[#allocation7_spill] sm:$0xff] }
 0x1e1   : > { %8018 = vrot.lane.b32.xlu1 %v12235_v61, %s8916_s22  ;;  %8013 = vrot.lane.b32.xlu0 %v8012_v4, %s8915_s24  ;;  %v9971_v54 = vpop.permute.xlu1 %7858  ;;  %v8307_v4 = vld [vmem:[%s12170_s2 + $0x1e0] sm:$0xff]   ;;  %v12242_v61 = vpack.i.bf16 %v12240_v3, %v12241_v32 }
 0x1e2   : > { %v7861_v55 = vunpack.i.h.bf16 %v9971_v54  ;;  %v7860_v13 = vunpack.i.l.bf16 %v9971_v54  ;;  %v8332_v54 = vld [vmem:[%s12170_s2 + $0x238] sm:$0xff]  }
 0x1e4   : > { %v1780_v41 = vsel %vm908_vm3, %v9800_v38, %v7860_v13  ;;  %v1608_v38 = vsel %vm1599_vm14, %v1606_v21, %v1607_v22  ;;  %v12254_v22 = vpack.i.bf16 %v9874_v16, %v9741_v31 }
 0x1e5   : > { %8028 = vrot.lane.b32.xlu0 %v9700_v12, %s8916_s22  ;;  %8023 = vrot.lane.b32.xlu1 %v12236_v53, %s8917_s27  ;;  %v9983_v29 = vpop.permute.xlu0 %7863  ;;  %v1223_v12 = vsel %vm908_vm3, %v7860_v13, %v7861_v55  ;;  %v8057_v46 = vpack.i.bf16 %v1614_v39, %v1608_v38  ;;  %v12244_v13 = vpack.i.bf16 %v9522_v63, %v12243_v43  ;;  %v12245_v53 = vld [vmem:[#allocation10_spill] sm:$0xff]  ;;  %v8329_v38 = vld [vmem:[%s12170_s2 + $0x2b8] sm:$0xff]  }
 0x1e6   : > { %v7866_v33 = vunpack.i.h.bf16 %v9983_v29  ;;  %v7865_v1 = vunpack.i.l.bf16 %v9983_v29  ;;  %v12246_v63 = vpack.i.bf16 %v9556_v26, %v12245_v53  ;;  %v12250_v26 = vpack.i.bf16 %v12248_v40, %v12249_v2 }
 0x1e8   : > { %v1781_v60 = vsel %vm908_vm3, %v9802_v34, %v7865_v1  ;;  %v1225_v15 = vsel %vm908_vm3, %v7865_v1, %v7866_v33  ;;  %v8313_v1 = vld [vmem:[%s12170_s2 + $0x198] sm:$0xff]  }
 0x1e9   : > { %v1818_v62 = vpack.c.bf16 %v1781_v60, %v1780_v41  ;;  %8033 = vrot.lane.b32.xlu0 %v8032_v49, %s8916_s22  ;;  %8043 = vrot.lane.b32.xlu1 %v8042_v52, %s8915_s24  ;;  %v9999_v9 = vpop.permute.xlu0 %7873  ;;  %v1819_v36 = vpack.c.bf16 %v1225_v15, %v1223_v12  ;;  %v10001_v18 = vpop.permute.xlu1 %7868  ;;  %v12247_v49 = vld [vmem:[#allocation9_spill] sm:$0xff]  ;;  %v8315_v41 = vld [vmem:[%s12170_s2 + $0x1d0] sm:$0xff]   ;;  %v12251_v60 = vld [vmem:[#allocation11_spill] sm:$0xff]  ;;  %s8923_s24 = smov 48  }
 0x1ea   : > { %v7876_v6 = vunpack.i.h.bf16 %v9999_v9  ;;  %v7875_v10 = vunpack.i.l.bf16 %v9999_v9  ;;  %v7871_v5 = vunpack.i.h.bf16 %v10001_v18  ;;  %v7870_v17 = vunpack.i.l.bf16 %v10001_v18  ;;  %v12252_v12 = vld [vmem:[#allocation8_spill] sm:$0xff] }
 0x1eb   : > { %3779 = vmatprep.mubr.bf16.mxu1 %v1819_v36  ;;  %v8087_v52 = vpack.i.bf16 %v9845_v58, %v12247_v49  ;;  %v8319_v58 = vld [vmem:[%s12170_s2 + $0x1c8] sm:$0xff]   ;;  %v12253_v15 = vpack.i.bf16 %v12251_v60, %v12252_v12  ;;  %v8102_v36 = vpack.i.bf16 %v9817_v8, %v9802_v34  ;;  %v8327_v34 = vld [vmem:[%s12170_s2 + $0x2f8] sm:$0xff]   ;;  %v8341_v18 = vld [vmem:[%s12170_s2 + $0x2a0] sm:$0xff]  }
 0x1ec   : > { %3780 = vmatmul.mubr.bf16.vlgmr.msra.gmra.mxu1 %v1818_v62  ;;  %v1229_v59 = vsel %vm908_vm3, %v7875_v10, %v7876_v6  ;;  %v1227_v30 = vsel %vm908_vm3, %v7870_v17, %v7871_v5  ;;  %v1783_v20 = vsel %vm908_vm3, %v9837_v23, %v7875_v10  ;;  %v8321_v62 = vld [vmem:[%s12170_s2 + $0x188] sm:$0xff]   ;;  %v8323_v10 = vld [vmem:[%s12170_s2 + $0x1c0] sm:$0xff]  }
 0x1ed   : > { %8038 = vrot.lane.b32.xlu0 %v9719_v25, %s8916_s22  ;;  %8048 = vrot.lane.b32.xlu1 %v12237_v44, %s8918_s19  ;;  %v1848_v45 = vpack.c.bf16 %v1229_v59, %v1227_v30  ;;  %v1782_v25 = vsel %vm908_vm3, %v9817_v8, %v7870_v17  ;;  %v12255_v8 = vld [vmem:[#allocation16_spill] sm:$0xff]  ;;  %v8338_v12 = vld [vmem:[%s12170_s2 + $0x268] sm:$0xff]   ;;  %s8924_s22 = smov 96  }
 0x1ee   : > { %7408 = vmatpush3.bf16.msra.mxu1 %v8297_v47  ;;  %v1847_v7 = vpack.c.bf16 %v1783_v20, %v1782_v25  ;;  %v8331_v25 = vld [vmem:[%s12170_s2 + $0x2f0] sm:$0xff]  }
 0x1ef   : > { %7409 = vmatprep.subr.bf16.mxu1 %v8299_v42  ;;  %3787 = vmatprep.mubr.bf16.mxu1 %v1848_v45 }
 0x1f1   : > { %8053 = vrot.lane.b32.xlu0 %v12239_v48, %s8918_s19  ;;  %8058 = vrot.lane.b32.xlu1 %v8057_v46, %s8917_s27 }
 0x1f2   : > { %7410 = vmatpush3.bf16.msra.mxu1 %v8301_v51 }
 0x1f3   : > { %7411 = vmatprep.subr.bf16.mxu1 %v8303_v24 }
 0x1f4   : > { %3788 = vmatmul.mubr.bf16.gmra.mxu1 %v1847_v7 }
 0x1f5   : > { %8063 = vrot.lane.b32.xlu0 %v12242_v61, %s8917_s27  ;;  %8068 = vrot.lane.b32.xlu1 %v12244_v13, %s8918_s19 }
 0x1f6   : > { %7412 = vmatpush3.bf16.msra.mxu1 %v8305_v0 }
 0x1f7   : > { %7413 = vmatprep.subr.bf16.mxu1 %v8307_v4 }
 0x1f9   : > { %8083 = vrot.lane.b32.xlu1 %v8082_v37, %s8917_s27  ;;  %8073 = vrot.lane.b32.xlu0 %v12246_v63, %s8918_s19  ;;  %v8317_v37 = vld [vmem:[%s12170_s2 + $0x190] sm:$0xff]  }
 0x1fa   : > { %7414 = vmatpush3.bf16.msra.mxu1 %v8309_v56  ;;  %v8334_v56 = vld [vmem:[%s12170_s2 + $0x270] sm:$0xff]  }
 0x1fb   : > { %7415 = vmatprep.subr.bf16.mxu1 %v8311_v27  ;;  %v8335_v27 = vld [vmem:[%s12170_s2 + $0x2e8] sm:$0xff]  }
 0x1fd   : > { %8088 = vrot.lane.b32.xlu1 %v8087_v52, %s8919_s30  ;;  %8078 = vrot.lane.b32.xlu0 %v12250_v26, %s8917_s27  ;;  %v8336_v26 = vld [vmem:[%s12170_s2 + $0x230] sm:$0xff]   ;;  %s12197_s27 = smov 64  }
 0x1fe   : > { %7416 = vmatpush3.bf16.msra.mxu1 %v8313_v1 }
 0x1ff   : > { %7417 = vmatprep.subr.bf16.mxu1 %v8315_v41 }
 0x201   : > { %8098 = vrot.lane.b32.xlu1 %v12253_v15, %s8919_s30  ;;  %8093 = vrot.lane.b32.xlu0 %v8092_v57, %s8919_s30  ;;  %v8339_v15 = vld [vmem:[%s12170_s2 + $0x2e0] sm:$0xff]  }
 0x202   : > { %7418 = vmatpush3.bf16.msra.mxu1 %v8317_v37  ;;  %v8337_v37 = vld [vmem:[%s12170_s2 + $0x2a8] sm:$0xff]  }
 0x203   : > { %7419 = vmatprep.subr.bf16.mxu1 %v8319_v58 }
 0x205   : > { %8113 = vrot.lane.b32.xlu1 %v12254_v22, %s8919_s30  ;;  %8103 = vrot.lane.b32.xlu0 %v8102_v36, %s8918_s19 }
 0x206   : > { %7420 = vmatpush3.bf16.msra.mxu1 %v8321_v62 }
 0x207   : > { %7421 = vmatprep.subr.bf16.mxu1 %v8323_v10 }
 0x209   : > { %8118 = vrot.lane.b32.xlu1 %v12255_v8, %s8919_s30  ;;  %8108 = vrot.lane.b32.xlu0 %v9893_v50, %s8919_s30 }
 0x20a   : > { %7422 = vmatpush3.bf16.msra.mxu1 %v8325_v35 }
 0x20b   : > { %7463 = vmatprep.subr.bf16.mxu1 %v8327_v34 }
 0x20d   : > { %8123 = vrot.lane.b32.xlu0 %v8122_v28, %s8918_s19  ;;  %s8921_s19 = smov 16  }
 0x21b   : > { %v10122_v31 = vpop.permute.xlu1 %7878 }
 0x21c   : > { %v7881_v14 = vunpack.i.h.bf16 %v10122_v31  ;;  %v7880_v57 = vunpack.i.l.bf16 %v10122_v31 }
 0x21e   : > { %v1295_v11 = vsel %vm1293_vm5, %v7880_v57, %v7881_v14 }
 0x21f   : > { %v7884_v16 = vpop.permute.xlu1 %7883  ;;  %v10126_v47 = vpop.permute.xlu0 %7888 }
 0x220   : > { %v7886_v17 = vunpack.i.h.bf16 %v7884_v16  ;;  %v7885_v42 = vunpack.i.l.bf16 %v7884_v16  ;;  %v7891_v50 = vunpack.i.h.bf16 %v10126_v47  ;;  %v7890_v59 = vunpack.i.l.bf16 %v10126_v47  ;;  %v8340_v16 = vld [vmem:[%s12170_s2 + $0x228] sm:$0xff]   ;;  %v8364_v47 = vld [vmem:[%s12170_s2 + $0x338] sm:$0xff]  }
 0x222   : > { %v1294_v21 = vsel %vm1293_vm5, %v7885_v42, %v7880_v57  ;;  %v1296_v23 = vsel %vm1293_vm5, %v7886_v17, %v7890_v59  ;;  %v1297_v28 = vsel %vm1293_vm5, %v7890_v59, %v7891_v50  ;;  %v8342_v59 = vld [vmem:[%s12170_s2 + $0x260] sm:$0xff]  }
 0x223   : > { %v1822_v39 = vpack.c.bf16 %v1296_v23, %v1294_v21  ;;  %v10138_v44 = vpop.permute.xlu1 %7903  ;;  %v7894_v30 = vpop.permute.xlu0 %7893  ;;  %v1823_v45 = vpack.c.bf16 %v1297_v28, %v1295_v11  ;;  %v8343_v21 = vld [vmem:[%s12170_s2 + $0x2d8] sm:$0xff]  }
 0x224   : > { %v7896_v51 = vunpack.i.h.bf16 %v7894_v30  ;;  %v7895_v46 = vunpack.i.l.bf16 %v7894_v30  ;;  %v7906_v20 = vunpack.i.h.bf16 %v10138_v44  ;;  %v7905_v24 = vunpack.i.l.bf16 %v10138_v44 }
 0x225   : > { %3877 = vmatprep.mubr.bf16.mxu1 %v1823_v45 }
 0x226   : > { %v1224_v19 = vsel %vm908_vm3, %v7861_v55, %v7895_v46  ;;  %v1226_v48 = vsel %vm908_vm3, %v7866_v33, %v7896_v51  ;;  %3878 = vmatmul.mubr.bf16.vlgmr.msra.gmra.mxu1 %v1822_v39  ;;  %v1784_v7 = vsel %vm1293_vm5, %v7895_v46, %v7885_v42  ;;  %v1785_v0 = vsel %vm1293_vm5, %v7896_v51, %v7886_v17  ;;  %v8333_v55 = vld [vmem:[%s12170_s2 + $0x2b0] sm:$0xff]   ;;  %v8344_v51 = vld [vmem:[%s12170_s2 + $0x220] sm:$0xff]   ;;  %v8345_v46 = vld [vmem:[%s12170_s2 + $0x298] sm:$0xff]  }
 0x227   : > { %v1820_v4 = vpack.c.bf16 %v1226_v48, %v1224_v19  ;;  %7464 = vmatpush3.bf16.msra.mxu1 %v8329_v38  ;;  %v7909_v3 = vpop.permute.xlu1 %7908  ;;  %v10156_v32 = vpop.permute.xlu0 %7898  ;;  %v1821_v61 = vpack.c.bf16 %v1785_v0, %v1784_v7  ;;  %v1299_v53 = vsel %vm1293_vm5, %v7905_v24, %v7906_v20  ;;  %v8346_v0 = vld [vmem:[%s12170_s2 + $0x258] sm:$0xff]  }
 0x228   : > { %v7911_v29 = vunpack.i.h.bf16 %v7909_v3  ;;  %v7910_v33 = vunpack.i.l.bf16 %v7909_v3  ;;  %v7901_v43 = vunpack.i.h.bf16 %v10156_v32  ;;  %v7900_v13 = vunpack.i.l.bf16 %v10156_v32  ;;  %7465 = vmatprep.subr.bf16.mxu1 %v8331_v25  ;;  %v8372_v32 = vld [vmem:[%s12170_s2 + $0x328] sm:$0xff]  }
 0x229   : > { %3828 = vmatprep.mubr.bf16.mxu0 %v1821_v61 }
 0x22a   : > { %3829 = vmatmul.mubr.bf16.vlgmr.msra.gmra.mxu0 %v1820_v4  ;;  %v1301_v63 = vsel %vm1293_vm5, %v7900_v13, %v7901_v43  ;;  %v1298_v1 = vsel %vm1293_vm5, %v7910_v33, %v7905_v24  ;;  %v1300_v49 = vsel %vm1293_vm5, %v7911_v29, %v7900_v13  ;;  %v8347_v4 = vld [vmem:[%s12170_s2 + $0x2d0] sm:$0xff]  }
 0x22b   : > { %7436 = vmatpush3.bf16.msra.mxu0 %v8332_v54  ;;  %7466 = vmatpush3.bf16.msra.mxu1 %v8333_v55  ;;  %v10180_v52 = vpop.permute.xlu1 %7913  ;;  %v7919_v41 = vpop.permute.xlu0 %7918  ;;  %v1852_v40 = vpack.c.bf16 %v1301_v63, %v1299_v53  ;;  %v1851_v2 = vpack.c.bf16 %v1300_v49, %v1298_v1  ;;  %v8350_v63 = vld [vmem:[%s12170_s2 + $0x250] sm:$0xff]   ;;  %v8351_v1 = vld [vmem:[%s12170_s2 + $0x2c8] sm:$0xff]  }
 0x22c   : > { %v7921_v58 = vunpack.i.h.bf16 %v7919_v41  ;;  %v7920_v60 = vunpack.i.l.bf16 %v7919_v41  ;;  %7437 = vmatprep.subr.bf16.mxu0 %v8334_v56  ;;  %7467 = vmatprep.subr.bf16.mxu1 %v8335_v27  ;;  %v7915_v9 = vunpack.i.l.bf16 %v10180_v52  ;;  %v8348_v56 = vld [vmem:[%s12170_s2 + $0x218] sm:$0xff]   ;;  %v8349_v27 = vld [vmem:[%s12170_s2 + $0x290] sm:$0xff]  }
 0x22d   : > { %3885 = vmatprep.mubr.bf16.mxu1 %v1852_v40  ;;  %v7339_v62 = vpop.f32.mrf.mxu0  ;;  %v8352_v40 = vld [vmem:[%s12170_s2 + $0x210] sm:$0xff]  }
 0x22e   : > { %3886 = vmatmul.mubr.bf16.gmra.mxu1 %v1851_v2  ;;  %v1786_v36 = vsel %vm1293_vm5, %v7920_v60, %v7910_v33  ;;  %v1787_v10 = vsel %vm1293_vm5, %v7921_v58, %v7911_v29  ;;  %v1228_v22 = vsel %vm908_vm3, %v7871_v5, %v7920_v60  ;;  %v1230_v35 = vsel %vm908_vm3, %v7876_v6, %v7921_v58  ;;  %v8353_v2 = vld [vmem:[%s12170_s2 + $0x288] sm:$0xff]  }
 0x22f   : > { %7438 = vmatpush3.bf16.msra.mxu0 %v8336_v26  ;;  %7468 = vmatpush3.bf16.msra.mxu1 %v8337_v37  ;;  %v10202_v34 = vpop.permute.xlu0 %7923  ;;  %v1850_v8 = vpack.c.bf16 %v1787_v10, %v1786_v36  ;;  %v1849_v57 = vpack.c.bf16 %v1230_v35, %v1228_v22  ;;  %v7916_v5 = vunpack.i.h.bf16 %v10180_v52  ;;  %v7340_v42 = vpop.f32.mrf.mxu0  ;;  %vm1363_vm3 = vcmask 482304   ;;  %v8354_v26 = vld [vmem:[%s12170_s2 + $0x248] sm:$0xff]   ;;  %v8355_v37 = vld [vmem:[%s12170_s2 + $0x2c0] sm:$0xff]   ;;  %v8359_v35 = vld [vmem:[%s12170_s2 + $0x3f8] sm:$0xff]  }
 0x230   : > { %v7926_v6 = vunpack.i.h.bf16 %v10202_v34  ;;  %v7925_v17 = vunpack.i.l.bf16 %v10202_v34  ;;  %7439 = vmatprep.subr.bf16.mxu0 %v8338_v12  ;;  %7469 = vmatprep.subr.bf16.mxu1 %v8339_v15  ;;  %v10220_v23 = vpop.permute.xlu1 %7928  ;;  %v10222_v11 = vadd.f32 %v7340_v42, %v7339_v62  ;;  %v8356_v15 = vld [vmem:[%s12170_s2 + $0x208] sm:$0xff]   ;;  %v8357_v62 = vld [vmem:[%s12170_s2 + $0x280] sm:$0xff]   ;;  %vm4578_vm5 = vcmask 130048  }
 0x231   : > { %3836 = vmatprep.mubr.bf16.mxu0 %v1850_v8  ;;  %v7342_v28 = vpop.f32.mrf.mxu0  ;;  %v7931_v25 = vunpack.i.h.bf16 %v10220_v23  ;;  %v7930_v24 = vunpack.i.l.bf16 %v10220_v23  ;;  %v8358_v22 = vld [vmem:[%s12170_s2 + $0x240] sm:$0xff]  }
 0x232   : > { %3837 = vmatmul.mubr.bf16.gmra.mxu0 %v1849_v57  ;;  %v1792_v39 = vsel %vm1433_vm4, %v7915_v9, %v7925_v17  ;;  %v1793_v30 = vsel %vm1433_vm4, %v7916_v5, %v7926_v6  ;;  %v8360_v52 = vld [vmem:[%s12170_s2 + $0x200] sm:$0xff]  }
 0x233   : > { %7440 = vmatpush3.bf16.msra.mxu0 %v8340_v16  ;;  %7470 = vmatpush3.bf16.msra.mxu1 %v8341_v18  ;;  %v10234_v45 = vpop.permute.xlu0 %7933  ;;  %v1827_v38 = vpack.c.bf16 %v1793_v30, %v1792_v39  ;;  %v7343_v7 = vpop.f32.mrf.mxu0  ;;  %v1365_v8 = vsel %vm1363_vm3, %v7930_v24, %v7915_v9  ;;  %v1367_v57 = vsel %vm1363_vm3, %v7931_v25, %v7916_v5  ;;  %v8361_v39 = vld [vmem:[%s12170_s2 + $0x3b8] sm:$0xff]  }
 0x234   : > { %v7936_v19 = vunpack.i.h.bf16 %v10234_v45  ;;  %v7935_v48 = vunpack.i.l.bf16 %v10234_v45  ;;  %7441 = vmatprep.subr.bf16.mxu0 %v8342_v59  ;;  %7471 = vmatprep.subr.bf16.mxu1 %v8343_v21  ;;  %v10252_v3 = vadd.f32 %v7343_v7, %v7342_v28  ;;  %v10260_v29 = vpop.permute.xlu1 %7943  ;;  %v1826_v5 = vpack.c.bf16 %v1367_v57, %v1365_v8  ;;  %v8362_v30 = vld [vmem:[%s12170_s2 + $0x378] sm:$0xff]  }
 0x235   : > { %3975 = vmatprep.mubr.bf16.mxu1 %v1827_v38  ;;  %v7345_v61 = vpop.f32.mrf.mxu0  ;;  %v7946_v36 = vunpack.i.h.bf16 %v10260_v29  ;;  %v7945_v10 = vunpack.i.l.bf16 %v10260_v29  ;;  %v8375_v57 = vld [vmem:[%s12170_s2 + $0x3d8] sm:$0xff]  }
 0x236   : > { %v1364_v54 = vsel %vm1363_vm3, %v7935_v48, %v7930_v24  ;;  %v1366_v55 = vsel %vm1363_vm3, %v7936_v19, %v7931_v25  ;;  %v1788_v38 = vsel %vm1363_vm3, %v7881_v14, %v7935_v48  ;;  %v8363_v25 = vld [vmem:[%s12170_s2 + $0x3f0] sm:$0xff]  }
 0x237   : > { %7442 = vmatpush3.bf16.msra.mxu0 %v8344_v51  ;;  %7472 = vmatpush3.bf16.msra.mxu1 %v8345_v46  ;;  %v10262_v33 = vpop.permute.xlu0 %7938  ;;  %v1825_v13 = vpack.c.bf16 %v1366_v55, %v1364_v54  ;;  %v7346_v53 = vpop.f32.mrf.mxu0  ;;  %v1789_v51 = vsel %vm1363_vm3, %v7891_v50, %v7936_v19 }
 0x238   : > { %7443 = vmatprep.subr.bf16.mxu0 %v8346_v0  ;;  %7473 = vmatprep.subr.bf16.mxu1 %v8347_v4  ;;  %v10276_v49 = vadd.f32 %v7346_v53, %v7345_v61  ;;  %v7949_v58 = vpop.permute.xlu1 %7948  ;;  %v7941_v60 = vunpack.i.h.bf16 %v10262_v33  ;;  %v7940_v12 = vunpack.i.l.bf16 %v10262_v33  ;;  %v1824_v50 = vpack.c.bf16 %v1789_v51, %v1788_v38  ;;  %v8365_v0 = vld [vmem:[%s12170_s2 + $0x3b0] sm:$0xff]  }
 0x239   : > { %3926 = vmatprep.mubr.bf16.mxu0 %v1825_v13  ;;  %v7951_v9 = vunpack.i.h.bf16 %v7949_v58  ;;  %v7950_v28 = vunpack.i.l.bf16 %v7949_v58  ;;  %v8366_v4 = vld [vmem:[%s12170_s2 + $0x370] sm:$0xff]   ;;  %v8367_v13 = vld [vmem:[%s12170_s2 + $0x3e8] sm:$0xff]  }
 0x23a   : > { %v1794_v59 = vsel %vm1433_vm4, %v7945_v10, %v7940_v12  ;;  %v1795_v21 = vsel %vm1433_vm4, %v7946_v36, %v7941_v60  ;;  %v8384_v51 = vld [vmem:[%s12170_s2 + $0x310] sm:$0xff]  }
 0x23b   : > { %7444 = vmatpush3.bf16.msra.mxu0 %v8348_v56  ;;  %7474 = vmatpush3.bf16.msra.mxu1 %v8349_v27  ;;  %v10278_v41 = vpop.permute.xlu0 %7953  ;;  %v1856_v46 = vpack.c.bf16 %v1795_v21, %v1794_v59  ;;  %v1369_v55 = vsel %vm1363_vm3, %v7950_v28, %v7945_v10  ;;  %v1371_v29 = vsel %vm1363_vm3, %v7951_v9, %v7946_v36  ;;  %v8371_v36 = vld [vmem:[%s12170_s2 + $0x3e0] sm:$0xff]   ;;  %v8378_v59 = vld [vmem:[%s12170_s2 + $0x358] sm:$0xff]  }
 0x23c   : > { %7445 = vmatprep.subr.bf16.mxu0 %v8350_v63  ;;  %7475 = vmatprep.subr.bf16.mxu1 %v8351_v1  ;;  %v7956_v18 = vunpack.i.h.bf16 %v10278_v41  ;;  %v7955_v42 = vunpack.i.l.bf16 %v10278_v41  ;;  %v10324_v23 = vpop.permute.xlu1 %7958  ;;  %v8368_v63 = vld [vmem:[%s12170_s2 + $0x330] sm:$0xff]  }
 0x23d   : > { %v7961_v45 = vunpack.i.h.bf16 %v10324_v23  ;;  %v7960_v19 = vunpack.i.l.bf16 %v10324_v23 }
 0x23e   : > { %v1368_v31 = vsel %vm1363_vm3, %v7955_v42, %v7950_v28  ;;  %v1370_v14 = vsel %vm1363_vm3, %v7956_v18, %v7951_v9  ;;  %v8380_v9 = vld [vmem:[%s12170_s2 + $0x318] sm:$0xff]   ;;  %v8381_v28 = vld [vmem:[%s12170_s2 + $0x390] sm:$0xff]  }
 0x23f   : > { %7446 = vmatpush3.bf16.msra.mxu0 %v8352_v40  ;;  %7476 = vmatpush3.bf16.msra.mxu1 %v8353_v2  ;;  %v10314_v16 = vpop.permute.xlu0 %7963  ;;  %v1854_v54 = vpack.c.bf16 %v1370_v14, %v1368_v31  ;;  %v1855_v40 = vpack.c.bf16 %v1371_v29, %v1369_v55  ;;  %v8369_v2 = vld [vmem:[%s12170_s2 + $0x3a8] sm:$0xff]   ;;  %v8387_v14 = vld [vmem:[%s12170_s2 + $0x3c0] sm:$0xff]  }
 0x240   : > { %7447 = vmatprep.subr.bf16.mxu0 %v8354_v26  ;;  %7477 = vmatprep.subr.bf16.mxu1 %v8355_v37  ;;  %v7966_v24 = vunpack.i.h.bf16 %v10314_v16  ;;  %v7965_v7 = vunpack.i.l.bf16 %v10314_v16  ;;  %v10365_v61 = vpop.permute.xlu1 %7968  ;;  %v1505_v26 = vsel %vm1504_vm6, %v7960_v19, %v7961_v45  ;;  %v8370_v37 = vld [vmem:[%s12170_s2 + $0x368] sm:$0xff]  }
 0x241   : > { %v7971_v1 = vunpack.i.h.bf16 %v10365_v61  ;;  %v7970_v41 = vunpack.i.l.bf16 %v10365_v61 }
 0x242   : > { %v1507_v53 = vsel %vm1504_vm6, %v7965_v7, %v7966_v24 }
 0x243   : > { %7448 = vmatpush3.bf16.msra.mxu0 %v8356_v15  ;;  %7478 = vmatpush3.bf16.msra.mxu1 %v8357_v62  ;;  %v10352_v48 = vpop.permute.xlu0 %7973  ;;  %v1831_v58 = vpack.c.bf16 %v1507_v53, %v1505_v26  ;;  %v1790_v15 = vsel %vm1363_vm3, %v7906_v20, %v7955_v42  ;;  %v1791_v62 = vsel %vm1363_vm3, %v7901_v43, %v7956_v18  ;;  %v8376_v18 = vld [vmem:[%s12170_s2 + $0x320] sm:$0xff]   ;;  %v8377_v42 = vld [vmem:[%s12170_s2 + $0x398] sm:$0xff]   ;;  %vm4586_vm3 = vcmask 392192  }
 0x244   : > { %7449 = vmatprep.subr.bf16.mxu0 %v8358_v22  ;;  %7519 = vmatprep.subr.bf16.mxu1 %v8359_v35  ;;  %v7976_v56 = vunpack.i.h.bf16 %v10352_v48  ;;  %v7975_v27 = vunpack.i.l.bf16 %v10352_v48  ;;  %v10414_v20 = vpop.permute.xlu1 %7978  ;;  %v1853_v43 = vpack.c.bf16 %v1791_v62, %v1790_v15  ;;  %v8373_v22 = vld [vmem:[%s12170_s2 + $0x3a0] sm:$0xff]   ;;  %v8391_v53 = vld [vmem:[%s12170_s2 + $0x4f8] sm:$0xff]  }
 0x245   : > { %v8374_v35 = vld [vmem:[%s12170_s2 + $0x360] sm:$0xff]   ;;  %v7981_v55 = vunpack.i.h.bf16 %v10414_v20  ;;  %v7980_v29 = vunpack.i.l.bf16 %v10414_v20 }
 0x246   : > { %3976 = vmatmul.mubr.bf16.vlgmr.msra.gmra.mxu1 %v1826_v5  ;;  %v1435_v10 = vsel %vm1433_vm4, %v7975_v27, %v7970_v41  ;;  %v1437_v44 = vsel %vm1433_vm4, %v7976_v56, %v7971_v1  ;;  %v1434_v15 = vsel %vm1433_vm4, %v7925_v17, %v7975_v27  ;;  %v1436_v62 = vsel %vm1433_vm4, %v7926_v6, %v7976_v56 }
 0x247   : > { %7450 = vmatpush3.bf16.msra.mxu0 %v8360_v52  ;;  %3983 = vmatprep.mubr.bf16.mxu1 %v1856_v46  ;;  %v1829_v8 = vpack.c.bf16 %v1437_v44, %v1435_v10  ;;  %v8379_v52 = vld [vmem:[%s12170_s2 + $0x3d0] sm:$0xff]   ;;  %v10442_v5 = vpop.permute.xlu0 %7983  ;;  %v8385_v46 = vld [vmem:[%s12170_s2 + $0x388] sm:$0xff]   ;;  %v8394_v10 = vld [vmem:[%s12170_s2 + $0x478] sm:$0xff]  }
 0x248   : > { %7520 = vmatpush3.bf16.msra.mxu1 %v8361_v39  ;;  %7491 = vmatprep.subr.bf16.mxu0 %v8362_v30  ;;  %v10437_v21 = vpop.permute.xlu1 %7993  ;;  %v8382_v39 = vld [vmem:[%s12170_s2 + $0x350] sm:$0xff]   ;;  %v8383_v30 = vld [vmem:[%s12170_s2 + $0x3c8] sm:$0xff]  }
 0x249   : > { %7521 = vmatprep.subr.bf16.mxu1 %v8363_v25  ;;  %v8386_v25 = vld [vmem:[%s12170_s2 + $0x348] sm:$0xff]   ;;  %v7995_v61 = vunpack.i.l.bf16 %v10437_v21  ;;  %v8395_v44 = vld [vmem:[%s12170_s2 + $0x4f0] sm:$0xff]  }
 0x24a   : > { %3927 = vmatmul.mubr.bf16.vlgmr.msra.gmra.mxu0 %v1824_v50  ;;  %v7985_v50 = vunpack.i.l.bf16 %v10442_v5 }
 0x24b   : > { %3934 = vmatprep.mubr.bf16.mxu0 %v1854_v54  ;;  %7492 = vmatpush3.bf16.msra.mxu0 %v8364_v47  ;;  %v10467_v31 = vpop.permute.xlu0 %7988  ;;  %v7986_v47 = vunpack.i.h.bf16 %v10442_v5  ;;  %v8390_v54 = vld [vmem:[%s12170_s2 + $0x340] sm:$0xff]  }
 0x24c   : > { %7522 = vmatpush3.bf16.msra.mxu1 %v8365_v0  ;;  %7493 = vmatprep.subr.bf16.mxu0 %v8366_v4  ;;  %v10456_v38 = vpop.permute.xlu1 %7998  ;;  %v8388_v0 = vld [vmem:[%s12170_s2 + $0x308] sm:$0xff]   ;;  %v8389_v4 = vld [vmem:[%s12170_s2 + $0x380] sm:$0xff]   ;;  %v7990_v26 = vunpack.i.l.bf16 %v10467_v31 }
 0x24d   : > { %7523 = vmatprep.subr.bf16.mxu1 %v8367_v13 }
 0x24e   : > { %3984 = vmatmul.mubr.bf16.gmra.mxu1 %v1855_v40  ;;  %v1797_v40 = vsel %vm1504_vm6, %v7971_v1, %v7965_v7  ;;  %v8393_v7 = vld [vmem:[%s12170_s2 + $0x4b8] sm:$0xff]   ;;  %v1439_v48 = vsel %vm1433_vm4, %v7990_v26, %v7995_v61 }
 0x24f   : > { %7494 = vmatpush3.bf16.msra.mxu0 %v8368_v63  ;;  %4073 = vmatprep.mubr.bf16.mxu1 %v1831_v58  ;;  %v1796_v63 = vsel %vm1504_vm6, %v7970_v41, %v7960_v19  ;;  %v8392_v58 = vld [vmem:[%s12170_s2 + $0x300] sm:$0xff]   ;;  %v1511_v19 = vsel %vm1504_vm6, %v7985_v50, %v7986_v47  ;;  %v7996_v41 = vunpack.i.h.bf16 %v10437_v21 }
 0x250   : > { %7524 = vmatpush3.bf16.msra.mxu1 %v8369_v2  ;;  %7495 = vmatprep.subr.bf16.mxu0 %v8370_v37  ;;  %v10485_v13 = vpop.permute.xlu1 %8008  ;;  %v7991_v2 = vunpack.i.h.bf16 %v10467_v31  ;;  %v10502_v37 = vpop.permute.xlu0 %8003  ;;  %v1830_v1 = vpack.c.bf16 %v1797_v40, %v1796_v63  ;;  %v8401_v31 = vld [vmem:[%s12170_s2 + $0x4a8] sm:$0xff]   ;;  %v8405_v40 = vld [vmem:[%s12170_s2 + $0x4a0] sm:$0xff]  }
 0x251   : > { %7525 = vmatprep.subr.bf16.mxu1 %v8371_v36  ;;  %v1509_v36 = vsel %vm1504_vm6, %v7980_v29, %v7981_v55  ;;  %v8006_v6 = vunpack.i.h.bf16 %v10502_v37  ;;  %v8005_v56 = vunpack.i.l.bf16 %v10502_v37 }
 0x252   : > { %3935 = vmatmul.mubr.bf16.gmra.mxu0 %v1853_v43  ;;  %v1860_v17 = vpack.c.bf16 %v1511_v19, %v1509_v36  ;;  %v1441_v34 = vsel %vm1433_vm4, %v7991_v2, %v7996_v41  ;;  %v1828_v43 = vpack.c.bf16 %v1436_v62, %v1434_v15  ;;  %v8408_v19 = vld [vmem:[%s12170_s2 + $0x420] sm:$0xff]   ;;  %v8412_v62 = vld [vmem:[%s12170_s2 + $0x418] sm:$0xff]   ;;  %v8413_v36 = vld [vmem:[%s12170_s2 + $0x490] sm:$0xff]  }
 0x253   : > { %7496 = vmatpush3.bf16.msra.mxu0 %v8372_v32  ;;  %4024 = vmatprep.mubr.bf16.mxu0 %v1829_v8  ;;  %v8396_v32 = vld [vmem:[%s12170_s2 + $0x438] sm:$0xff]   ;;  %v8001_v8 = vunpack.i.h.bf16 %v10456_v38 }
 0x254   : > { %7526 = vmatpush3.bf16.msra.mxu1 %v8373_v22  ;;  %7497 = vmatprep.subr.bf16.mxu0 %v8374_v35  ;;  %v10538_v27 = vpop.permute.xlu1 %8018  ;;  %v8397_v22 = vld [vmem:[%s12170_s2 + $0x4b0] sm:$0xff]  }
 0x255   : > { %7527 = vmatprep.subr.bf16.mxu1 %v8375_v57  ;;  %v8398_v35 = vld [vmem:[%s12170_s2 + $0x470] sm:$0xff]   ;;  %v8000_v57 = vunpack.i.l.bf16 %v10456_v38  ;;  %v8021_v21 = vunpack.i.h.bf16 %v10538_v27 }
 0x257   : > { %7498 = vmatpush3.bf16.msra.mxu0 %v8376_v18  ;;  %v10551_v18 = vpop.permute.xlu0 %8013 }
 0x258   : > { %7528 = vmatpush3.bf16.msra.mxu1 %v8377_v42  ;;  %7499 = vmatprep.subr.bf16.mxu0 %v8378_v59  ;;  %v1858_v42 = vpack.c.bf16 %v1441_v34, %v1439_v48  ;;  %v8399_v59 = vld [vmem:[%s12170_s2 + $0x4e8] sm:$0xff]   ;;  %v10628_v15 = vpop.permute.xlu1 %8023  ;;  %v8416_v48 = vld [vmem:[%s12170_s2 + $0x410] sm:$0xff]  }
 0x259   : > { %7529 = vmatprep.subr.bf16.mxu1 %v8379_v52  ;;  %v8020_v52 = vunpack.i.l.bf16 %v10538_v27  ;;  %v8417_v34 = vld [vmem:[%s12170_s2 + $0x488] sm:$0xff]  }
 0x25b   : > { %7500 = vmatpush3.bf16.msra.mxu0 %v8380_v9  ;;  %v1798_v9 = vsel %vm1504_vm6, %v7995_v61, %v7980_v29  ;;  %v8410_v61 = vld [vmem:[%s12170_s2 + $0x458] sm:$0xff]  }
 0x25c   : > { %7530 = vmatpush3.bf16.msra.mxu1 %v8381_v28  ;;  %7501 = vmatprep.subr.bf16.mxu0 %v8382_v39  ;;  %v1799_v28 = vsel %vm1504_vm6, %v7996_v41, %v7985_v50  ;;  %v8400_v39 = vld [vmem:[%s12170_s2 + $0x430] sm:$0xff]   ;;  %v1438_v50 = vsel %vm1433_vm4, %v7940_v12, %v7990_v26  ;;  %v8404_v12 = vld [vmem:[%s12170_s2 + $0x428] sm:$0xff]   ;;  %v8409_v41 = vld [vmem:[%s12170_s2 + $0x498] sm:$0xff]  }
 0x25d   : > { %7531 = vmatprep.subr.bf16.mxu1 %v8383_v30  ;;  %v1804_v30 = vsel %vm1651_vm7, %v8000_v57, %v8005_v56 }
 0x25f   : > { %7502 = vmatpush3.bf16.msra.mxu0 %v8384_v51  ;;  %v1805_v51 = vsel %vm1651_vm7, %v8001_v8, %v8006_v6 }
 0x260   : > { %7532 = vmatpush3.bf16.msra.mxu1 %v8385_v46  ;;  %7503 = vmatprep.subr.bf16.mxu0 %v8386_v25  ;;  %v8011_v46 = vunpack.i.h.bf16 %v10485_v13  ;;  %v8010_v25 = vunpack.i.l.bf16 %v10485_v13  ;;  %v1835_v29 = vpack.c.bf16 %v1805_v51, %v1804_v30  ;;  %v8422_v30 = vld [vmem:[%s12170_s2 + $0x440] sm:$0xff]  }
 0x261   : > { %7533 = vmatprep.subr.bf16.mxu1 %v8387_v14  ;;  %v1859_v14 = vpack.c.bf16 %v1799_v28, %v1798_v9  ;;  %v8420_v28 = vld [vmem:[%s12170_s2 + $0x408] sm:$0xff]  }
 0x262   : > { %v1574_v33 = vsel %vm1571_vm8, %v8021_v21, %v8011_v46  ;;  %v1575_v51 = vsel %vm1571_vm8, %v8011_v46, %v8001_v8 }
 0x263   : > { %7504 = vmatpush3.bf16.msra.mxu0 %v8388_v0  ;;  %v1440_v0 = vsel %vm1433_vm4, %v7941_v60, %v7991_v2  ;;  %v10600_v60 = vpop.permute.xlu0 %8028  ;;  %v8406_v2 = vld [vmem:[%s12170_s2 + $0x460] sm:$0xff]   ;;  %vm4582_vm4 = vcmask 261120  }
 0x264   : > { %7534 = vmatpush3.bf16.msra.mxu1 %v8389_v4  ;;  %7505 = vmatprep.subr.bf16.mxu0 %v8390_v54  ;;  %v8402_v4 = vld [vmem:[%s12170_s2 + $0x468] sm:$0xff]   ;;  %v8403_v54 = vld [vmem:[%s12170_s2 + $0x4e0] sm:$0xff]   ;;  %v1857_v63 = vpack.c.bf16 %v1440_v0, %v1438_v50  ;;  %v8423_v0 = vld [vmem:[%s12170_s2 + $0x5f8] sm:$0xff]  }
 0x265   : > { %7575 = vmatprep.subr.bf16.mxu1 %v8391_v53  ;;  %v1572_v53 = vsel %vm1571_vm8, %v8020_v52, %v8010_v25 }
 0x266   : > { %v1833_v26 = vpack.c.bf16 %v1574_v33, %v1572_v53  ;;  %v8426_v33 = vld [vmem:[%s12170_s2 + $0x578] sm:$0xff]  }
 0x267   : > { %4074 = vmatmul.mubr.bf16.vlgmr.msra.gmra.mxu1 %v1830_v1  ;;  %7506 = vmatpush3.bf16.msra.mxu0 %v8392_v58  ;;  %v8407_v58 = vld [vmem:[%s12170_s2 + $0x4d8] sm:$0xff]   ;;  %v8411_v1 = vld [vmem:[%s12170_s2 + $0x4d0] sm:$0xff]  }
 0x268   : > { %4081 = vmatprep.mubr.bf16.mxu1 %v1860_v17  ;;  %7576 = vmatpush3.bf16.msra.mxu1 %v8393_v7  ;;  %v10623_v7 = vpop.permute.xlu0 %8033 }
 0x269   : > { %7547 = vmatprep.subr.bf16.mxu0 %v8394_v10  ;;  %7577 = vmatprep.subr.bf16.mxu1 %v8395_v44  ;;  %v8414_v10 = vld [vmem:[%s12170_s2 + $0x450] sm:$0xff]   ;;  %v8415_v44 = vld [vmem:[%s12170_s2 + $0x4c8] sm:$0xff]   ;;  %v8035_v9 = vunpack.i.l.bf16 %v10623_v7 }
 0x26a   : > { %4025 = vmatmul.mubr.bf16.vlgmr.msra.gmra.mxu0 %v1828_v43  ;;  %v10653_v43 = vpop.permute.xlu1 %8043 }
 0x26b   : > { %4032 = vmatprep.mubr.bf16.mxu0 %v1858_v42  ;;  %7548 = vmatpush3.bf16.msra.mxu0 %v8396_v32  ;;  %v8418_v32 = vld [vmem:[%s12170_s2 + $0x448] sm:$0xff]   ;;  %v8015_v42 = vunpack.i.l.bf16 %v10551_v18 }
 0x26c   : > { %7578 = vmatpush3.bf16.msra.mxu1 %v8397_v22  ;;  %7549 = vmatprep.subr.bf16.mxu0 %v8398_v35  ;;  %v10642_v17 = vpop.permute.xlu0 %8038  ;;  %v8419_v22 = vld [vmem:[%s12170_s2 + $0x4c0] sm:$0xff]   ;;  %v8016_v35 = vunpack.i.h.bf16 %v10551_v18  ;;  %v1573_v18 = vsel %vm1571_vm8, %v8010_v25, %v8000_v57 }
 0x26d   : > { %7579 = vmatprep.subr.bf16.mxu1 %v8399_v59  ;;  %v8036_v59 = vunpack.i.h.bf16 %v10623_v7  ;;  %v1506_v57 = vsel %vm1504_vm6, %v7961_v45, %v8015_v42  ;;  %v8041_v13 = vunpack.i.h.bf16 %v10642_v17  ;;  %v8040_v8 = vunpack.i.l.bf16 %v10642_v17  ;;  %v8424_v25 = vld [vmem:[%s12170_s2 + $0x400] sm:$0xff]  }
 0x26e   : > { %v1508_v38 = vsel %vm1504_vm6, %v7966_v24, %v8016_v35  ;;  %v10696_v46 = vpop.permute.xlu1 %8048  ;;  %v8031_v24 = vunpack.i.h.bf16 %v10600_v60  ;;  %v8030_v45 = vunpack.i.l.bf16 %v10600_v60  ;;  %v8427_v60 = vld [vmem:[%s12170_s2 + $0x5f0] sm:$0xff]  }
 0x26f   : > { %4082 = vmatmul.mubr.bf16.gmra.mxu1 %v1859_v14  ;;  %7550 = vmatpush3.bf16.msra.mxu0 %v8400_v39  ;;  %v8421_v39 = vld [vmem:[%s12170_s2 + $0x480] sm:$0xff]   ;;  %v8025_v14 = vunpack.i.l.bf16 %v10628_v15  ;;  %v1801_v53 = vsel %vm1571_vm8, %v1508_v38, %v8021_v21 }
 0x270   : > { %7580 = vmatpush3.bf16.msra.mxu1 %v8401_v31  ;;  %4171 = vmatprep.mubr.bf16.mxu1 %v1835_v29  ;;  %v8026_v31 = vunpack.i.h.bf16 %v10628_v15  ;;  %v10683_v50 = vpop.permute.xlu0 %8053  ;;  %v1800_v29 = vsel %vm1571_vm8, %v1506_v57, %v8020_v52  ;;  %v1578_v52 = vsel %vm1571_vm8, %v8041_v13, %v8031_v24  ;;  %v8437_v38 = vld [vmem:[%s12170_s2 + $0x5a0] sm:$0xff]  }
 0x271   : > { %7551 = vmatprep.subr.bf16.mxu0 %v8402_v4  ;;  %7581 = vmatprep.subr.bf16.mxu1 %v8403_v54  ;;  %v1806_v23 = vsel %vm1651_vm7, %v8035_v9, %v8025_v14  ;;  %v8425_v4 = vld [vmem:[%s12170_s2 + $0x5b8] sm:$0xff]   ;;  %v1834_v54 = vpack.c.bf16 %v1575_v51, %v1573_v18  ;;  %v8056_v27 = vunpack.i.h.bf16 %v10683_v50  ;;  %v8055_v21 = vunpack.i.l.bf16 %v10683_v50 }
 0x272   : > { %4033 = vmatmul.mubr.bf16.gmra.mxu0 %v1857_v63  ;;  %v1807_v16 = vsel %vm1651_vm7, %v8036_v59, %v8026_v31  ;;  %v1576_v63 = vsel %vm1571_vm8, %v8040_v8, %v8030_v45 }
 0x273   : > { %7552 = vmatpush3.bf16.msra.mxu0 %v8404_v12  ;;  %4122 = vmatprep.mubr.bf16.mxu0 %v1833_v26  ;;  %v1864_v12 = vpack.c.bf16 %v1807_v16, %v1806_v23  ;;  %v1832_v26 = vpack.c.bf16 %v1801_v53, %v1800_v29  ;;  %v1703_v35 = vsel %vm1700_vm9, %v8055_v21, %v8056_v27  ;;  %v8440_v23 = vld [vmem:[%s12170_s2 + $0x520] sm:$0xff]   ;;  %v8441_v16 = vld [vmem:[%s12170_s2 + $0x598] sm:$0xff]   ;;  %v8445_v53 = vld [vmem:[%s12170_s2 + $0x590] sm:$0xff]  }
 0x274   : > { %7582 = vmatpush3.bf16.msra.mxu1 %v8405_v40  ;;  %7553 = vmatprep.subr.bf16.mxu0 %v8406_v2  ;;  %v10732_v40 = vpop.permute.xlu0 %8063  ;;  %v8428_v2 = vld [vmem:[%s12170_s2 + $0x538] sm:$0xff]  }
 0x275   : > { %7583 = vmatprep.subr.bf16.mxu1 %v8407_v58  ;;  %v8046_v58 = vunpack.i.h.bf16 %v10653_v43  ;;  %v8444_v29 = vld [vmem:[%s12170_s2 + $0x518] sm:$0xff]  }
 0x277   : > { %7554 = vmatpush3.bf16.msra.mxu0 %v8408_v19  ;;  %v8045_v19 = vunpack.i.l.bf16 %v10653_v43  ;;  %v1579_v43 = vsel %vm1571_vm8, %v8031_v24, %v8036_v59  ;;  %v1512_v7 = vsel %vm1504_vm6, %v7986_v47, %v8046_v58  ;;  %v8442_v24 = vld [vmem:[%s12170_s2 + $0x558] sm:$0xff]   ;;  %v8451_v58 = vld [vmem:[%s12170_s2 + $0x5c0] sm:$0xff]  }
 0x278   : > { %7584 = vmatpush3.bf16.msra.mxu1 %v8409_v41  ;;  %7555 = vmatprep.subr.bf16.mxu0 %v8410_v61  ;;  %v8429_v41 = vld [vmem:[%s12170_s2 + $0x5b0] sm:$0xff]   ;;  %v1803_v47 = vsel %vm1571_vm8, %v1512_v7, %v8041_v13  ;;  %v8438_v13 = vld [vmem:[%s12170_s2 + $0x560] sm:$0xff]  }
 0x279   : > { %7585 = vmatprep.subr.bf16.mxu1 %v8411_v1  ;;  %v8430_v61 = vld [vmem:[%s12170_s2 + $0x570] sm:$0xff]   ;;  %v8051_v1 = vunpack.i.h.bf16 %v10696_v46  ;;  %v1510_v42 = vsel %vm1504_vm6, %v7981_v55, %v8045_v19  ;;  %v8434_v55 = vld [vmem:[%s12170_s2 + $0x568] sm:$0xff]   ;;  %vm4590_vm6 = vcmask 523264  }
 0x27a   : > { %v1802_v5 = vsel %vm1571_vm8, %v1510_v42, %v8040_v8 }
 0x27b   : > { %7556 = vmatpush3.bf16.msra.mxu0 %v8412_v62  ;;  %v8050_v62 = vunpack.i.l.bf16 %v10696_v46  ;;  %v1861_v57 = vpack.c.bf16 %v1803_v47, %v1802_v5  ;;  %v8456_v5 = vld [vmem:[%s12170_s2 + $0x500] sm:$0xff]  }
 0x27c   : > { %7586 = vmatpush3.bf16.msra.mxu1 %v8413_v36  ;;  %7557 = vmatprep.subr.bf16.mxu0 %v8414_v10  ;;  %v10747_v36 = vpop.permute.xlu1 %8058  ;;  %v1862_v10 = vpack.c.bf16 %v1578_v52, %v1576_v63  ;;  %v8448_v63 = vld [vmem:[%s12170_s2 + $0x510] sm:$0xff]   ;;  %v8449_v52 = vld [vmem:[%s12170_s2 + $0x588] sm:$0xff]  }
 0x27d   : > { %7587 = vmatprep.subr.bf16.mxu1 %v8415_v44  ;;  %v8431_v44 = vld [vmem:[%s12170_s2 + $0x5e8] sm:$0xff]   ;;  %v8061_v59 = vunpack.i.h.bf16 %v10747_v36  ;;  %v1701_v20 = vsel %vm1700_vm9, %v8050_v62, %v8051_v1 }
 0x27e   : > { %v1839_v18 = vpack.c.bf16 %v1703_v35, %v1701_v20  ;;  %v8455_v35 = vld [vmem:[%s12170_s2 + $0x6f8] sm:$0xff]  }
 0x27f   : > { %7558 = vmatpush3.bf16.msra.mxu0 %v8416_v48  ;;  %v8066_v48 = vunpack.i.h.bf16 %v10732_v40  ;;  %v1809_v7 = vsel %vm1700_vm9, %v8061_v59, %v8055_v21  ;;  %v8457_v21 = vld [vmem:[%s12170_s2 + $0x6b8] sm:$0xff]  }
 0x280   : > { %7588 = vmatpush3.bf16.msra.mxu1 %v8417_v34  ;;  %7559 = vmatprep.subr.bf16.mxu0 %v8418_v32  ;;  %v8065_v34 = vunpack.i.l.bf16 %v10732_v40  ;;  %v1577_v32 = vsel %vm1571_vm8, %v8030_v45, %v8035_v9  ;;  %v8060_v9 = vunpack.i.l.bf16 %v10747_v36  ;;  %v10823_v45 = vpop.permute.xlu0 %8073  ;;  %vm4598_vm8 = vcmask 785408  }
 0x281   : > { %7589 = vmatprep.subr.bf16.mxu1 %v8419_v22  ;;  %v8432_v22 = vld [vmem:[%s12170_s2 + $0x530] sm:$0xff]   ;;  %v1655_v17 = vsel %vm1651_vm7, %v8066_v48, %v8061_v59  ;;  %v8076_v19 = vunpack.i.h.bf16 %v10823_v45 }
 0x282   : > { %v1653_v51 = vsel %vm1651_vm7, %v8065_v34, %v8060_v9  ;;  %v1808_v42 = vsel %vm1700_vm9, %v8060_v9, %v8050_v62  ;;  %v1652_v47 = vsel %vm1651_vm7, %v8005_v56, %v8065_v34 }
 0x283   : > { %7560 = vmatpush3.bf16.msra.mxu0 %v8420_v28  ;;  %v8433_v28 = vld [vmem:[%s12170_s2 + $0x5a8] sm:$0xff]   ;;  %v1837_v8 = vpack.c.bf16 %v1655_v17, %v1653_v51  ;;  %v1838_v59 = vpack.c.bf16 %v1809_v7, %v1808_v42  ;;  %v8459_v51 = vld [vmem:[%s12170_s2 + $0x6f0] sm:$0xff]   ;;  %v8460_v17 = vld [vmem:[%s12170_s2 + $0x638] sm:$0xff]  }
 0x284   : > { %7590 = vmatpush3.bf16.msra.mxu1 %v8421_v39  ;;  %7561 = vmatprep.subr.bf16.mxu0 %v8422_v30  ;;  %v1863_v39 = vpack.c.bf16 %v1579_v43, %v1577_v32  ;;  %v8435_v30 = vld [vmem:[%s12170_s2 + $0x5e0] sm:$0xff]  }
 0x285   : > { %7631 = vmatprep.subr.bf16.mxu1 %v8423_v0  ;;  %v8436_v0 = vld [vmem:[%s12170_s2 + $0x528] sm:$0xff]  }
 0x287   : > { %4172 = vmatmul.mubr.bf16.vlgmr.msra.gmra.mxu1 %v1834_v54  ;;  %7562 = vmatpush3.bf16.msra.mxu0 %v8424_v25  ;;  %v8439_v25 = vld [vmem:[%s12170_s2 + $0x5d8] sm:$0xff]   ;;  %v10828_v54 = vpop.permute.xlu1 %8068 }
 0x288   : > { %4179 = vmatprep.mubr.bf16.mxu1 %v1864_v12  ;;  %7632 = vmatpush3.bf16.msra.mxu1 %v8425_v4  ;;  %v8443_v4 = vld [vmem:[%s12170_s2 + $0x5d0] sm:$0xff]   ;;  %v10842_v12 = vpop.permute.xlu0 %8078  ;;  %v8071_v32 = vunpack.i.h.bf16 %v10828_v54  ;;  %v8070_v43 = vunpack.i.l.bf16 %v10828_v54 }
 0x289   : > { %7603 = vmatprep.subr.bf16.mxu0 %v8426_v33  ;;  %7633 = vmatprep.subr.bf16.mxu1 %v8427_v60  ;;  %v8446_v33 = vld [vmem:[%s12170_s2 + $0x550] sm:$0xff]   ;;  %v8447_v60 = vld [vmem:[%s12170_s2 + $0x5c8] sm:$0xff]  }
 0x28a   : > { %4123 = vmatmul.mubr.bf16.vlgmr.msra.gmra.mxu0 %v1832_v26 }
 0x28b   : > { %4130 = vmatprep.mubr.bf16.mxu0 %v1862_v10  ;;  %7604 = vmatpush3.bf16.msra.mxu0 %v8428_v2  ;;  %v8450_v2 = vld [vmem:[%s12170_s2 + $0x548] sm:$0xff]   ;;  %v10853_v26 = vpop.permute.xlu1 %8083  ;;  %v8453_v10 = vld [vmem:[%s12170_s2 + $0x580] sm:$0xff]  }
 0x28c   : > { %7634 = vmatpush3.bf16.msra.mxu1 %v8429_v41  ;;  %7605 = vmatprep.subr.bf16.mxu0 %v8430_v61  ;;  %v8075_v41 = vunpack.i.l.bf16 %v10823_v45  ;;  %v8452_v61 = vld [vmem:[%s12170_s2 + $0x508] sm:$0xff]   ;;  %v8086_v9 = vunpack.i.h.bf16 %v10853_v26  ;;  %v8085_v36 = vunpack.i.l.bf16 %v10853_v26 }
 0x28d   : > { %7635 = vmatprep.subr.bf16.mxu1 %v8431_v44  ;;  %v8454_v44 = vld [vmem:[%s12170_s2 + $0x540] sm:$0xff]   ;;  %v8465_v26 = vld [vmem:[%s12170_s2 + $0x6a8] sm:$0xff]  }
 0x28e   : > { %v1707_v62 = vsel %vm1700_vm9, %v8075_v41, %v8076_v19 }
 0x28f   : > { %4180 = vmatmul.mubr.bf16.gmra.mxu1 %v1863_v39  ;;  %7606 = vmatpush3.bf16.msra.mxu0 %v8432_v22  ;;  %v10871_v22 = vpop.permute.xlu0 %8093  ;;  %v8080_v39 = vunpack.i.l.bf16 %v10842_v12  ;;  %v10888_v20 = vpop.permute.xlu1 %8088 }
 0x290   : > { %7636 = vmatpush3.bf16.msra.mxu1 %v8433_v28  ;;  %4269 = vmatprep.mubr.bf16.mxu1 %v1839_v18  ;;  %v8081_v28 = vunpack.i.h.bf16 %v10842_v12  ;;  %v8458_v18 = vld [vmem:[%s12170_s2 + $0x678] sm:$0xff]   ;;  %v10957_v12 = vld [vmem:[%s12171_s3] ss:$0 sm:$0xff] }
 0x291   : > { %7607 = vmatprep.subr.bf16.mxu0 %v8434_v55  ;;  %7637 = vmatprep.subr.bf16.mxu1 %v8435_v30  ;;  %v1654_v55 = vsel %vm1651_vm7, %v8006_v6, %v8066_v48  ;;  %v1705_v30 = vsel %vm1700_vm9, %v8070_v43, %v8071_v32  ;;  %v1657_v40 = vsel %vm1651_vm7, %v8080_v39, %v8085_v36  ;;  %v8096_v6 = vunpack.i.h.bf16 %v10871_v22 }
 0x292   : > { %4131 = vmatmul.mubr.bf16.gmra.mxu0 %v1861_v57  ;;  %v1868_v56 = vpack.c.bf16 %v1707_v62, %v1705_v30  ;;  %v1659_v37 = vsel %vm1651_vm7, %v8081_v28, %v8086_v9  ;;  %v8095_v48 = vunpack.i.l.bf16 %v10871_v22  ;;  %v8461_v57 = vld [vmem:[%s12170_s2 + $0x6b0] sm:$0xff]  }
 0x293   : > { %7608 = vmatpush3.bf16.msra.mxu0 %v8436_v0  ;;  %4220 = vmatprep.mubr.bf16.mxu0 %v1837_v8  ;;  %v10924_v34 = vpop.permute.xlu0 %8103  ;;  %v1836_v0 = vpack.c.bf16 %v1654_v55, %v1652_v47  ;;  %v8090_v8 = vunpack.i.l.bf16 %v10888_v20  ;;  %v3736_v55 = vadd.f32 %v10252_v3, %v10957_v12 }
 0x294   : > { %7638 = vmatpush3.bf16.msra.mxu1 %v8437_v38  ;;  %7609 = vmatprep.subr.bf16.mxu0 %v8438_v13  ;;  %v8462_v38 = vld [vmem:[%s12170_s2 + $0x670] sm:$0xff]   ;;  %v8091_v13 = vunpack.i.h.bf16 %v10888_v20 }
 0x295   : > { %7639 = vmatprep.subr.bf16.mxu1 %v8439_v25  ;;  %v10937_v25 = vpop.permute.xlu1 %8098 }
 0x297   : > { %7610 = vmatpush3.bf16.msra.mxu0 %v8440_v23  ;;  %v1866_v23 = vpack.c.bf16 %v1659_v37, %v1657_v40  ;;  %v8473_v40 = vld [vmem:[%s12170_s2 + $0x698] sm:$0xff]  }
 0x298   : > { %7640 = vmatpush3.bf16.msra.mxu1 %v8441_v16  ;;  %7611 = vmatprep.subr.bf16.mxu0 %v8442_v24  ;;  %v8463_v16 = vld [vmem:[%s12170_s2 + $0x6e8] sm:$0xff]   ;;  %v8106_v24 = vunpack.i.h.bf16 %v10924_v34  ;;  %v8474_v37 = vld [vmem:[%s12170_s2 + $0x658] sm:$0xff]  }
 0x299   : > { %7641 = vmatprep.subr.bf16.mxu1 %v8443_v4  ;;  %v8105_v4 = vunpack.i.l.bf16 %v10924_v34 }
 0x29b   : > { %7612 = vmatpush3.bf16.msra.mxu0 %v8444_v29  ;;  %v1810_v29 = vsel %vm1700_vm9, %v8085_v36, %v8070_v43  ;;  %v8467_v43 = vld [vmem:[%s12170_s2 + $0x6e0] sm:$0xff]  }
 0x29c   : > { %7642 = vmatpush3.bf16.msra.mxu1 %v8445_v53  ;;  %7613 = vmatprep.subr.bf16.mxu0 %v8446_v33  ;;  %v1811_v53 = vsel %vm1700_vm9, %v8086_v9, %v8075_v41  ;;  %v8464_v33 = vld [vmem:[%s12170_s2 + $0x630] sm:$0xff]   ;;  %v1757_v41 = vsel %vm1755_vm11, %v8090_v8, %v8091_v13  ;;  %v8469_v9 = vld [vmem:[%s12170_s2 + $0x6a0] sm:$0xff]  }
 0x29d   : > { %7643 = vmatprep.subr.bf16.mxu1 %v8447_v60  ;;  %v1759_v60 = vsel %vm1755_vm11, %v8095_v48, %v8096_v6 }
 0x29f   : > { %7614 = vmatpush3.bf16.msra.mxu0 %v8448_v63  ;;  %v8101_v63 = vunpack.i.h.bf16 %v10937_v25 }
 0x2a0   : > { %7644 = vmatpush3.bf16.msra.mxu1 %v8449_v52  ;;  %7615 = vmatprep.subr.bf16.mxu0 %v8450_v2  ;;  %v8100_v52 = vunpack.i.l.bf16 %v10937_v25  ;;  %v1704_v25 = vsel %vm1700_vm9, %v8056_v27, %v8106_v24  ;;  %v12256_v27 = vmov 0  }
 0x2a1   : > { %7645 = vmatprep.subr.bf16.mxu1 %v8451_v58  ;;  %v1867_v58 = vpack.c.bf16 %v1811_v53, %v1810_v29  ;;  %v1813_v15 = vsel %vm1755_vm11, %v8106_v24, %v8101_v63  ;;  %v8477_v53 = vld [vmem:[%s12170_s2 + $0x690] sm:$0xff]  }
 0x2a3   : > { %7616 = vmatpush3.bf16.msra.mxu0 %v8452_v61  ;;  %v1656_v61 = vsel %vm1651_vm7, %v8025_v14, %v8080_v39  ;;  %v1812_v14 = vsel %vm1755_vm11, %v8105_v4, %v8100_v52  ;;  %v7348_v39 = vpop.f32.mrf.mxu0 }
 0x2a4   : > { %7646 = vmatpush3.bf16.msra.mxu1 %v8453_v10  ;;  %7617 = vmatprep.subr.bf16.mxu0 %v8454_v44  ;;  %v1658_v10 = vsel %vm1651_vm7, %v8026_v31, %v8081_v28  ;;  %v8466_v44 = vld [vmem:[%s12170_s2 + $0x668] sm:$0xff]   ;;  %v3733_v31 = vadd.f32 %v10222_v11, %v10957_v12  ;;  %v8470_v11 = vld [vmem:[%s12170_s2 + $0x660] sm:$0xff]   ;;  %vm4594_vm7 = vcmask 654336  }
 0x2a5   : > { %7687 = vmatprep.subr.bf16.mxu1 %v8455_v35  ;;  %v1843_v35 = vpack.c.bf16 %v1759_v60, %v1757_v41  ;;  %v8468_v28 = vld [vmem:[%s12170_s2 + $0x628] sm:$0xff]   ;;  %v1865_v62 = vpack.c.bf16 %v1658_v10, %v1656_v61  ;;  %v11034_v60 = vpop.permute.xlu0 %8108  ;;  %v11042_v41 = vpop.permute.xlu1 %8113  ;;  %v8480_v10 = vld [vmem:[%s12170_s2 + $0x610] sm:$0xff]  }
 0x2a7   : > { %4270 = vmatmul.mubr.bf16.vlgmr.msra.gmra.mxu1 %v1838_v59  ;;  %7618 = vmatpush3.bf16.msra.mxu0 %v8456_v5  ;;  %v8471_v59 = vld [vmem:[%s12170_s2 + $0x6d8] sm:$0xff]  }
 0x2a8   : > { %4277 = vmatprep.mubr.bf16.mxu1 %v1868_v56  ;;  %7688 = vmatpush3.bf16.msra.mxu1 %v8457_v21  ;;  %v1841_v21 = vpack.c.bf16 %v1813_v15, %v1812_v14  ;;  %v8110_v14 = vunpack.i.l.bf16 %v11034_v60 }
 0x2a9   : > { %7659 = vmatprep.subr.bf16.mxu0 %v8458_v18  ;;  %7689 = vmatprep.subr.bf16.mxu1 %v8459_v51  ;;  %v8472_v18 = vld [vmem:[%s12170_s2 + $0x620] sm:$0xff]   ;;  %v7349_v51 = vpop.f32.mrf.mxu0  ;;  %v8124_v15 = vpop.permute.xlu0 %8123 }
 0x2aa   : > { %4221 = vmatmul.mubr.bf16.vlgmr.msra.gmra.mxu0 %v1836_v0 }
 0x2ab   : > { %4228 = vmatprep.mubr.bf16.mxu0 %v1866_v23  ;;  %7660 = vmatpush3.bf16.msra.mxu0 %v8460_v17  ;;  %v8475_v17 = vld [vmem:[%s12170_s2 + $0x6d0] sm:$0xff]  }
 0x2ac   : > { %7690 = vmatpush3.bf16.msra.mxu1 %v8461_v57  ;;  %v7367_v2 = vpop.f32.mrf.mxu1  ;;  %7661 = vmatprep.subr.bf16.mxu0 %v8462_v38  ;;  %v3741_v57 = vadd.f32 %v10276_v49, %v10957_v12  ;;  %v7350_v38 = vadd.f32 %v7349_v51, %v7348_v39  ;;  %v8487_v39 = vld [vmem:[%s12170_s2 + $0x708] sm:$0x1f]  }
 0x2ad   : > { %7691 = vmatprep.subr.bf16.mxu1 %v8463_v16  ;;  %v8476_v16 = vld [vmem:[%s12170_s2 + $0x618] sm:$0xff]  }
 0x2ae   : > { %v7368_v42 = vpop.f32.mrf.mxu1 }
 0x2af   : > { %4278 = vmatmul.mubr.bf16.gmra.mxu1 %v1867_v58  ;;  %7662 = vmatpush3.bf16.msra.mxu0 %v8464_v33  ;;  %v7369_v7 = vadd.f32 %v7368_v42, %v7367_v2  ;;  %v8478_v33 = vld [vmem:[%s12170_s2 + $0x650] sm:$0xff]   ;;  %v8479_v2 = vld [vmem:[%s12170_s2 + $0x6c8] sm:$0xff]   ;;  %v3744_v58 = vadd.f32 %v7350_v38, %v10957_v12  ;;  %v8483_v12 = vld [vmem:[%s12170_s2 + $0x6c0] sm:$0xff]   ;;  %v8111_v42 = vunpack.i.h.bf16 %v11034_v60 }
 0x2b0   : > { %7692 = vmatpush3.bf16.msra.mxu1 %v8465_v26  ;;  %4367 = vmatprep.mubr.bf16.mxu1 %v1843_v35  ;;  %v7370_v5 = vpop.f32.mrf.mxu1 }
 0x2b1   : > { %v11002_v36 = vadd.f32 %v7369_v7, %v3733_v31  ;;  %7663 = vmatprep.subr.bf16.mxu0 %v8466_v44  ;;  %7693 = vmatprep.subr.bf16.mxu1 %v8467_v43  ;;  %v8481_v44 = vld [vmem:[%s12170_s2 + $0x688] sm:$0xff]   ;;  %v8485_v7 = vld [vmem:[%s12170_s2 + $0x680] sm:$0xff]  }
 0x2b2   : > { %4229 = vmatmul.mubr.bf16.gmra.mxu0 %v1865_v62  ;;  %v7371_v47 = vpop.f32.mrf.mxu1  ;;  %v8482_v43 = vld [vmem:[%s12170_s2 + $0x648] sm:$0xff]   ;;  %v8115_v62 = vunpack.i.l.bf16 %v11042_v41 }
 0x2b3   : > { %7664 = vmatpush3.bf16.msra.mxu0 %v8468_v28  ;;  %4318 = vmatprep.mubr.bf16.mxu0 %v1841_v21  ;;  %v7372_v30 = vadd.f32 %v7371_v47, %v7370_v5  ;;  %v8484_v31 = vld [vmem:[%s12170_s2 + $0x608] sm:$0xff]   ;;  %v8486_v28 = vld [vmem:[%s12170_s2 + $0x640] sm:$0xff]   ;;  %v8116_v5 = vunpack.i.h.bf16 %v11042_v41  ;;  %v1758_v21 = vsel %vm1755_vm11, %v8101_v63, %v8095_v48  ;;  %v8125_v47 = vunpack.i.l.bf16 %v8124_v15 }
 0x2b4   : > { %7694 = vmatpush3.bf16.msra.mxu1 %v8469_v9  ;;  %v7373_v56 = vpop.f32.mrf.mxu1  ;;  %7665 = vmatprep.subr.bf16.mxu0 %v8470_v11  ;;  %v8119_v9 = vpop.permute.xlu1 %8118  ;;  %v1756_v11 = vsel %vm1755_vm11, %v8100_v52, %v8090_v8  ;;  %v3696_v8 = vsel %vm919_vm1, %v8487_v39, 0  ;;  %v1702_v48 = vsel %vm1700_vm9, %v8051_v1, %v8105_v4 }
 0x2b5   : > { %v11018_v3 = vadd.f32 %v7372_v30, %v3736_v55  ;;  %7695 = vmatprep.subr.bf16.mxu1 %v8471_v59  ;;  %v8126_v59 = vunpack.i.h.bf16 %v8124_v15  ;;  %v8488_v55 = vld [vmem:[%s12170_s2 + $0x600] sm:$0xff]   ;;  %v1763_v30 = vsel %vm1755_vm11, %v8110_v14, %v8111_v42  ;;  %v8120_v51 = vunpack.i.l.bf16 %v8119_v9 }
 0x2b6   : > { %v7374_v0 = vpop.f32.mrf.mxu1  ;;  %v1842_v52 = vpack.c.bf16 %v1758_v21, %v1756_v11  ;;  %v1761_v63 = vsel %vm1755_vm11, %v8115_v62, %v8116_v5  ;;  %v1840_v1 = vpack.c.bf16 %v1704_v25, %v1702_v48 }
 0x2b7   : > { %7666 = vmatpush3.bf16.msra.mxu0 %v8472_v18  ;;  %v7375_v23 = vadd.f32 %v7374_v0, %v7373_v56  ;;  %v8121_v18 = vunpack.i.h.bf16 %v8119_v9  ;;  %v8489_v56 = vld [vmem:[%s12170_s2 + $0x700] sm:$0xff]   ;;  %v1760_v34 = vsel %vm1755_vm11, %v8120_v51, %v8115_v62  ;;  %v1708_v0 = vsel %vm1700_vm9, %v8076_v19, %v8126_v59 }
 0x2b8   : > { %7696 = vmatpush3.bf16.msra.mxu1 %v8473_v40  ;;  %v7376_v29 = vpop.f32.mrf.mxu1  ;;  %7667 = vmatprep.subr.bf16.mxu0 %v8474_v37  ;;  %v1872_v40 = vpack.c.bf16 %v1763_v30, %v1761_v63  ;;  %v1814_v37 = vsel %vm1755_vm11, %v8125_v47, %v8120_v51 }
 0x2b9   : > { %v11036_v49 = vadd.f32 %v7375_v23, %v3741_v57  ;;  %7697 = vmatprep.subr.bf16.mxu1 %v8475_v17  ;;  %v1815_v46 = vsel %vm1755_vm11, %v8126_v59, %v8121_v18  ;;  %v1762_v24 = vsel %vm1755_vm11, %v8121_v18, %v8110_v14  ;;  %v1706_v17 = vsel %vm1700_vm9, %v8071_v32, %v8125_v47 }
 0x2ba   : > { %v7377_v26 = vpop.f32.mrf.mxu1  ;;  %v1870_v50 = vpack.c.bf16 %v1815_v46, %v1814_v37  ;;  %v1871_v4 = vpack.c.bf16 %v1762_v24, %v1760_v34  ;;  %v1844_v57 = vpack.c.bf16 %v8096_v6, %v8091_v13  ;;  %v1869_v38 = vpack.c.bf16 %v1708_v0, %v1706_v17 }
 0x2bb   : > { %7668 = vmatpush3.bf16.msra.mxu0 %v8476_v16  ;;  %v7378_v61 = vadd.f32 %v7377_v26, %v7376_v29  ;;  %v1873_v23 = vpack.c.bf16 %v8111_v42, %v8116_v5  ;;  %vm4602_vm9 = vcmask 916480  }
 0x2bc   : > { %7698 = vmatpush3.bf16.msra.mxu1 %v8477_v53  ;;  %7669 = vmatprep.subr.bf16.mxu0 %v8478_v33 }
 0x2bd   : > { %v11053_v35 = vadd.f32 %v7378_v61, %v3744_v58  ;;  %7699 = vmatprep.subr.bf16.mxu1 %v8479_v2 }
 0x2bf   : > { %7670 = vmatpush3.bf16.msra.mxu0 %v8480_v10 }
 0x2c0   : > { %7700 = vmatpush3.bf16.msra.mxu1 %v8481_v44  ;;  %7671 = vmatprep.subr.bf16.mxu0 %v8482_v43 }
 0x2c1   : > { %7701 = vmatprep.subr.bf16.mxu1 %v8483_v12 }
 0x2c3   : > { %7672 = vmatpush3.bf16.msra.mxu0 %v8484_v31 }
 0x2c4   : > { %7702 = vmatpush3.bf16.msra.mxu1 %v8485_v7  ;;  %7673 = vmatprep.subr.bf16.mxu0 %v8486_v28 }
 0x2c5   : > { %7775 = vmatprep.subr.msk.bf16.mxu1 %vm919_vm1, %v8487_v39 }
 0x2c7   : > { %4368 = vmatmul.mubr.bf16.vlgmr.msra.gmra.mxu1 %v1842_v52  ;;  %7674 = vmatpush3.bf16.msra.mxu0 %v8488_v55 }
 0x2c8   : > { %4375 = vmatprep.mubr.bf16.mxu1 %v1872_v40  ;;  %7768 = vmatpush3.bf16.msra.mxu1 %v3696_v8 }
 0x2c9   : > { %7769 = vmatprep.subr.bf16.mxu1 %v8489_v56  ;;  %4705 = vmatprep.subr.bf16.mxu0 %v12256_v27 }
 0x2ca   : > { %4319 = vmatmul.mubr.bf16.vlgmr.msra.gmra.mxu0 %v1840_v1 }
 0x2cb   : > { %4326 = vmatprep.mubr.bf16.mxu0 %v1870_v50 }
 0x2cc   : > { %7770 = vmatpush3.bf16.msra.mxu1 %v8489_v56 }
 0x2cf   : > { %4376 = vmatmul.mubr.bf16.gmra.mxu1 %v1871_v4 }
 0x2d0   : > { %7771 = vmatprep.mubr.msk.bf16.mxu1 %vm3688_vm10, %v1844_v57 }
 0x2d2   : > { %4327 = vmatmul.mubr.bf16.gmra.mxu0 %v1869_v38 }
 0x2d7   : > { %7772 = vmatmul.mubr.msk.bf16.vlgmr.msra.gmra.mxu1 %vm3688_vm10, %v1873_v23 }
 0x2e6   : > { %v7423_v16 = vpop.f32.mrf.mxu1 }
 0x2e8   : > { %v7424_v29 = vpop.f32.mrf.mxu1 }
 0x2e9   : > { %v7425_v54 = vadd.f32 %v7424_v29, %v7423_v16 }
 0x2ea   : > { %v7395_v53 = vpop.f32.mrf.mxu0  ;;  %v7426_v32 = vpop.f32.mrf.mxu1 }
 0x2ec   : > { %v7396_v33 = vpop.f32.mrf.mxu0  ;;  %v7427_v45 = vpop.f32.mrf.mxu1 }
 0x2ed   : > { %v7397_v60 = vadd.f32 %v7396_v33, %v7395_v53  ;;  %v7428_v19 = vadd.f32 %v7427_v45, %v7426_v32  ;;  %v8490_v32 = vld [vmem:[%s12172_s4 + $0x38] sm:$0xff]   ;;  %v8491_v33 = vld [vmem:[%s12172_s4 + $0x30] sm:$0xff]  }
 0x2ee   : > { %v7398_v2 = vpop.f32.mrf.mxu0  ;;  %v7429_v20 = vpop.f32.mrf.mxu1  ;;  %4706 = vmatpush1.bf16.msra.mxu0 %v8490_v32 }
 0x2ef   : > { %v3831_v22 = vadd.f32 %v7397_v60, %v11002_v36  ;;  %4707 = vmatprep.subr.bf16.mxu0 %v12256_v27 }
 0x2f0   : > { %v7399_v6 = vpop.f32.mrf.mxu0  ;;  %v7430_v13 = vpop.f32.mrf.mxu1 }
 0x2f1   : > { %v7400_v26 = vadd.f32 %v7399_v6, %v7398_v2  ;;  %v7431_v58 = vadd.f32 %v7430_v13, %v7429_v20  ;;  %v3880_v41 = vadd.f32 %v7425_v54, %v3831_v22  ;;  %v8493_v6 = vld [vmem:[%s12172_s4 + $0x20] sm:$0xff]  }
 0x2f2   : > { %v7401_v61 = vpop.f32.mrf.mxu0  ;;  %v7432_v10 = vpop.f32.mrf.mxu1  ;;  %4708 = vmatpush1.bf16.msra.mxu0 %v8491_v33 }
 0x2f3   : > { %v3834_v44 = vadd.f32 %v7400_v26, %v11018_v3  ;;  %4709 = vmatprep.subr.bf16.mxu0 %v12256_v27 }
 0x2f4   : > { %v7402_v43 = vpop.f32.mrf.mxu0  ;;  %v7433_v12 = vpop.f32.mrf.mxu1 }
 0x2f5   : > { %v7403_v42 = vadd.f32 %v7402_v43, %v7401_v61  ;;  %v7434_v14 = vadd.f32 %v7433_v12, %v7432_v10  ;;  %v11121_v15 = vadd.f32 %v7428_v19, %v3834_v44  ;;  %v8492_v19 = vld [vmem:[%s12172_s4 + $0x28] sm:$0xff]   ;;  %v8495_v44 = vld [vmem:[%s12172_s4 + $0x10] sm:$0xff]  }
 0x2f6   : > { %v7404_v31 = vpop.f32.mrf.mxu0  ;;  %4710 = vmatpush1.bf16.msra.mxu0 %v8492_v19 }
 0x2f7   : > { %v3839_v7 = vadd.f32 %v7403_v42, %v11036_v49  ;;  %4711 = vmatprep.subr.bf16.mxu0 %v12256_v27 }
 0x2f8   : > { %v7405_v28 = vpop.f32.mrf.mxu0 }
 0x2f9   : > { %v7406_v36 = vadd.f32 %v7405_v28, %v7404_v31  ;;  %v11124_v39 = vadd.f32 %v7431_v58, %v3839_v7 }
 0x2fa   : > { %4712 = vmatpush1.bf16.msra.mxu0 %v8493_v6 }
 0x2fb   : > { %v3842_v5 = vadd.f32 %v7406_v36, %v11053_v35  ;;  %4713 = vmatprep.subr.bf16.mxu0 %v12256_v27 }
 0x2fd   : > { %v3891_v62 = vadd.f32 %v7434_v14, %v3842_v5 }
 0x306   : > { %v7479_v9 = vpop.f32.mrf.mxu1 }
 0x308   : > { %v7480_v11 = vpop.f32.mrf.mxu1 }
 0x309   : > { %v7481_v49 = vadd.f32 %v7480_v11, %v7479_v9 }
 0x30a   : > { %v7451_v21 = vpop.f32.mrf.mxu0  ;;  %v11127_v3 = vpop.f32.mrf.mxu1 }
 0x30c   : > { %v7452_v59 = vpop.f32.mrf.mxu0  ;;  %v11129_v47 = vpop.f32.mrf.mxu1 }
 0x30d   : > { %v7453_v55 = vadd.f32 %v7452_v59, %v7451_v21 }
 0x30e   : > { %v11131_v30 = vpop.f32.mrf.mxu0  ;;  %v11133_v18 = vpop.f32.mrf.mxu1 }
 0x30f   : > { %v3929_v51 = vadd.f32 %v7453_v55, %v3880_v41  ;;  %v8494_v41 = vld [vmem:[%s12172_s4 + $0x18] sm:$0xff]  }
 0x310   : > { %v11135_v8 = vpop.f32.mrf.mxu0  ;;  %v11137_v52 = vpop.f32.mrf.mxu1  ;;  %4714 = vmatpush1.bf16.msra.mxu0 %v8494_v41 }
 0x311   : > { %v11139_v35 = vadd.f32 %v7481_v49, %v3929_v51  ;;  %4715 = vmatprep.subr.bf16.mxu0 %v12256_v27  ;;  %v7487_v41 = vadd.f32 %v11137_v52, %v11133_v18 }
 0x312   : > { %v11141_v48 = vpop.f32.mrf.mxu0  ;;  %v7488_v25 = vpop.f32.mrf.mxu1 }
 0x314   : > { %v11143_v63 = vpop.f32.mrf.mxu0  ;;  %v7489_v56 = vpop.f32.mrf.mxu1  ;;  %4716 = vmatpush1.bf16.msra.mxu0 %v8495_v44 }
 0x315   : > { %v7490_v40 = vadd.f32 %v7489_v56, %v7488_v25  ;;  %4717 = vmatprep.subr.bf16.mxu0 %v12256_v27 }
 0x316   : > { %v7460_v37 = vpop.f32.mrf.mxu0 }
 0x318   : > { %v7461_v46 = vpop.f32.mrf.mxu0 }
 0x319   : > { %v7462_v1 = vadd.f32 %v7461_v46, %v7460_v37  ;;  %v7459_v37 = vadd.f32 %v11143_v63, %v11141_v48  ;;  %v7456_v46 = vadd.f32 %v11135_v8, %v11131_v30  ;;  %v7484_v48 = vadd.f32 %v11129_v47, %v11127_v3 }
 0x31b   : > { %v3940_v50 = vadd.f32 %v7462_v1, %v3891_v62  ;;  %v3937_v33 = vadd.f32 %v7459_v37, %v11124_v39  ;;  %v3932_v19 = vadd.f32 %v7456_v46, %v11121_v15 }
 0x31d   : > { %v11145_v34 = vadd.f32 %v7490_v40, %v3940_v50  ;;  %v3986_v63 = vadd.f32 %v7487_v41, %v3937_v33  ;;  %v3981_v15 = vadd.f32 %v7484_v48, %v3932_v19 }
 0x327   : > { %v11147_v24 = vpop.f32.mrf.mxu1 }
 0x329   : > { %v11149_v17 = vpop.f32.mrf.mxu1 }
 0x32a   : > { %v7507_v4 = vpop.f32.mrf.mxu0  ;;  %v7537_v39 = vadd.f32 %v11149_v17, %v11147_v24 }
 0x32b   : > { %v11151_v57 = vpop.f32.mrf.mxu1 }
 0x32c   : > { %v7508_v0 = vpop.f32.mrf.mxu0 }
 0x32d   : > { %v11155_v23 = vpop.f32.mrf.mxu1  ;;  %v7509_v32 = vadd.f32 %v7508_v0, %v7507_v4 }
 0x32e   : > { %v11153_v38 = vpop.f32.mrf.mxu0 }
 0x32f   : > { %v11159_v29 = vpop.f32.mrf.mxu1  ;;  %v4027_v30 = vadd.f32 %v7509_v32, %v11139_v35 }
 0x330   : > { %v11157_v16 = vpop.f32.mrf.mxu0 }
 0x331   : > { %v11161_v53 = vpop.f32.mrf.mxu1  ;;  %v7512_v8 = vadd.f32 %v11157_v16, %v11153_v38  ;;  %v7540_v38 = vadd.f32 %v11155_v23, %v11151_v57 }
 0x332   : > { %v7513_v54 = vpop.f32.mrf.mxu0  ;;  %v7543_v3 = vadd.f32 %v11161_v53, %v11159_v29 }
 0x333   : > { %v11170_v60 = vpop.f32.mrf.mxu1 }
 0x334   : > { %v7514_v45 = vpop.f32.mrf.mxu0 }
 0x335   : > { %v11176_v20 = vpop.f32.mrf.mxu1  ;;  %v7515_v44 = vadd.f32 %v7514_v45, %v7513_v54  ;;  %v4030_v54 = vadd.f32 %v7512_v8, %v3981_v15  ;;  %v4076_v45 = vadd.f32 %v7537_v39, %v4027_v30 }
 0x336   : > { %v7516_v2 = vpop.f32.mrf.mxu0  ;;  %v7546_v29 = vadd.f32 %v11176_v20, %v11170_v60 }
 0x337   : > { %v4035_v37 = vadd.f32 %v7515_v44, %v3986_v63 }
 0x338   : > { %v7517_v13 = vpop.f32.mrf.mxu0 }
 0x339   : > { %v7518_v18 = vadd.f32 %v7517_v13, %v7516_v2  ;;  %v4084_v17 = vadd.f32 %v7543_v3, %v4035_v37  ;;  %v4079_v13 = vadd.f32 %v7540_v38, %v4030_v54 }
 0x33b   : > { %v4038_v24 = vadd.f32 %v7518_v18, %v11145_v34 }
 0x33d   : > { %v4087_v19 = vadd.f32 %v7546_v29, %v4038_v24 }
 0x347   : > { %v11178_v22 = vpop.f32.mrf.mxu1 }
 0x349   : > { %v11184_v58 = vpop.f32.mrf.mxu1 }
 0x34a   : > { %v7563_v26 = vpop.f32.mrf.mxu0  ;;  %v7593_v2 = vadd.f32 %v11184_v58, %v11178_v22 }
 0x34b   : > { %v11190_v10 = vpop.f32.mrf.mxu1 }
 0x34c   : > { %v7564_v61 = vpop.f32.mrf.mxu0 }
 0x34d   : > { %v11196_v12 = vpop.f32.mrf.mxu1  ;;  %v7565_v4 = vadd.f32 %v7564_v61, %v7563_v26 }
 0x34e   : > { %v7566_v43 = vpop.f32.mrf.mxu0  ;;  %v7596_v44 = vadd.f32 %v11196_v12, %v11190_v10 }
 0x34f   : > { %v7597_v14 = vpop.f32.mrf.mxu1  ;;  %v4125_v16 = vadd.f32 %v7565_v4, %v4076_v45 }
 0x350   : > { %v7567_v42 = vpop.f32.mrf.mxu0 }
 0x351   : > { %v7598_v7 = vpop.f32.mrf.mxu1  ;;  %v7568_v46 = vadd.f32 %v7567_v42, %v7566_v43  ;;  %v4174_v23 = vadd.f32 %v7593_v2, %v4125_v16 }
 0x352   : > { %v7569_v31 = vpop.f32.mrf.mxu0  ;;  %v7599_v42 = vadd.f32 %v7598_v7, %v7597_v14 }
 0x353   : > { %v11199_v36 = vpop.f32.mrf.mxu1  ;;  %v4128_v57 = vadd.f32 %v7568_v46, %v4079_v13 }
 0x354   : > { %v7570_v28 = vpop.f32.mrf.mxu0 }
 0x355   : > { %v11201_v62 = vpop.f32.mrf.mxu1  ;;  %v7571_v47 = vadd.f32 %v7570_v28, %v7569_v31  ;;  %v4177_v20 = vadd.f32 %v7596_v44, %v4128_v57 }
 0x356   : > { %v7572_v5 = vpop.f32.mrf.mxu0  ;;  %v7602_v14 = vadd.f32 %v11201_v62, %v11199_v36 }
 0x357   : > { %v4133_v53 = vadd.f32 %v7571_v47, %v4084_v17 }
 0x358   : > { %v7573_v11 = vpop.f32.mrf.mxu0 }
 0x359   : > { %v7574_v31 = vadd.f32 %v7573_v11, %v7572_v5  ;;  %v4182_v48 = vadd.f32 %v7599_v42, %v4133_v53 }
 0x367   : > { %v11203_v9 = vpop.f32.mrf.mxu1 }
 0x369   : > { %v11205_v59 = vpop.f32.mrf.mxu1 }
 0x36a   : > { %v7619_v21 = vpop.f32.mrf.mxu0  ;;  %v7649_v60 = vadd.f32 %v11205_v59, %v11203_v9 }
 0x36b   : > { %v11207_v49 = vpop.f32.mrf.mxu1 }
 0x36c   : > { %v7620_v55 = vpop.f32.mrf.mxu0 }
 0x36d   : > { %v11209_v25 = vpop.f32.mrf.mxu1  ;;  %v7621_v61 = vadd.f32 %v7620_v55, %v7619_v21  ;;  %v4136_v55 = vadd.f32 %v7574_v31, %v4087_v19 }
 0x36e   : > { %v7622_v51 = vpop.f32.mrf.mxu0  ;;  %v7652_v9 = vadd.f32 %v11209_v25, %v11207_v49 }
 0x36f   : > { %v11211_v40 = vpop.f32.mrf.mxu1  ;;  %v4223_v22 = vadd.f32 %v7621_v61, %v4174_v23 }
 0x370   : > { %v7623_v56 = vpop.f32.mrf.mxu0 }
 0x371   : > { %v11217_v50 = vpop.f32.mrf.mxu1  ;;  %v7624_v58 = vadd.f32 %v7623_v56, %v7622_v51  ;;  %v4272_v10 = vadd.f32 %v7649_v60, %v4223_v22  ;;  %v4185_v56 = vadd.f32 %v7602_v14, %v4136_v55 }
 0x372   : > { %v7625_v1 = vpop.f32.mrf.mxu0  ;;  %v7655_v51 = vadd.f32 %v11217_v50, %v11211_v40 }
 0x373   : > { %v11223_v27 = vpop.f32.mrf.mxu1  ;;  %v4226_v8 = vadd.f32 %v7624_v58, %v4177_v20 }
 0x374   : > { %v7626_v6 = vpop.f32.mrf.mxu0 }
 0x375   : > { %v7657_v52 = vpop.f32.mrf.mxu1  ;;  %v7627_v34 = vadd.f32 %v7626_v6, %v7625_v1  ;;  %v4275_v18 = vadd.f32 %v7652_v9, %v4226_v8  ;;  %v8499_v9 = vld [vmem:[%s12172_s4 + $0x40] sm:$0xff]  }
 0x376   : > { %v7628_v0 = vpop.f32.mrf.mxu0  ;;  %v7658_v45 = vadd.f32 %v7657_v52, %v11223_v27 }
 0x377   : > { %v4231_v7 = vadd.f32 %v7627_v34, %v4182_v48 }
 0x378   : > { %v7629_v32 = vpop.f32.mrf.mxu0 }
 0x379   : > { %v7630_v1 = vadd.f32 %v7629_v32, %v7628_v0  ;;  %v4280_v37 = vadd.f32 %v7655_v51, %v4231_v7 }
 0x37b   : > { %v4234_v4 = vadd.f32 %v7630_v1, %v4185_v56 }
 0x37d   : > { %v4283_v49 = vadd.f32 %v7658_v45, %v4234_v4 }
 0x387   : > { %v7703_v35 = vpop.f32.mrf.mxu1 }
 0x389   : > { %v7704_v26 = vpop.f32.mrf.mxu1 }
 0x38a   : > { %v7675_v33 = vpop.f32.mrf.mxu0  ;;  %v7705_v0 = vadd.f32 %v7704_v26, %v7703_v35  ;;  %v8496_v35 = vld [vmem:[%s12172_s4 + $0x8] sm:$0xff]  }
 0x38b   : > { %v7706_v28 = vpop.f32.mrf.mxu1  ;;  %4718 = vmatpush1.bf16.msra.mxu0 %v8496_v35 }
 0x38c   : > { %v7676_v43 = vpop.f32.mrf.mxu0 }
 0x38d   : > { %v7707_v41 = vpop.f32.mrf.mxu1  ;;  %v7677_v5 = vadd.f32 %v7676_v43, %v7675_v33  ;;  %v8497_v33 = vld [vmem:[%s12172_s4] sm:$0xff]  }
 0x38e   : > { %v7678_v21 = vpop.f32.mrf.mxu0  ;;  %v7708_v24 = vadd.f32 %v7707_v41, %v7706_v28  ;;  %v12257_v28 = vmov 0  }
 0x38f   : > { %v7709_v30 = vpop.f32.mrf.mxu1  ;;  %v4321_v59 = vadd.f32 %v7677_v5, %v4272_v10  ;;  %4719 = vmatprep.subr.bf16.mxu0 %v12257_v28 }
 0x390   : > { %v7679_v11 = vpop.f32.mrf.mxu0  ;;  %4720 = vmatpush1.bf16.msra.mxu0 %v8497_v33 }
 0x391   : > { %v7710_v6 = vpop.f32.mrf.mxu1  ;;  %v7680_v39 = vadd.f32 %v7679_v11, %v7678_v21  ;;  %v4370_v16 = vadd.f32 %v7705_v0, %v4321_v59  ;;  %v8498_v21 = vld [vmem:[%s12172_s4 + $0x48] sm:$0xff]   ;;  %4733 = vmatprep.subr.bf16.mxu0 %v12257_v28 }
 0x392   : > { %v7681_v12 = vpop.f32.mrf.mxu0  ;;  %v7711_v3 = vadd.f32 %v7710_v6, %v7709_v30 }
 0x393   : > { %v7712_v63 = vpop.f32.mrf.mxu1  ;;  %v4324_v50 = vadd.f32 %v7680_v39, %v4275_v18 }
 0x394   : > { %v7682_v15 = vpop.f32.mrf.mxu0  ;;  %4734 = vmatpush2.bf16.msra.mxu0 %v8498_v21 }
 0x395   : > { %v7683_v36 = vadd.f32 %v7682_v15, %v7681_v12  ;;  %v7713_v62 = vpop.f32.mrf.mxu1  ;;  %v4373_v61 = vadd.f32 %v7708_v24, %v4324_v50  ;;  %4735 = vmatprep.subr.bf16.mxu0 %v12257_v28 }
 0x396   : > { %v7684_v54 = vpop.f32.mrf.mxu0  ;;  %v7714_v26 = vadd.f32 %v7713_v62, %v7712_v63 }
 0x397   : > { %v4329_v47 = vadd.f32 %v7683_v36, %v4280_v37  ;;  %v7773_v40 = vpop.f32.mrf.mxu1 }
 0x398   : > { %v7685_v38 = vpop.f32.mrf.mxu0  ;;  %4736 = vmatpush2.bf16.msra.mxu0 %v8499_v9 }
 0x399   : > { %v4378_v46 = vadd.f32 %v7711_v3, %v4329_v47  ;;  %v7686_v25 = vadd.f32 %v7685_v38, %v7684_v54  ;;  %v4418_v32 = vpop.f32.mrf.mxu1 }
 0x39a   : > { %v4419_v17 = vadd.f32 %v4418_v32, %v4370_v16 }
 0x39b   : > { %v4427_v2 = vadd.f32 %v7773_v40, %v4378_v46  ;;  %v4332_v13 = vadd.f32 %v7686_v25, %v4283_v49  ;;  %v7774_v27 = vpop.f32.mrf.mxu1 }
 0x39c   : > { %v11255_v52 = vmul.f32 0.0, %v4419_v17 }
 0x39d   : > { %v11260_v29 = vmul.f32 0.0, %v4427_v2  ;;  %v4381_v53 = vadd.f32 %v7714_v26, %v4332_v13  ;;  %v4421_v31 = vpop.f32.mrf.mxu1 }
 0x39e   : > { %v11263_v57 = vadd.f32 %v4421_v31, %v4373_v61  ;;  %v4485_v23 = vrot.slane %v11255_v52, 2  ;;  %v4471_v42 = vrot.slane %v11255_v52, 1  ;;  %v4513_v34 = vrot.slane %v11255_v52, 4 }
 0x39f   : > { %v4488_v43 = vrot.slane %v11260_v29, 2  ;;  %v11269_v19 = vrot.slane %v11260_v29, 1  ;;  %v4516_v58 = vrot.slane %v11260_v29, 4  ;;  %v4430_v55 = vadd.f32 %v7774_v27, %v4381_v53 }
 0x3a0   : > { %v4486_v41 = vrot.slane %v11263_v57, 2  ;;  %v4472_v44 = vrot.slane %v11263_v57, 1  ;;  %v4514_v22 = vrot.slane %v11263_v57, 4  ;;  %v4499_v48 = vrot.slane %v11255_v52, 3 }
 0x3a1   : > { %v4500_v30 = vrot.slane %v11263_v57, 3  ;;  %v4502_v60 = vrot.slane %v11260_v29, 3  ;;  %v4542_v51 = vrot.slane %v11263_v57, 6  ;;  %v4541_v56 = vrot.slane %v11255_v52, 6 }
 0x3a2   : > { %v4487_v20 = vsel %vm1247_vm2, %v4485_v23, %v4486_v41  ;;  %v4489_v5 = vsel %vm1247_vm2, %v4486_v41, %v4488_v43  ;;  %v4473_v11 = vsel %vm1177_vm12, %v4471_v42, %v4472_v44  ;;  %v4475_v14 = vsel %vm1177_vm12, %v4472_v44, %v11269_v19 }
 0x3a3   : > { %v8132_v7 = vpack.i.bf16 %v4489_v5, %v4487_v20  ;;  %v8127_v1 = vpack.i.bf16 %v4475_v14, %v4473_v11  ;;  %v4515_v6 = vsel %vm918_vm0, %v4513_v34, %v4514_v22  ;;  %v4517_v8 = vsel %vm918_vm0, %v4514_v22, %v4516_v58 }
 0x3a4   : > { %v4501_v10 = vsel %vm919_vm1, %v4499_v48, %v4500_v30  ;;  %v4503_v12 = vsel %vm919_vm1, %v4500_v30, %v4502_v60  ;;  %v4544_v63 = vrot.slane %v11260_v29, 6  ;;  %v11302_v59 = vmul.f32 0.0, %v4430_v55 }
 0x3a5   : > { %8133 = vrot.lane.b32.xlu0 %v8132_v7, %s8920_s11  ;;  %8128 = vrot.lane.b32.xlu1 %v8127_v1, %s8921_s19  ;;  %v4527_v39 = vrot.slane %v11255_v52, 5  ;;  %v4528_v15 = vrot.slane %v11263_v57, 5  ;;  %v4530_v4 = vrot.slane %v11260_v29, 5  ;;  %v8142_v37 = vpack.i.bf16 %v4517_v8, %v4515_v6 }
 0x3a6   : > { %v8137_v36 = vpack.i.bf16 %v4503_v12, %v4501_v10  ;;  %v4543_v62 = vsel %vm1525_vm15, %v4541_v56, %v4542_v51  ;;  %v4545_v0 = vsel %vm1525_vm15, %v4542_v51, %v4544_v63  ;;  %v4556_v45 = vrot.slane %v11263_v57, 7 }
 0x3a7   : > { %v4529_v18 = vsel %vm1458_vm13, %v4527_v39, %v4528_v15  ;;  %v4531_v54 = vsel %vm1458_vm13, %v4528_v15, %v4530_v4  ;;  %v4558_v3 = vrot.slane %v11260_v29, 7  ;;  %v4555_v47 = vrot.slane %v11255_v52, 7 }
 0x3a8   : > { %v8152_v40 = vpack.i.bf16 %v4545_v0, %v4543_v62  ;;  %v8147_v50 = vpack.i.bf16 %v4531_v54, %v4529_v18  ;;  %v4570_v38 = vrot.slane %v11302_v59, 1 }
 0x3a9   : > { %8143 = vrot.lane.b32.xlu0 %v8142_v37, %s12197_s27  ;;  %8138 = vrot.lane.b32.xlu1 %v8137_v36, %s8923_s24  ;;  %v4557_v16 = vsel %vm1599_vm14, %v4555_v47, %v4556_v45  ;;  %v4559_v46 = vsel %vm1599_vm14, %v4556_v45, %v4558_v3 }
 0x3aa   : > { %v8157_v49 = vpack.i.bf16 %v4559_v46, %v4557_v16  ;;  %v4571_v25 = vsel %vm1177_vm12, %v11269_v19, %v4570_v38  ;;  %v8502_v16 = vld [vmem:[%s12174_s6 + $0x74] ss:$8 sps:$4 sm:$0xff]   ;;  %v8503_v46 = vld [vmem:[%s12174_s6 + $0x170] ss:$8 sps:$4 sm:$0xff]  }
 0x3ab   : > { %5322 = vmatprep.subr.bf16.mxu1 %v8502_v16 }
 0x3ad   : > { %8153 = vrot.lane.b32.xlu0 %v8152_v40, %s8924_s22  ;;  %8148 = vrot.lane.b32.xlu1 %v8147_v50, %s8925_s28 }
 0x3b1   : > { %8158 = vrot.lane.b32.xlu0 %v8157_v49, %s8926_s29  ;;  %4572 = vrot.lane.b32.xlu1 %v4571_v25, %s8921_s19  ;;  %v8508_v49 = vld [vmem:[%s12174_s6 + $0x64] ss:$8 sps:$4 sm:$0xff]  }
 0x3b2   : > { %v8511_v25 = vld [vmem:[%s12174_s6 + $0x164] ss:$8 sps:$4 sm:$0xff]  }
 0x3b5   : > { %4494 = vrot.lane.b32.xlu0 %v4488_v43, %s8920_s11  ;;  %4480 = vrot.lane.b32.xlu1 %v11269_v19, %s8921_s19  ;;  %s374_s11 = sand.u32 1, %s8888_s14  }
 0x3b6   : > { %s7776_s21 = smul.u32 72, %s374_s11 }
 0x3b9   : > { %4522 = vrot.lane.b32.xlu0 %v4516_v58, %s12197_s27  ;;  %4508 = vrot.lane.b32.xlu1 %v4502_v60, %s8923_s24  ;;  %s12103_s24 = scalar_lea.vmem [#allocation2], %s7776_s21  ;;  %s8927_s21 = smov [#allocation2]  }
 0x3ba   : > { %s8832_s27 = sshll.u32 %s8927_s21, 4  ;;  %s8833_s27 = int_to_ptr.vmem [resolvable:$false] %s8832_s27 }
 0x3bd   : > { %4550 = vrot.lane.b32.xlu0 %v4544_v63, %s8924_s22  ;;  %4536 = vrot.lane.b32.xlu1 %v4530_v4, %s8925_s28  ;;  %s7778_s22 = smul.u32 1152, %s8896_s16  ;;  %s6607_s16 = scalar_lea.sflag [#allocation3], %s374_s11 }
 0x3be   : > { %s8834_s28 = scalar_lea.vmem %s8833_s27, 2304 }
 0x3c1   : > { %4564 = vrot.lane.b32.xlu0 %v4558_v3, %s8926_s29  ;;  %4574 = vrot.lane.b32.xlu1 %v4570_v38, %s8921_s19  ;;  %v8500_v38 = vld [vmem:[%s12174_s6 + $0x70] ss:$8 sps:$4 sm:$0xff]   ;;  %s6623_s29 = sshll.u32 %s12103_s24, 4  ;;  %s12125_s19 = scalar_lea.hbm %s12178_s10, %s7778_s22  ;;  %s6624_s29 = int_to_ptr.vmem [resolvable:$true] %s6623_s29 }
 0x3c2   : > { %5323 = vmatpush1.bf16.msra.mxu1 %v8500_v38  ;;  %s8828_s30 = scalar_lea.vmem %s6624_s29, 1152  ;;  %p8835_p1 = scmp.lt.s32.totalorder %s6624_s29, %s8833_s27 }
 0x3c3   : > { %5324 = vmatprep.subr.bf16.mxu1 %v8508_v49  ;;  %p8829_p12 = scmp.ne.s32.totalorder %s6624_s29, %s8828_s30  ;;  %p8836_p2 = scmp.lt.s32.totalorder %s8834_s28, %s8828_s30 }
 0x3c5   : > { %p8830_p13 = pnand %p8829_p12, %p9023_p4  ;;  %p8837_p3 = por %p8836_p2, %p8835_p1 }
 0x3c7   : > { %p8831_p0 = pneg %p8830_p13 }
 0x3c9   : > { %p8838_p5 = pnand %p8837_p3, %p8831_p0 }
 0x417   : > { %v8134_v32 = vpop.permute.xlu0 %8133  ;;  %v8129_v24 = vpop.permute.xlu1 %8128 }
 0x418   : > { %v8131_v17 = vunpack.i.h.bf16 %v8129_v24  ;;  %v8130_v35 = vunpack.i.l.bf16 %v8129_v24  ;;  %v8136_v26 = vunpack.i.h.bf16 %v8134_v32  ;;  %v8135_v2 = vunpack.i.l.bf16 %v8134_v32  ;;  %v8506_v32 = vld [vmem:[%s12174_s6 + $0x60] ss:$8 sps:$4 sm:$0xff]  }
 0x419   : > { %v8509_v24 = vld [vmem:[%s12174_s6 + $0x160] ss:$8 sps:$4 sm:$0xff]   ;;  %5325 = vmatpush1.bf16.msra.mxu1 %v8506_v32 }
 0x41a   : > { %v4579_v13 = vsel %vm4578_vm5, %v11255_v52, %v8130_v35  ;;  %v4580_v27 = vsel %vm4578_vm5, %v11263_v57, %v8131_v17  ;;  %v8514_v17 = vld [vmem:[%s12174_s6 + $0x54] ss:$8 sps:$4 sm:$0xff]  }
 0x41b   : > { %v8144_v61 = vpop.permute.xlu0 %8143  ;;  %v8139_v33 = vpop.permute.xlu1 %8138  ;;  %v4583_v42 = vsel %vm4582_vm4, %v4579_v13, %v8135_v2  ;;  %v4584_v19 = vsel %vm4582_vm4, %v4580_v27, %v8136_v26  ;;  %v8517_v35 = vld [vmem:[%s12174_s6 + $0x154] ss:$8 sps:$4 sm:$0xff]   ;;  %v8512_v26 = vld [vmem:[%s12174_s6 + $0x50] ss:$8 sps:$4 sm:$0xff]   ;;  %5326 = vmatprep.subr.bf16.mxu1 %v8514_v17  ;;  %v8520_v13 = vld [vmem:[%s12174_s6 + $0x44] ss:$8 sps:$4 sm:$0xff]  }
 0x41c   : > { %v8141_v53 = vunpack.i.h.bf16 %v8139_v33  ;;  %v8140_v31 = vunpack.i.l.bf16 %v8139_v33  ;;  %v8146_v23 = vunpack.i.h.bf16 %v8144_v61  ;;  %v8145_v43 = vunpack.i.l.bf16 %v8144_v61  ;;  %v8515_v2 = vld [vmem:[%s12174_s6 + $0x150] ss:$8 sps:$4 sm:$0xff]   ;;  %v8518_v61 = vld [vmem:[%s12174_s6 + $0x40] ss:$8 sps:$4 sm:$0xff]  }
 0x41d   : > { %5327 = vmatpush1.bf16.msra.mxu1 %v8512_v26  ;;  %v8521_v33 = vld [vmem:[%s12174_s6 + $0x140] ss:$8 sps:$4 sm:$0xff]  }
 0x41e   : > { %v4587_v34 = vsel %vm4586_vm3, %v4583_v42, %v8140_v31  ;;  %v4588_v41 = vsel %vm4586_vm3, %v4584_v19, %v8141_v53  ;;  %5328 = vmatprep.subr.bf16.mxu1 %v8520_v13  ;;  %v8526_v53 = vld [vmem:[%s12174_s6 + $0x34] ss:$8 sps:$4 sm:$0xff]   ;;  %v8532_v42 = vld [vmem:[%s12174_s6 + $0x24] ss:$8 sps:$4 sm:$0xff]  }
 0x41f   : > { %v8154_v52 = vpop.permute.xlu0 %8153  ;;  %v8149_v44 = vpop.permute.xlu1 %8148  ;;  %v4591_v55 = vsel %vm4590_vm6, %v4587_v34, %v8145_v43  ;;  %v4592_v48 = vsel %vm4590_vm6, %v4588_v41, %v8146_v23  ;;  %v8529_v31 = vld [vmem:[%s12174_s6 + $0x134] ss:$8 sps:$4 sm:$0xff]   ;;  %v8524_v23 = vld [vmem:[%s12174_s6 + $0x30] ss:$8 sps:$4 sm:$0xff]   ;;  %v8535_v19 = vld [vmem:[%s12174_s6 + $0x124] ss:$8 sps:$4 sm:$0xff]  }
 0x420   : > { %v8151_v57 = vunpack.i.h.bf16 %v8149_v44  ;;  %v8150_v22 = vunpack.i.l.bf16 %v8149_v44  ;;  %v8156_v58 = vunpack.i.h.bf16 %v8154_v52  ;;  %v8155_v21 = vunpack.i.l.bf16 %v8154_v52  ;;  %v8527_v43 = vld [vmem:[%s12174_s6 + $0x130] ss:$8 sps:$4 sm:$0xff]   ;;  %v8530_v34 = vld [vmem:[%s12174_s6 + $0x20] ss:$8 sps:$4 sm:$0xff]   ;;  %v8538_v52 = vld [vmem:[%s12174_s6 + $0x14] ss:$8 sps:$4 sm:$0xff]  }
 0x421   : > { %5329 = vmatpush1.bf16.msra.mxu1 %v8518_v61  ;;  %v8533_v41 = vld [vmem:[%s12174_s6 + $0x120] ss:$8 sps:$4 sm:$0xff]   ;;  %v8541_v44 = vld [vmem:[%s12174_s6 + $0x114] ss:$8 sps:$4 sm:$0xff]   ;;  %v8592_v13 = vld [vmem:[%s12174_s6 + $0x84] ss:$8 sps:$4 sm:$0xff]  }
 0x422   : > { %v4595_v30 = vsel %vm4594_vm7, %v4591_v55, %v8150_v22  ;;  %v4596_v60 = vsel %vm4594_vm7, %v4592_v48, %v8151_v57  ;;  %5330 = vmatprep.subr.bf16.mxu1 %v8526_v53  ;;  %v8536_v57 = vld [vmem:[%s12174_s6 + $0x10] ss:$8 sps:$4 sm:$0xff]   ;;  %v8542_v55 = vld [vmem:[%s12174_s6] ss:$8 sps:$4 sm:$0xff]  }
 0x423   : > { %v8159_v20 = vpop.permute.xlu0 %8158  ;;  %v4573_v5 = vpop.permute.xlu1 %4572  ;;  %v4599_v6 = vsel %vm4598_vm8, %v4595_v30, %v8155_v21  ;;  %v4600_v8 = vsel %vm4598_vm8, %v4596_v60, %v8156_v58  ;;  %v8539_v22 = vld [vmem:[%s12174_s6 + $0x110] ss:$8 sps:$4 sm:$0xff]   ;;  %v8544_v58 = vld [vmem:[%s12174_s6 + $0x4] ss:$8 sps:$4 sm:$0xff]   ;;  %v8545_v48 = vld [vmem:[%s12174_s6 + $0x100] ss:$8 sps:$4 sm:$0xff]  }
 0x424   : > { %v8161_v11 = vunpack.i.h.bf16 %v8159_v20  ;;  %v8160_v14 = vunpack.i.l.bf16 %v8159_v20  ;;  %v4606_v7 = vsel %vm4578_vm5, %v11260_v29, %v4573_v5  ;;  %v8547_v21 = vld [vmem:[%s12174_s6 + $0x104] ss:$8 sps:$4 sm:$0xff]   ;;  %v8550_v30 = vld [vmem:[%s12174_s6 + $0xf4] ss:$8 sps:$4 sm:$0xff]   ;;  %v8548_v20 = vld [vmem:[%s12174_s6 + $0xf0] ss:$8 sps:$4 sm:$0xff]  }
 0x425   : > { %v4609_v1 = vpack.c.bf16 %v4606_v7, %v4580_v27  ;;  %v8523_v27 = vld [vmem:[%s12174_s6 + $0x144] ss:$8 sps:$4 sm:$0xff]   ;;  %5331 = vmatpush1.bf16.msra.mxu1 %v8524_v23  ;;  %v8553_v60 = vld [vmem:[%s12174_s6 + $0x1f4] ss:$8 sps:$4 sm:$0xff]   ;;  %v8551_v5 = vld [vmem:[%s12174_s6 + $0x1f0] ss:$8 sps:$4 sm:$0xff]  }
 0x426   : > { %v4603_v10 = vsel %vm4602_vm9, %v4599_v6, %v8160_v14  ;;  %v4604_v12 = vsel %vm4602_vm9, %v4600_v8, %v8161_v11  ;;  %5332 = vmatprep.subr.bf16.mxu1 %v8532_v42  ;;  %v8556_v11 = vld [vmem:[%s12174_s6 + $0xe4] ss:$8 sps:$4 sm:$0xff]   ;;  %v8554_v7 = vld [vmem:[%s12174_s6 + $0xe0] ss:$8 sps:$4 sm:$0xff]   ;;  %v8562_v6 = vld [vmem:[%s12174_s6 + $0xd4] ss:$8 sps:$4 sm:$0xff]  }
 0x427   : > { %v4495_v51 = vpop.permute.xlu0 %4494  ;;  %v4481_v56 = vpop.permute.xlu1 %4480  ;;  %7047 = vmatprep.mubr.msk.bf16.mxu0 %vm4582_vm4, %v4609_v1  ;;  %v4608_v63 = vpack.c.bf16 %v4604_v12, %v4603_v10  ;;  %v8559_v14 = vld [vmem:[%s12174_s6 + $0x1e4] ss:$8 sps:$4 sm:$0xff]   ;;  %v8557_v1 = vld [vmem:[%s12174_s6 + $0x1e0] ss:$8 sps:$4 sm:$0xff]   ;;  %v8565_v8 = vld [vmem:[%s12174_s6 + $0x1d4] ss:$8 sps:$4 sm:$0xff]  }
 0x428   : > { %v4581_v9 = vsel %vm4578_vm5, %v11260_v29, %v4481_v56  ;;  %v8560_v10 = vld [vmem:[%s12174_s6 + $0xd0] ss:$8 sps:$4 sm:$0xff]   ;;  %v8571_v56 = vld [vmem:[%s12174_s6 + $0x1c4] ss:$8 sps:$4 sm:$0xff]   ;;  %v8598_v23 = vld [vmem:[%s12174_s6 + $0x274] ss:$8 sps:$4 sm:$0xff]  }
 0x429   : > { %4738 = vmatmul.mubr.bf16.vlgmr.msra.gmra.mxu0 %v4608_v63  ;;  %v4585_v15 = vsel %vm4582_vm4, %v4581_v9, %v4495_v51  ;;  %5333 = vmatpush1.bf16.msra.mxu1 %v8530_v34  ;;  %v8563_v12 = vld [vmem:[%s12174_s6 + $0x1d0] ss:$8 sps:$4 sm:$0xff]   ;;  %v8568_v51 = vld [vmem:[%s12174_s6 + $0xc4] ss:$8 sps:$4 sm:$0xff]   ;;  %v8566_v63 = vld [vmem:[%s12174_s6 + $0xc0] ss:$8 sps:$4 sm:$0xff]  }
 0x42a   : > { %5334 = vmatprep.subr.bf16.mxu1 %v8538_v52  ;;  %v8569_v9 = vld [vmem:[%s12174_s6 + $0x1c0] ss:$8 sps:$4 sm:$0xff]  }
 0x42b   : > { %v4523_v39 = vpop.permute.xlu0 %4522  ;;  %v4509_v4 = vpop.permute.xlu1 %4508 }
 0x42c   : > { %v4589_v37 = vsel %vm4586_vm3, %v4585_v15, %v4509_v4  ;;  %v8577_v15 = vld [vmem:[%s12174_s6 + $0x1b4] ss:$8 sps:$4 sm:$0xff]   ;;  %v8572_v4 = vld [vmem:[%s12174_s6 + $0xb0] ss:$8 sps:$4 sm:$0xff]  }
 0x42d   : > { %v4593_v62 = vsel %vm4590_vm6, %v4589_v37, %v4523_v39  ;;  %5335 = vmatpush1.bf16.msra.mxu1 %v8536_v57  ;;  %v8574_v39 = vld [vmem:[%s12174_s6 + $0xb4] ss:$8 sps:$4 sm:$0xff]   ;;  %v8575_v37 = vld [vmem:[%s12174_s6 + $0x1b0] ss:$8 sps:$4 sm:$0xff]  }
 0x42e   : > { %5336 = vmatprep.subr.bf16.mxu1 %v8544_v58 }
 0x42f   : > { %v4551_v36 = vpop.permute.xlu0 %4550  ;;  %v4537_v0 = vpop.permute.xlu1 %4536 }
 0x430   : > { %v4597_v18 = vsel %vm4594_vm7, %v4593_v62, %v4537_v0  ;;  %v8583_v62 = vld [vmem:[%s12174_s6 + $0x1a4] ss:$8 sps:$4 sm:$0xff]   ;;  %v8578_v0 = vld [vmem:[%s12174_s6 + $0xa0] ss:$8 sps:$4 sm:$0xff]  }
 0x431   : > { %v4601_v45 = vsel %vm4598_vm8, %v4597_v18, %v4551_v36  ;;  %5337 = vmatpush1.bf16.msra.mxu1 %v8542_v55  ;;  %v8580_v36 = vld [vmem:[%s12174_s6 + $0xa4] ss:$8 sps:$4 sm:$0xff]   ;;  %v8581_v18 = vld [vmem:[%s12174_s6 + $0x1a0] ss:$8 sps:$4 sm:$0xff]  }
 0x432   : > { %5338 = vmatprep.subr.bf16.mxu1 %v8550_v30 }
 0x433   : > { %v4565_v54 = vpop.permute.xlu0 %4564  ;;  %v4575_v3 = vpop.permute.xlu1 %4574 }
 0x434   : > { %v4605_v47 = vsel %vm4602_vm9, %v4601_v45, %v4565_v54  ;;  %v4607_v29 = vsel %vm4578_vm5, %v11302_v59, %v4575_v3  ;;  %v8505_v59 = vld [vmem:[%s12174_s6 + $0x174] ss:$8 sps:$4 sm:$0xff]   ;;  %v8584_v3 = vld [vmem:[%s12174_s6 + $0x90] ss:$8 sps:$4 sm:$0xff]  }
 0x435   : > { %v4610_v40 = vpack.c.bf16 %v4605_v47, %v4605_v47  ;;  %v4611_v50 = vpack.c.bf16 %v4607_v29, %v4607_v29  ;;  %5363 = vmatprep.subr.bf16.mxu0 %v8505_v59  ;;  %5339 = vmatpush2.bf16.msra.mxu1 %v8548_v20  ;;  %v8586_v54 = vld [vmem:[%s12174_s6 + $0x94] ss:$8 sps:$4 sm:$0xff]   ;;  %v8587_v47 = vld [vmem:[%s12174_s6 + $0x190] ss:$8 sps:$4 sm:$0xff]   ;;  %v12258_v29 = vlaneseq }
 0x436   : > { %5364 = vmatpush1.bf16.msra.mxu0 %v8503_v46  ;;  %5340 = vmatprep.subr.bf16.mxu1 %v8556_v11  ;;  %v8589_v45 = vld [vmem:[%s12174_s6 + $0x194] ss:$8 sps:$4 sm:$0xff]   ;;  %v7036_v46 = vld [vmem:[%s12173_s5] ss:$0 sm:$0xff] }
 0x437   : > { %7048 = vmatprep.mubr.msk.bf16.mxu0 %vm4582_vm4, %v4611_v50  ;;  %5365 = vmatprep.subr.bf16.mxu0 %v8511_v25  ;;  %v12259_v25 = vmov 0.0  }
 0x438   : > { %4746 = vmatmul.mubr.bf16.gmra.mxu0 %v4610_v40  ;;  %v11540_v40 = vshrl.u32 %v12258_v29, 7 }
 0x439   : > { %5341 = vmatpush2.bf16.msra.mxu1 %v8554_v7 }
 0x43a   : > { %5366 = vmatpush1.bf16.msra.mxu0 %v8509_v24  ;;  %5342 = vmatprep.subr.bf16.mxu1 %v8562_v6  ;;  %v4436_v50 = vadd.s32 8, %v11540_v40  ;;  %v4755_v38 = vadd.s32 4294967292, %v11540_v40 }
 0x43b   : > { %5367 = vmatprep.subr.bf16.mxu0 %v8517_v35 }
 0x43c   : > { %v4756_v16 = vadd.s32 4294967292, %v4436_v50  ;;  %vm4758_vm11 = vcmp.ge.s32.totalorder %v4755_v38, 0 }
 0x43d   : > { %5343 = vmatpush2.bf16.msra.mxu1 %v8560_v10  ;;  %v7049_v32 = vsel %vm4758_vm11, 1.0, %v12259_v25 }
 0x43e   : > { %5368 = vmatpush1.bf16.msra.mxu0 %v8515_v2  ;;  %5344 = vmatprep.subr.bf16.mxu1 %v8568_v51  ;;  %vm4762_vm10 = vcmp.lt.s32.totalorder %v4756_v16, 8  ;;  %v8590_v2 = vld [vmem:[%s12174_s6 + $0x80] ss:$8 sps:$4 sm:$0xff]  }
 0x43f   : > { %5369 = vmatprep.subr.bf16.mxu0 %v8523_v27  ;;  %v7050_v17 = vsel %vm4762_vm10, 1.0, %v12259_v25  ;;  %v8593_v27 = vld [vmem:[%s12174_s6 + $0x180] ss:$8 sps:$4 sm:$0xff]   ;;  %v8620_v25 = vld [vmem:[%s12176_s8 + $0x1f8] ss:$36 sps:$4 sm:$0xff]  }
 0x441   : > { %5345 = vmatpush2.bf16.msra.mxu1 %v8566_v63 }
 0x442   : > { %5370 = vmatpush1.bf16.msra.mxu0 %v8521_v33  ;;  %5346 = vmatprep.subr.bf16.mxu1 %v8574_v39  ;;  %v8595_v33 = vld [vmem:[%s12174_s6 + $0x184] ss:$8 sps:$4 sm:$0xff]  }
 0x443   : > { %5371 = vmatprep.subr.bf16.mxu0 %v8529_v31 }
 0x445   : > { %5347 = vmatpush2.bf16.msra.mxu1 %v8572_v4 }
 0x446   : > { %5372 = vmatpush1.bf16.msra.mxu0 %v8527_v43  ;;  %5348 = vmatprep.subr.bf16.mxu1 %v8580_v36 }
 0x447   : > { %5373 = vmatprep.subr.bf16.mxu0 %v8535_v19 }
 0x449   : > { %5349 = vmatpush2.bf16.msra.mxu1 %v8578_v0 }
 0x44a   : > { %5374 = vmatpush1.bf16.msra.mxu0 %v8533_v41  ;;  %5350 = vmatprep.subr.bf16.mxu1 %v8586_v54 }
 0x44b   : > { %5375 = vmatprep.subr.bf16.mxu0 %v8541_v44 }
 0x44d   : > { %5351 = vmatpush2.bf16.msra.mxu1 %v8584_v3 }
 0x44e   : > { %5376 = vmatpush1.bf16.msra.mxu0 %v8539_v22  ;;  %5352 = vmatprep.subr.bf16.mxu1 %v8592_v13  ;;  %v8632_v13 = vld [vmem:[%s12176_s8 + $0x168] ss:$36 sps:$4 sm:$0xff]  }
 0x44f   : > { %5377 = vmatprep.subr.bf16.mxu0 %v8547_v21 }
 0x451   : > { %5353 = vmatpush2.bf16.msra.mxu1 %v8590_v2  ;;  %v8607_v2 = vld [vmem:[%s12174_s6 + $0x244] ss:$8 sps:$4 sm:$0xff]  }
 0x452   : > { %5378 = vmatpush1.bf16.msra.mxu0 %v8545_v48  ;;  %5404 = vmatprep.subr.bf16.mxu1 %v8598_v23  ;;  %v8646_v23 = vld [vmem:[%s12176_s8 + $0xdc] ss:$36 sps:$4 sm:$0xff]  }
 0x453   : > { %5379 = vmatprep.subr.bf16.mxu0 %v8553_v60 }
 0x456   : > { %5380 = vmatpush2.bf16.msra.mxu0 %v8551_v5 }
 0x457   : > { %5381 = vmatprep.subr.bf16.mxu0 %v8559_v14 }
 0x45a   : > { %5382 = vmatpush2.bf16.msra.mxu0 %v8557_v1 }
 0x45b   : > { %5383 = vmatprep.subr.bf16.mxu0 %v8565_v8  ;;  %v8622_v8 = vld [vmem:[%s12176_s8 + $0x1fc] ss:$36 sps:$4 sm:$0xff]  }
 0x45e   : > { %5384 = vmatpush2.bf16.msra.mxu0 %v8563_v12 }
 0x45f   : > { %5385 = vmatprep.subr.bf16.mxu0 %v8571_v56 }
 0x462   : > { %5386 = vmatpush2.bf16.msra.mxu0 %v8569_v9 }
 0x463   : > { %5387 = vmatprep.subr.bf16.mxu0 %v8577_v15 }
 0x466   : > { %5388 = vmatpush2.bf16.msra.mxu0 %v8575_v37 }
 0x467   : > { %5389 = vmatprep.subr.bf16.mxu0 %v8583_v62 }
 0x46a   : > { %5390 = vmatpush2.bf16.msra.mxu0 %v8581_v18 }
 0x46b   : > { %5391 = vmatprep.subr.bf16.mxu0 %v8589_v45 }
 0x46e   : > { %5392 = vmatpush2.bf16.msra.mxu0 %v8587_v47 }
 0x46f   : > { %5393 = vmatprep.subr.bf16.mxu0 %v8595_v33  ;;  %v8610_v33 = vld [vmem:[%s12174_s6 + $0x234] ss:$8 sps:$4 sm:$0xff]  }
 0x472   : > { %5394 = vmatpush2.bf16.msra.mxu0 %v8593_v27  ;;  %v8640_v27 = vld [vmem:[%s12176_s8 + $0x124] ss:$36 sps:$4 sm:$0xff]  }
 0x473   : > { %6392 = vmatprep.subr.bf16.mxu0 %v8622_v8  ;;  %v8649_v8 = vld [vmem:[%s12176_s8 + $0xe4] ss:$36 sps:$4 sm:$0xff]  }
 0x4e9   : > { %v4739_v59 = vpop.f32.mrf.mxu0 }
 0x4ea   : > { %v4740_v49 = vadd.f32 %v7036_v46, %v4739_v59  ;;  %v8596_v59 = vld [vmem:[%s12174_s6 + $0x270] ss:$8 sps:$4 sm:$0xff]  }
 0x4eb   : > { %v4741_v24 = vpop.f32.mrf.mxu0 }
 0x4ec   : > { %v4773_v35 = vmul.f32 %v7049_v32, %v4740_v49  ;;  %v8601_v49 = vld [vmem:[%s12174_s6 + $0x264] ss:$8 sps:$4 sm:$0xff]   ;;  %v8628_v32 = vld [vmem:[%s12176_s8 + $0x1b4] ss:$36 sps:$4 sm:$0xff]   ;;  %v8599_v24 = vld [vmem:[%s12174_s6 + $0x260] ss:$8 sps:$4 sm:$0xff]  }
 0x4ed   : > { %v4742_v26 = vpop.f32.mrf.mxu0 }
 0x4ee   : > { %v4743_v61 = vadd.f32 %v7036_v46, %v4742_v26  ;;  %v4798_v43 = vrot.slane %v4773_v35, 5  ;;  %v4808_v42 = vrot.slane %v4773_v35, 7  ;;  %v4778_v19 = vrot.slane %v4773_v35, 1  ;;  %v8634_v26 = vld [vmem:[%s12176_s8 + $0x16c] ss:$36 sps:$4 sm:$0xff]  }
 0x4ef   : > { %v4744_v53 = vpop.f32.mrf.mxu0  ;;  %v4788_v34 = vrot.slane %v4773_v35, 3  ;;  %v4794_v63 = vrot.slane %v4773_v35, 4  ;;  %v4784_v39 = vrot.slane %v4773_v35, 2  ;;  %v4804_v15 = vrot.slane %v4773_v35, 6 }
 0x4f0   : > { %v11561_v31 = vmul.f32 %v7050_v17, %v4743_v61  ;;  %v8604_v17 = vld [vmem:[%s12174_s6 + $0x254] ss:$8 sps:$4 sm:$0xff]   ;;  %v8605_v61 = vld [vmem:[%s12174_s6 + $0x240] ss:$8 sps:$4 sm:$0xff]  }
 0x4f1   : > { %v8638_v53 = vld [vmem:[%s12176_s8 + $0x120] ss:$36 sps:$4 sm:$0xff]  }
 0x4f2   : > { %v4799_v41 = vrot.slane %v11561_v31, 5  ;;  %v4809_v52 = vrot.slane %v11561_v31, 7  ;;  %v4779_v44 = vrot.slane %v11561_v31, 1  ;;  %v4789_v57 = vrot.slane %v11561_v31, 3 }
 0x4f3   : > { %v4795_v10 = vrot.slane %v11561_v31, 4  ;;  %v4785_v12 = vrot.slane %v11561_v31, 2  ;;  %v4805_v51 = vrot.slane %v11561_v31, 6 }
 0x4f4   : > { %v4800_v22 = vsel %vm1458_vm13, %v4798_v43, %v4799_v41  ;;  %v4810_v58 = vsel %vm1599_vm14, %v4808_v42, %v4809_v52  ;;  %v4780_v21 = vsel %vm1177_vm12, %v4778_v19, %v4779_v44  ;;  %v4790_v55 = vsel %vm919_vm1, %v4788_v34, %v4789_v57  ;;  %v8608_v43 = vld [vmem:[%s12174_s6 + $0x230] ss:$8 sps:$4 sm:$0xff]   ;;  %v8613_v42 = vld [vmem:[%s12174_s6 + $0x224] ss:$8 sps:$4 sm:$0xff]   ;;  %v8611_v41 = vld [vmem:[%s12174_s6 + $0x220] ss:$8 sps:$4 sm:$0xff]  }
 0x4f5   : > { %v8167_v48 = vpack.i.bf16 %v4800_v22, %v4810_v58  ;;  %v8162_v30 = vpack.i.bf16 %v4780_v21, %v4790_v55  ;;  %v4796_v0 = vsel %vm918_vm0, %v4794_v63, %v4795_v10  ;;  %v4786_v18 = vsel %vm1247_vm2, %v4784_v39, %v4785_v12  ;;  %v8644_v19 = vld [vmem:[%s12176_s8 + $0xd8] ss:$36 sps:$4 sm:$0xff]   ;;  %v8658_v57 = vld [vmem:[%s12176_s8 + $0x4c] ss:$36 sps:$4 sm:$0xff]   ;;  %v8647_v10 = vld [vmem:[%s12176_s8 + $0xe0] ss:$36 sps:$4 sm:$0xff]  }
 0x4f6   : > { %v4806_v54 = vsel %vm1525_vm15, %v4804_v15, %v4805_v51  ;;  %v8652_v34 = vld [vmem:[%s12176_s8 + $0x94] ss:$36 sps:$4 sm:$0xff]   ;;  %v8619_v58 = vld [vmem:[%s12174_s6 + $0x204] ss:$8 sps:$4 sm:$0xff]   ;;  %v8655_v12 = vld [vmem:[%s12176_s8 + $0x9c] ss:$36 sps:$4 sm:$0xff]  }
 0x4f7   : > { %8168 = vrot.lane.b32.xlu0 %v8167_v48, %s12260_s12  ;;  %8163 = vrot.lane.b32.xlu1 %v8162_v30, %s12260_s12  ;;  %v8616_v52 = vld [vmem:[%s12174_s6 + $0x214] ss:$8 sps:$4 sm:$0xff]   ;;  %v8614_v22 = vld [vmem:[%s12174_s6 + $0x210] ss:$8 sps:$4 sm:$0xff]   ;;  %vm6604_vm0 = vcmask 15360  }
 0x4f8   : > { %v4747_v60 = vpop.f32.mrf.mxu0  ;;  %v8656_v21 = vld [vmem:[%s12176_s8 + $0x48] ss:$36 sps:$4 sm:$0xff]   ;;  %v8653_v51 = vld [vmem:[%s12176_s8 + $0x98] ss:$36 sps:$4 sm:$0xff]   ;;  %v8659_v63 = vld [vmem:[%s12176_s8 + $0x50] ss:$36 sps:$4 sm:$0xff]  }
 0x4f9   : > { %v4748_v20 = vadd.f32 %v7036_v46, %v4747_v60  ;;  %v8617_v48 = vld [vmem:[%s12174_s6 + $0x200] ss:$8 sps:$4 sm:$0xff]  }
 0x4fa   : > { %v4749_v5 = vpop.f32.mrf.mxu0  ;;  %v8625_v30 = vld [vmem:[%s12176_s8 + $0x204] ss:$36 sps:$4 sm:$0xff]  }
 0x4fb   : > { %v4775_v11 = vmul.f32 0.0, %v4748_v20  ;;  %v8623_v20 = vld [vmem:[%s12176_s8 + $0x200] ss:$36 sps:$4 sm:$0xff]   ;;  %v8665_v15 = vld [vmem:[%s12176_s8 + $0x8] ss:$36 sps:$4 sm:$0xff]  }
 0x4fc   : > { %v4750_v14 = vpop.f32.mrf.mxu0  ;;  %v8664_v39 = vld [vmem:[%s12176_s8 + $0x4] ss:$36 sps:$4 sm:$0xff]  }
 0x4fd   : > { %v4815_v7 = vrot.slane %v4775_v11, 1  ;;  %v8631_v11 = vld [vmem:[%s12176_s8 + $0x1bc] ss:$36 sps:$4 sm:$0xff]  }
 0x4fe   : > { %v4751_v1 = vpop.f32.mrf.mxu0  ;;  %v8629_v14 = vld [vmem:[%s12176_s8 + $0x1b8] ss:$36 sps:$4 sm:$0xff]  }
 0x4ff   : > { %v4816_v6 = vsel %vm1177_vm12, %v4779_v44, %v4815_v7  ;;  %v8650_v44 = vld [vmem:[%s12176_s8 + $0x90] ss:$36 sps:$4 sm:$0xff]  }
 0x500   : > { %4817 = vrot.lane.b32.xlu1 %v4816_v6, %s12260_s12  ;;  %v8635_v7 = vld [vmem:[%s12176_s8 + $0x170] ss:$36 sps:$4 sm:$0xff]   ;;  %v8641_v6 = vld [vmem:[%s12176_s8 + $0x128] ss:$36 sps:$4 sm:$0xff]  }
 0x501   : > { %v8643_v1 = vld [vmem:[%s12176_s8 + $0x12c] ss:$36 sps:$4 sm:$0xff]  }
 0x569   : > { %v8169_v56 = vpop.permute.xlu0 %8168  ;;  %v8164_v9 = vpop.permute.xlu1 %8163 }
 0x56a   : > { %v8171_v4 = vunpack.i.h.bf16 %v8169_v56  ;;  %v8170_v37 = vunpack.i.l.bf16 %v8169_v56  ;;  %v8166_v36 = vunpack.i.h.bf16 %v8164_v9  ;;  %v8165_v62 = vunpack.i.l.bf16 %v8164_v9  ;;  %v8661_v56 = vld [vmem:[%s12176_s8 + $0x54] ss:$36 sps:$4 sm:$0xff]   ;;  %v8662_v9 = vld [vmem:[%s12176_s8] ss:$36 sps:$4 sm:$0xff]  }
 0x56c   : > { %v4822_v45 = vsel %vm4590_vm6, %v4796_v0, %v8171_v4  ;;  %v4820_v3 = vsel %vm4590_vm6, %v4773_v35, %v8166_v36  ;;  %v4821_v47 = vsel %vm4590_vm6, %v4786_v18, %v8165_v62  ;;  %v4823_v29 = vsel %vm4590_vm6, %v4806_v54, %v8170_v37  ;;  %v8626_v35 = vld [vmem:[%s12176_s8 + $0x1b0] ss:$36 sps:$4 sm:$0xff]   ;;  %v8670_v37 = vld [vmem:[%s12176_s8 + $0x43c] ss:$36 sps:$4 sm:$0xff]   ;;  %v8673_v36 = vld [vmem:[%s12176_s8 + $0x444] ss:$36 sps:$4 sm:$0xff]  }
 0x56d   : > { %v4827_v50 = vpack.c.bf16 %v4822_v45, %v4822_v45  ;;  %v4825_v38 = vpack.c.bf16 %v4820_v3, %v4820_v3  ;;  %v4826_v16 = vpack.c.bf16 %v4821_v47, %v4821_v47  ;;  %v4828_v46 = vpack.c.bf16 %v4823_v29, %v4823_v29  ;;  %v8667_v4 = vld [vmem:[%s12176_s8 + $0xc] ss:$36 sps:$4 sm:$0xff]   ;;  %v8668_v62 = vld [vmem:[%s12176_s8 + $0x438] ss:$36 sps:$4 sm:$0xff]   ;;  %v8671_v0 = vld [vmem:[%s12176_s8 + $0x440] ss:$36 sps:$4 sm:$0xff]  }
 0x56e   : > { %v8676_v18 = vld [vmem:[%s12176_s8 + $0x3f4] ss:$36 sps:$4 sm:$0xff]   ;;  %v8679_v54 = vld [vmem:[%s12176_s8 + $0x3fc] ss:$36 sps:$4 sm:$0xff]   ;;  %v8682_v47 = vld [vmem:[%s12176_s8 + $0x3ac] ss:$36 sps:$4 sm:$0xff]  }
 0x56f   : > { %5354 = vmatprep.mubr.bf16.mxu1 %v4826_v16  ;;  %5395 = vmatprep.mubr.bf16.mxu0 %v4828_v46  ;;  %v8674_v45 = vld [vmem:[%s12176_s8 + $0x3f0] ss:$36 sps:$4 sm:$0xff]   ;;  %v8677_v3 = vld [vmem:[%s12176_s8 + $0x3f8] ss:$36 sps:$4 sm:$0xff]   ;;  %v8688_v16 = vld [vmem:[%s12176_s8 + $0x364] ss:$36 sps:$4 sm:$0xff]  }
 0x570   : > { %5355 = vmatmul.mubr.bf16.vlgmr.msra.gmra.mxu1 %v4825_v38  ;;  %5396 = vmatmul.mubr.bf16.vlgmr.msra.gmra.mxu0 %v4827_v50  ;;  %v8685_v29 = vld [vmem:[%s12176_s8 + $0x3b4] ss:$36 sps:$4 sm:$0xff]   ;;  %v8680_v50 = vld [vmem:[%s12176_s8 + $0x3a8] ss:$36 sps:$4 sm:$0xff]  }
 0x571   : > { %5405 = vmatpush1.bf16.msra.mxu1 %v8596_v59  ;;  %5436 = vmatprep.mubr.bf16.mxu1 %v12257_v28  ;;  %v8602_v28 = vld [vmem:[%s12174_s6 + $0x250] ss:$8 sps:$4 sm:$0xff]   ;;  %v8686_v59 = vld [vmem:[%s12176_s8 + $0x360] ss:$36 sps:$4 sm:$0xff]  }
 0x572   : > { %5406 = vmatprep.subr.bf16.mxu1 %v8601_v49  ;;  %6393 = vmatpush1.bf16.msra.mxu0 %v8620_v25  ;;  %v4818_v55 = vpop.permute.xlu1 %4817  ;;  %v8683_v38 = vld [vmem:[%s12176_s8 + $0x3b0] ss:$36 sps:$4 sm:$0xff]   ;;  %v8689_v49 = vld [vmem:[%s12176_s8 + $0x368] ss:$36 sps:$4 sm:$0xff]   ;;  %v8694_v25 = vld [vmem:[%s12176_s8 + $0x31c] ss:$36 sps:$4 sm:$0xff]  }
 0x573   : > { %6394 = vmatprep.subr.bf16.mxu0 %v8628_v32  ;;  %v4824_v60 = vsel %vm4590_vm6, %v11561_v31, %v4818_v55  ;;  %v8637_v31 = vld [vmem:[%s12176_s8 + $0x174] ss:$36 sps:$4 sm:$0xff]   ;;  %v8691_v46 = vld [vmem:[%s12176_s8 + $0x36c] ss:$36 sps:$4 sm:$0xff]   ;;  %v8697_v32 = vld [vmem:[%s12176_s8 + $0x324] ss:$36 sps:$4 sm:$0xff]  }
 0x574   : > { %v4829_v5 = vpack.c.bf16 %v4824_v60, %v4824_v60  ;;  %v4918_v60 = vsub.s32 1, %v11540_v40 }
 0x575   : > { %5407 = vmatpush1.bf16.msra.mxu1 %v8599_v24  ;;  %v8692_v24 = vld [vmem:[%s12176_s8 + $0x318] ss:$36 sps:$4 sm:$0xff]  }
 0x576   : > { %5408 = vmatprep.subr.bf16.mxu1 %v8604_v17  ;;  %6395 = vmatpush1.bf16.msra.mxu0 %v8626_v35  ;;  %v8695_v17 = vld [vmem:[%s12176_s8 + $0x320] ss:$36 sps:$4 sm:$0xff]   ;;  %v8700_v35 = vld [vmem:[%s12176_s8 + $0x2d4] ss:$36 sps:$4 sm:$0xff]  }
 0x577   : > { %6396 = vmatprep.subr.bf16.mxu0 %v8634_v26  ;;  %v8703_v26 = vld [vmem:[%s12176_s8 + $0x2dc] ss:$36 sps:$4 sm:$0xff]  }
 0x579   : > { %5409 = vmatpush1.bf16.msra.mxu1 %v8602_v28  ;;  %v8698_v28 = vld [vmem:[%s12176_s8 + $0x2d0] ss:$36 sps:$4 sm:$0xff]  }
 0x57a   : > { %5410 = vmatprep.subr.bf16.mxu1 %v8607_v2  ;;  %6397 = vmatpush1.bf16.msra.mxu0 %v8632_v13  ;;  %v8701_v2 = vld [vmem:[%s12176_s8 + $0x2d8] ss:$36 sps:$4 sm:$0xff]   ;;  %v8706_v13 = vld [vmem:[%s12176_s8 + $0x28c] ss:$36 sps:$4 sm:$0xff]  }
 0x57b   : > { %6398 = vmatprep.subr.bf16.mxu0 %v8640_v27  ;;  %v8709_v27 = vld [vmem:[%s12176_s8 + $0x294] ss:$36 sps:$4 sm:$0xff]  }
 0x57d   : > { %5411 = vmatpush1.bf16.msra.mxu1 %v8605_v61  ;;  %v8704_v61 = vld [vmem:[%s12176_s8 + $0x288] ss:$36 sps:$4 sm:$0xff]  }
 0x57e   : > { %5412 = vmatprep.subr.bf16.mxu1 %v8610_v33  ;;  %6399 = vmatpush1.bf16.msra.mxu0 %v8638_v53  ;;  %v8707_v33 = vld [vmem:[%s12176_s8 + $0x290] ss:$36 sps:$4 sm:$0xff]   ;;  %v8710_v53 = vld [vmem:[%s12176_s8 + $0x240] ss:$36 sps:$4 sm:$0xff]  }
 0x57f   : > { %6400 = vmatprep.subr.bf16.mxu0 %v8646_v23  ;;  %v8712_v23 = vld [vmem:[%s12176_s8 + $0x244] ss:$36 sps:$4 sm:$0xff]  }
 0x581   : > { %5413 = vmatpush1.bf16.msra.mxu1 %v8608_v43  ;;  %v8713_v43 = vld [vmem:[%s12176_s8 + $0x248] ss:$36 sps:$4 sm:$0xff]  }
 0x582   : > { %5414 = vmatprep.subr.bf16.mxu1 %v8613_v42  ;;  %6401 = vmatpush1.bf16.msra.mxu0 %v8644_v19  ;;  %v8715_v42 = vld [vmem:[%s12176_s8 + $0x24c] ss:$36 sps:$4 sm:$0xff]  }
 0x583   : > { %6402 = vmatprep.subr.bf16.mxu0 %v8652_v34  ;;  %v8718_v19 = vld [vmem:[%s12176_s8 + $0x20c] ss:$36 sps:$4 sm:$0xff]   ;;  %v8721_v34 = vld [vmem:[%s12176_s8 + $0x214] ss:$36 sps:$4 sm:$0xff]  }
 0x585   : > { %5415 = vmatpush1.bf16.msra.mxu1 %v8611_v41 }
 0x586   : > { %5416 = vmatprep.subr.bf16.mxu1 %v8616_v52  ;;  %6403 = vmatpush1.bf16.msra.mxu0 %v8650_v44 }
 0x587   : > { %6404 = vmatprep.subr.bf16.mxu0 %v8658_v57 }
 0x589   : > { %5417 = vmatpush1.bf16.msra.mxu1 %v8614_v22 }
 0x58a   : > { %5418 = vmatprep.subr.bf16.mxu1 %v8619_v58  ;;  %6405 = vmatpush1.bf16.msra.mxu0 %v8656_v21 }
 0x58b   : > { %6406 = vmatprep.subr.bf16.mxu0 %v8664_v39 }
 0x58d   : > { %5419 = vmatpush1.bf16.msra.mxu1 %v8617_v48  ;;  %v4914_v48 = vsub.s32 0, %v11540_v40 }
 0x58e   : > { %6433 = vmatprep.subr.bf16.mxu1 %v8625_v30  ;;  %6407 = vmatpush1.bf16.msra.mxu0 %v8662_v9  ;;  %v4910_v30 = vld [vmem:[%s12175_s7] sm:$0x3] }
 0x58f   : > { %6408 = vmatprep.subr.bf16.mxu0 %v8670_v37  ;;  %v8722_v37 = vld [vmem:[%s12176_s8 + $0x1c0] ss:$36 sps:$4 sm:$0xff]  }
 0x590   : > { %5437 = vmatmul.mubr.bf16.vlgmr.msra.gmra.mxu1 %v4829_v5  ;;  %v4919_v5 = vrot.slane %v4910_v30, %v4918_v60 }
 0x591   : > { %6434 = vmatpush1.bf16.msra.mxu1 %v8623_v20  ;;  %v4915_v20 = vrot.slane %v4910_v30, %v4914_v48  ;;  %v8790_v30 = vld [vmem:[%s12176_s8 + $0x32c] ss:$36 sps:$4 sm:$0xff]  }
 0x592   : > { %6435 = vmatprep.subr.bf16.mxu1 %v8631_v11  ;;  %6409 = vmatpush2.bf16.msra.mxu0 %v8668_v62  ;;  %v8730_v62 = vld [vmem:[%s12176_s8 + $0x17c] ss:$36 sps:$4 sm:$0xff]  }
 0x593   : > { %6410 = vmatprep.subr.bf16.mxu0 %v8676_v18  ;;  %v8728_v18 = vld [vmem:[%s12176_s8 + $0x178] ss:$36 sps:$4 sm:$0xff]  }
 0x595   : > { %6436 = vmatpush1.bf16.msra.mxu1 %v8629_v14 }
 0x596   : > { %6437 = vmatprep.subr.bf16.mxu1 %v8637_v31  ;;  %6411 = vmatpush2.bf16.msra.mxu0 %v8674_v45  ;;  %v8736_v45 = vld [vmem:[%s12176_s8 + $0x134] ss:$36 sps:$4 sm:$0xff]  }
 0x597   : > { %6412 = vmatprep.subr.bf16.mxu0 %v8682_v47  ;;  %v8734_v47 = vld [vmem:[%s12176_s8 + $0x130] ss:$36 sps:$4 sm:$0xff]  }
 0x599   : > { %6438 = vmatpush1.bf16.msra.mxu1 %v8635_v7 }
 0x59a   : > { %6439 = vmatprep.subr.bf16.mxu1 %v8643_v1  ;;  %6413 = vmatpush2.bf16.msra.mxu0 %v8680_v50  ;;  %v8742_v50 = vld [vmem:[%s12176_s8 + $0xec] ss:$36 sps:$4 sm:$0xff]  }
 0x59b   : > { %6414 = vmatprep.subr.bf16.mxu0 %v8688_v16  ;;  %v8740_v16 = vld [vmem:[%s12176_s8 + $0xe8] ss:$36 sps:$4 sm:$0xff]  }
 0x59d   : > { %6440 = vmatpush1.bf16.msra.mxu1 %v8641_v6 }
 0x59e   : > { %6441 = vmatprep.subr.bf16.mxu1 %v8649_v8  ;;  %6415 = vmatpush2.bf16.msra.mxu0 %v8686_v59  ;;  %v8748_v59 = vld [vmem:[%s12176_s8 + $0xa4] ss:$36 sps:$4 sm:$0xff]  }
 0x59f   : > { %6416 = vmatprep.subr.bf16.mxu0 %v8694_v25  ;;  %v8746_v25 = vld [vmem:[%s12176_s8 + $0xa0] ss:$36 sps:$4 sm:$0xff]  }
 0x5a1   : > { %6442 = vmatpush1.bf16.msra.mxu1 %v8647_v10 }
 0x5a2   : > { %6443 = vmatprep.subr.bf16.mxu1 %v8655_v12  ;;  %6417 = vmatpush2.bf16.msra.mxu0 %v8692_v24  ;;  %v8754_v24 = vld [vmem:[%s12176_s8 + $0x5c] ss:$36 sps:$4 sm:$0xff]  }
 0x5a3   : > { %6418 = vmatprep.subr.bf16.mxu0 %v8700_v35  ;;  %v8752_v35 = vld [vmem:[%s12176_s8 + $0x58] ss:$36 sps:$4 sm:$0xff]  }
 0x5a5   : > { %6444 = vmatpush1.bf16.msra.mxu1 %v8653_v51 }
 0x5a6   : > { %6445 = vmatprep.subr.bf16.mxu1 %v8661_v56  ;;  %6419 = vmatpush2.bf16.msra.mxu0 %v8698_v28  ;;  %v8716_v56 = vld [vmem:[%s12176_s8 + $0x208] ss:$36 sps:$4 sm:$0xff]   ;;  %v8760_v28 = vld [vmem:[%s12176_s8 + $0x14] ss:$36 sps:$4 sm:$0xff]  }
 0x5a7   : > { %6420 = vmatprep.subr.bf16.mxu0 %v8706_v13  ;;  %v8758_v13 = vld [vmem:[%s12176_s8 + $0x10] ss:$36 sps:$4 sm:$0xff]  }
 0x5a9   : > { %6446 = vmatpush1.bf16.msra.mxu1 %v8659_v63  ;;  %v8719_v63 = vld [vmem:[%s12176_s8 + $0x210] ss:$36 sps:$4 sm:$0xff]  }
 0x5aa   : > { %6447 = vmatprep.subr.bf16.mxu1 %v8667_v4  ;;  %6421 = vmatpush2.bf16.msra.mxu0 %v8704_v61  ;;  %v8727_v4 = vld [vmem:[%s12176_s8 + $0x1cc] ss:$36 sps:$4 sm:$0xff]  }
 0x5ab   : > { %6422 = vmatprep.subr.bf16.mxu0 %v8712_v23  ;;  %v8766_v61 = vld [vmem:[%s12176_s8 + $0x44c] ss:$36 sps:$4 sm:$0xff]  }
 0x5ac   : > { %v8767_v23 = vld [vmem:[%s12176_s8 + $0x450] ss:$36 sps:$4 sm:$0xff]  }
 0x5ad   : > { %6448 = vmatpush1.bf16.msra.mxu1 %v8665_v15  ;;  %v8724_v15 = vld [vmem:[%s12176_s8 + $0x1c4] ss:$36 sps:$4 sm:$0xff]  }
 0x5ae   : > { %6449 = vmatprep.subr.bf16.mxu1 %v8673_v36  ;;  %6423 = vmatpush2.bf16.msra.mxu0 %v8710_v53  ;;  %v8725_v36 = vld [vmem:[%s12176_s8 + $0x1c8] ss:$36 sps:$4 sm:$0xff]  }
 0x5af   : > { %6474 = vmatprep.subr.bf16.mxu0 %v8718_v19  ;;  %v8764_v53 = vld [vmem:[%s12176_s8 + $0x448] ss:$36 sps:$4 sm:$0xff]   ;;  %v8770_v19 = vld [vmem:[%s12176_s8 + $0x400] ss:$36 sps:$4 sm:$0xff]  }
 0x5b1   : > { %6450 = vmatpush2.bf16.msra.mxu1 %v8671_v0  ;;  %v8733_v0 = vld [vmem:[%s12176_s8 + $0x184] ss:$36 sps:$4 sm:$0xff]  }
 0x5b2   : > { %6451 = vmatprep.subr.bf16.mxu1 %v8679_v54  ;;  %v8731_v54 = vld [vmem:[%s12176_s8 + $0x180] ss:$36 sps:$4 sm:$0xff]  }
 0x5b5   : > { %6452 = vmatpush2.bf16.msra.mxu1 %v8677_v3  ;;  %v8739_v3 = vld [vmem:[%s12176_s8 + $0x13c] ss:$36 sps:$4 sm:$0xff]  }
 0x5b6   : > { %6453 = vmatprep.subr.bf16.mxu1 %v8685_v29  ;;  %v8737_v29 = vld [vmem:[%s12176_s8 + $0x138] ss:$36 sps:$4 sm:$0xff]  }
 0x5b9   : > { %6454 = vmatpush2.bf16.msra.mxu1 %v8683_v38  ;;  %v8745_v38 = vld [vmem:[%s12176_s8 + $0xf4] ss:$36 sps:$4 sm:$0xff]  }
 0x5ba   : > { %6455 = vmatprep.subr.bf16.mxu1 %v8691_v46  ;;  %v8743_v46 = vld [vmem:[%s12176_s8 + $0xf0] ss:$36 sps:$4 sm:$0xff]  }
 0x5bd   : > { %6456 = vmatpush2.bf16.msra.mxu1 %v8689_v49  ;;  %v8751_v49 = vld [vmem:[%s12176_s8 + $0xac] ss:$36 sps:$4 sm:$0xff]  }
 0x5be   : > { %6457 = vmatprep.subr.bf16.mxu1 %v8697_v32  ;;  %v8749_v32 = vld [vmem:[%s12176_s8 + $0xa8] ss:$36 sps:$4 sm:$0xff]  }
 0x5c1   : > { %6458 = vmatpush2.bf16.msra.mxu1 %v8695_v17  ;;  %v8757_v17 = vld [vmem:[%s12176_s8 + $0x64] ss:$36 sps:$4 sm:$0xff]  }
 0x5c2   : > { %6459 = vmatprep.subr.bf16.mxu1 %v8703_v26  ;;  %v8755_v26 = vld [vmem:[%s12176_s8 + $0x60] ss:$36 sps:$4 sm:$0xff]  }
 0x5c5   : > { %6460 = vmatpush2.bf16.msra.mxu1 %v8701_v2  ;;  %v8763_v2 = vld [vmem:[%s12176_s8 + $0x1c] ss:$36 sps:$4 sm:$0xff]  }
 0x5c6   : > { %6461 = vmatprep.subr.bf16.mxu1 %v8709_v27  ;;  %v8761_v27 = vld [vmem:[%s12176_s8 + $0x18] ss:$36 sps:$4 sm:$0xff]  }
 0x5c9   : > { %6462 = vmatpush2.bf16.msra.mxu1 %v8707_v33  ;;  %v8769_v33 = vld [vmem:[%s12176_s8 + $0x454] ss:$36 sps:$4 sm:$0xff]  }
 0x5ca   : > { %6463 = vmatprep.subr.bf16.mxu1 %v8715_v42  ;;  %v8775_v42 = vld [vmem:[%s12176_s8 + $0x40c] ss:$36 sps:$4 sm:$0xff]  }
 0x5cd   : > { %6464 = vmatpush2.bf16.msra.mxu1 %v8713_v43  ;;  %v8772_v43 = vld [vmem:[%s12176_s8 + $0x404] ss:$36 sps:$4 sm:$0xff]  }
 0x5ce   : > { %6515 = vmatprep.subr.bf16.mxu1 %v8721_v34  ;;  %v8773_v34 = vld [vmem:[%s12176_s8 + $0x408] ss:$36 sps:$4 sm:$0xff]  }
 0x630   : > { %v5356_v41 = vpop.f32.mrf.mxu1  ;;  %v5397_v52 = vpop.f32.mrf.mxu0 }
 0x631   : > { %v5357_v11 = vadd.f32 %v5356_v41, %v4915_v20  ;;  %v8778_v41 = vld [vmem:[%s12176_s8 + $0x3bc] ss:$36 sps:$4 sm:$0xff]   ;;  %v8793_v20 = vld [vmem:[%s12176_s8 + $0x334] ss:$36 sps:$4 sm:$0xff]  }
 0x632   : > { %v5358_v44 = vpop.f32.mrf.mxu1  ;;  %v5399_v57 = vpop.f32.mrf.mxu0 }
 0x633   : > { %v5359_v14 = vadd.f32 %v5358_v44, %v4919_v5  ;;  %v5398_v31 = vadd.f32 %v5397_v52, %v5357_v11  ;;  %v8781_v52 = vld [vmem:[%s12176_s8 + $0x3c4] ss:$36 sps:$4 sm:$0xff]   ;;  %v8776_v44 = vld [vmem:[%s12176_s8 + $0x3b8] ss:$36 sps:$4 sm:$0xff]   ;;  %v8791_v11 = vld [vmem:[%s12176_s8 + $0x330] ss:$36 sps:$4 sm:$0xff]  }
 0x634   : > { %v5360_v22 = vpop.f32.mrf.mxu1  ;;  %v5401_v58 = vpop.f32.mrf.mxu0  ;;  %v8788_v5 = vld [vmem:[%s12176_s8 + $0x328] ss:$36 sps:$4 sm:$0xff]  }
 0x635   : > { %v5400_v1 = vadd.f32 %v5399_v57, %v5359_v14  ;;  %v8779_v57 = vld [vmem:[%s12176_s8 + $0x3c0] ss:$36 sps:$4 sm:$0xff]   ;;  %v8784_v22 = vld [vmem:[%s12176_s8 + $0x374] ss:$36 sps:$4 sm:$0xff]  }
 0x636   : > { %v5361_v21 = vpop.f32.mrf.mxu1  ;;  %v5402_v55 = vpop.f32.mrf.mxu0  ;;  %v8787_v58 = vld [vmem:[%s12176_s8 + $0x37c] ss:$36 sps:$4 sm:$0xff]   ;;  %v8796_v14 = vld [vmem:[%s12176_s8 + $0x2e4] ss:$36 sps:$4 sm:$0xff]  }
 0x637   : > { %v8782_v21 = vld [vmem:[%s12176_s8 + $0x370] ss:$36 sps:$4 sm:$0xff]   ;;  %v8785_v55 = vld [vmem:[%s12176_s8 + $0x378] ss:$36 sps:$4 sm:$0xff]  }
 0x650   : > { %v5438_v7 = vpop.f32.mrf.mxu1 }
 0x651   : > { %v5439_v6 = vadd.f32 %v5438_v7, %v5398_v31  ;;  %v8799_v31 = vld [vmem:[%s12176_s8 + $0x2ec] ss:$36 sps:$4 sm:$0xff]   ;;  %v8794_v7 = vld [vmem:[%s12176_s8 + $0x2e0] ss:$36 sps:$4 sm:$0xff]  }
 0x652   : > { %v5440_v8 = vpop.f32.mrf.mxu1 }
 0x653   : > { %v5441_v10 = vadd.f32 %v5440_v8, %v5400_v1  ;;  %v11851_v9 = vpack.c.bf16 %v5439_v6, %v5439_v6  ;;  %v8797_v1 = vld [vmem:[%s12176_s8 + $0x2e8] ss:$36 sps:$4 sm:$0xff]   ;;  %v8802_v6 = vld [vmem:[%s12176_s8 + $0x29c] ss:$36 sps:$4 sm:$0xff]  }
 0x654   : > { %v5442_v12 = vpop.f32.mrf.mxu1  ;;  %v8805_v8 = vld [vmem:[%s12176_s8 + $0x2a4] ss:$36 sps:$4 sm:$0xff]  }
 0x655   : > { %v11843_v51 = vpack.c.bf16 %v5441_v10, %v5441_v10  ;;  %v8800_v10 = vld [vmem:[%s12176_s8 + $0x298] ss:$36 sps:$4 sm:$0xff]   ;;  %v8803_v12 = vld [vmem:[%s12176_s8 + $0x2a0] ss:$36 sps:$4 sm:$0xff]  }
 0x656   : > { %v5443_v39 = vpop.f32.mrf.mxu1 }
 0x657   : > { %6424 = vmatprep.mubr.bf16.mxu0 %v11843_v51  ;;  %6465 = vmatprep.mubr.bf16.mxu1 %v11843_v51  ;;  %v8806_v39 = vld [vmem:[%s12176_s8 + $0x250] ss:$36 sps:$4 sm:$0xff]  }
 0x658   : > { %6425 = vmatmul.mubr.bf16.vlgmr.msra.gmra.mxu0 %v11851_v9  ;;  %6466 = vmatmul.mubr.bf16.vlgmr.msra.gmra.mxu1 %v11851_v9 }
 0x659   : > { %6475 = vmatpush1.bf16.msra.mxu0 %v8716_v56  ;;  %6516 = vmatpush1.bf16.msra.mxu1 %v8719_v63  ;;  %v8808_v56 = vld [vmem:[%s12176_s8 + $0x254] ss:$36 sps:$4 sm:$0xff]   ;;  %v8811_v63 = vld [vmem:[%s12176_s8 + $0x25c] ss:$36 sps:$4 sm:$0xff]  }
 0x65a   : > { %6506 = vmatprep.mubr.bf16.mxu0 %v11843_v51  ;;  %6547 = vmatprep.mubr.bf16.mxu1 %v11843_v51 }
 0x65b   : > { %6476 = vmatprep.subr.bf16.mxu0 %v8724_v15  ;;  %6517 = vmatprep.subr.bf16.mxu1 %v8727_v4  ;;  %v8809_v15 = vld [vmem:[%s12176_s8 + $0x258] ss:$36 sps:$4 sm:$0xff]  }
 0x65c   : > { %v8812_v4 = vld [vmem:[%s12176_s8 + $0x458] ss:$36 sps:$4 sm:$0xff]  }
 0x65d   : > { %6477 = vmatpush1.bf16.msra.mxu0 %v8722_v37  ;;  %6518 = vmatpush1.bf16.msra.mxu1 %v8725_v36  ;;  %v8813_v37 = vld [vmem:[%s12176_s8 + $0x218] ss:$36 sps:$4 sm:$0xff]   ;;  %v8814_v36 = vld [vmem:[%s12176_s8 + $0x410] ss:$36 sps:$4 sm:$0xff]  }
 0x65e   : > { %6478 = vmatprep.subr.bf16.mxu0 %v8730_v62  ;;  %6519 = vmatprep.subr.bf16.mxu1 %v8733_v0  ;;  %v8815_v62 = vld [vmem:[%s12176_s8 + $0x1d0] ss:$36 sps:$4 sm:$0xff]   ;;  %v8816_v0 = vld [vmem:[%s12176_s8 + $0x3c8] ss:$36 sps:$4 sm:$0xff]  }
 0x661   : > { %6479 = vmatpush1.bf16.msra.mxu0 %v8728_v18  ;;  %6520 = vmatpush1.bf16.msra.mxu1 %v8731_v54  ;;  %v8817_v18 = vld [vmem:[%s12176_s8 + $0x188] ss:$36 sps:$4 sm:$0xff]   ;;  %v8818_v54 = vld [vmem:[%s12176_s8 + $0x380] ss:$36 sps:$4 sm:$0xff]  }
 0x662   : > { %6480 = vmatprep.subr.bf16.mxu0 %v8736_v45  ;;  %6521 = vmatprep.subr.bf16.mxu1 %v8739_v3  ;;  %v8820_v45 = vld [vmem:[%s12176_s8 + $0x338] ss:$36 sps:$4 sm:$0xff]  }
 0x663   : > { %v8821_v3 = vld [vmem:[%s12176_s8 + $0xf8] ss:$36 sps:$4 sm:$0xff]  }
 0x665   : > { %6481 = vmatpush1.bf16.msra.mxu0 %v8734_v47  ;;  %6522 = vmatpush1.bf16.msra.mxu1 %v8737_v29  ;;  %v8822_v47 = vld [vmem:[%s12176_s8 + $0x2f0] ss:$36 sps:$4 sm:$0xff]  }
 0x666   : > { %6482 = vmatprep.subr.bf16.mxu0 %v8742_v50  ;;  %6523 = vmatprep.subr.bf16.mxu1 %v8745_v38  ;;  %v8823_v29 = vld [vmem:[%s12176_s8 + $0xb0] ss:$36 sps:$4 sm:$0xff]   ;;  %v8824_v50 = vld [vmem:[%s12176_s8 + $0x2a8] ss:$36 sps:$4 sm:$0xff]  }
 0x667   : > { %v8825_v38 = vld [vmem:[%s12176_s8 + $0x68] ss:$36 sps:$4 sm:$0xff]  }
 0x669   : > { %6483 = vmatpush1.bf16.msra.mxu0 %v8740_v16  ;;  %6524 = vmatpush1.bf16.msra.mxu1 %v8743_v46  ;;  %v8826_v16 = vld [vmem:[%s12176_s8 + $0x260] ss:$36 sps:$4 sm:$0xff]  }
 0x66a   : > { %6484 = vmatprep.subr.bf16.mxu0 %v8748_v59  ;;  %6525 = vmatprep.subr.bf16.mxu1 %v8751_v49  ;;  %v8827_v46 = vld [vmem:[%s12176_s8 + $0x20] ss:$36 sps:$4 sm:$0xff]   ;;  %v5621_v59 = vsub.s32 2, %v11540_v40 }
 0x66b   : > { %v5607_v49 = vld [vmem:[%s12177_s9] sm:$0xff] }
 0x66d   : > { %6485 = vmatpush1.bf16.msra.mxu0 %v8746_v25  ;;  %6526 = vmatpush1.bf16.msra.mxu1 %v8749_v32  ;;  %v5625_v25 = vsub.s32 3, %v11540_v40  ;;  %v5614_v32 = vrot.slane %v5607_v49, %v4914_v48 }
 0x66e   : > { %6486 = vmatprep.subr.bf16.mxu0 %v8754_v24  ;;  %6527 = vmatprep.subr.bf16.mxu1 %v8757_v17  ;;  %v5622_v24 = vrot.slane %v5607_v49, %v5621_v59  ;;  %v5618_v17 = vrot.slane %v5607_v49, %v4918_v60 }
 0x671   : > { %6487 = vmatpush1.bf16.msra.mxu0 %v8752_v35  ;;  %6528 = vmatpush1.bf16.msra.mxu1 %v8755_v26  ;;  %v5626_v35 = vrot.slane %v5607_v49, %v5625_v25 }
 0x672   : > { %6488 = vmatprep.subr.bf16.mxu0 %v8760_v28  ;;  %6529 = vmatprep.subr.bf16.mxu1 %v8763_v2 }
 0x675   : > { %6489 = vmatpush1.bf16.msra.mxu0 %v8758_v13  ;;  %6530 = vmatpush1.bf16.msra.mxu1 %v8761_v27 }
 0x676   : > { %6490 = vmatprep.subr.bf16.mxu0 %v8766_v61  ;;  %6531 = vmatprep.subr.bf16.mxu1 %v8769_v33 }
 0x679   : > { %6491 = vmatpush2.bf16.msra.mxu0 %v8764_v53  ;;  %6532 = vmatpush2.bf16.msra.mxu1 %v8767_v23 }
 0x67a   : > { %6492 = vmatprep.subr.bf16.mxu0 %v8772_v43  ;;  %6533 = vmatprep.subr.bf16.mxu1 %v8775_v42  ;;  %v5629_v43 = vsub.s32 4, %v11540_v40  ;;  %v5637_v42 = vsub.s32 6, %v11540_v40 }
 0x67d   : > { %6493 = vmatpush2.bf16.msra.mxu0 %v8770_v19  ;;  %6534 = vmatpush2.bf16.msra.mxu1 %v8773_v34  ;;  %v5633_v19 = vsub.s32 5, %v11540_v40  ;;  %v5641_v34 = vsub.s32 7, %v11540_v40 }
 0x67e   : > { %6494 = vmatprep.subr.bf16.mxu0 %v8778_v41  ;;  %6535 = vmatprep.subr.bf16.mxu1 %v8781_v52  ;;  %v5630_v41 = vrot.slane %v5607_v49, %v5629_v43  ;;  %v5638_v52 = vrot.slane %v5607_v49, %v5637_v42 }
 0x681   : > { %6495 = vmatpush2.bf16.msra.mxu0 %v8776_v44  ;;  %6536 = vmatpush2.bf16.msra.mxu1 %v8779_v57  ;;  %v5634_v44 = vrot.slane %v5607_v49, %v5633_v19  ;;  %v5642_v57 = vrot.slane %v5607_v49, %v5641_v34 }
 0x682   : > { %6496 = vmatprep.subr.bf16.mxu0 %v8784_v22  ;;  %6537 = vmatprep.subr.bf16.mxu1 %v8787_v58 }
 0x685   : > { %6497 = vmatpush2.bf16.msra.mxu0 %v8782_v21  ;;  %6538 = vmatpush2.bf16.msra.mxu1 %v8785_v55 }
 0x686   : > { %6498 = vmatprep.subr.bf16.mxu0 %v8790_v30  ;;  %6539 = vmatprep.subr.bf16.mxu1 %v8793_v20 }
 0x689   : > { %6499 = vmatpush2.bf16.msra.mxu0 %v8788_v5  ;;  %6540 = vmatpush2.bf16.msra.mxu1 %v8791_v11 }
 0x68a   : > { %6500 = vmatprep.subr.bf16.mxu0 %v8796_v14  ;;  %6541 = vmatprep.subr.bf16.mxu1 %v8799_v31 }
 0x68d   : > { %6501 = vmatpush2.bf16.msra.mxu0 %v8794_v7  ;;  %6542 = vmatpush2.bf16.msra.mxu1 %v8797_v1 }
 0x68e   : > { %6502 = vmatprep.subr.bf16.mxu0 %v8802_v6  ;;  %6543 = vmatprep.subr.bf16.mxu1 %v8805_v8  ;;  %v7131_v6 = vld [vmem:[%s12177_s9 + $0x8] ss:$0 sm:$0xff] }
 0x691   : > { %6503 = vmatpush2.bf16.msra.mxu0 %v8800_v10  ;;  %6544 = vmatpush2.bf16.msra.mxu1 %v8803_v12 }
 0x692   : > { %6504 = vmatprep.subr.bf16.mxu0 %v8808_v56  ;;  %6545 = vmatprep.subr.bf16.mxu1 %v8811_v63 }
 0x695   : > { %6505 = vmatpush2.bf16.msra.mxu0 %v8806_v39  ;;  %6546 = vmatpush2.bf16.msra.mxu1 %v8809_v15 }
 0x696   : > { %7719 = vmatprep.subr.bf16.mxu0 %v8812_v4 }
 0x698   : > { %6507 = vmatmul.mubr.bf16.vlgmr.msra.gmra.mxu0 %v11851_v9  ;;  %6548 = vmatmul.mubr.bf16.vlgmr.msra.gmra.mxu1 %v11851_v9 }
 0x699   : > { %7720 = vmatpush3.bf16.msra.mxu0 %v8813_v37  ;;  %6588 = vmatprep.mubr.bf16.mxu0 %v11843_v51  ;;  %v8819_v51 = vld [vmem:[%s12176_s8 + $0x140] ss:$36 sps:$4 sm:$0xff]  }
 0x69a   : > { %7721 = vmatprep.subr.bf16.mxu0 %v8814_v36 }
 0x69d   : > { %7722 = vmatpush3.bf16.msra.mxu0 %v8815_v62 }
 0x69e   : > { %7723 = vmatprep.subr.bf16.mxu0 %v8816_v0 }
 0x6a1   : > { %7724 = vmatpush3.bf16.msra.mxu0 %v8817_v18 }
 0x6a2   : > { %7725 = vmatprep.subr.bf16.mxu0 %v8818_v54 }
 0x6a5   : > { %7726 = vmatpush3.bf16.msra.mxu0 %v8819_v51 }
 0x6a6   : > { %7727 = vmatprep.subr.bf16.mxu0 %v8820_v45 }
 0x6a9   : > { %7728 = vmatpush3.bf16.msra.mxu0 %v8821_v3 }
 0x6aa   : > { %7729 = vmatprep.subr.bf16.mxu0 %v8822_v47 }
 0x6ad   : > { %7730 = vmatpush3.bf16.msra.mxu0 %v8823_v29 }
 0x6ae   : > { %7731 = vmatprep.subr.bf16.mxu0 %v8824_v50 }
 0x6b1   : > { %7732 = vmatpush3.bf16.msra.mxu0 %v8825_v38 }
 0x6b2   : > { %7733 = vmatprep.subr.bf16.mxu0 %v8826_v16 }
 0x6b5   : > { %7734 = vmatpush3.bf16.msra.mxu0 %v8827_v46 }
 0x6b8   : > { %6589 = vmatmul.mubr.bf16.vlgmr.msra.gmra.mxu0 %v11851_v9 }
 0x718   : > { %v6426_v9 = vpop.f32.mrf.mxu0  ;;  %v6467_v26 = vpop.f32.mrf.mxu1 }
 0x719   : > { %v6427_v28 = vadd.f32 %v6426_v9, %v5614_v32  ;;  %v6468_v2 = vadd.f32 %v6467_v26, %v5622_v24 }
 0x71a   : > { %v6428_v13 = vpop.f32.mrf.mxu0  ;;  %v6469_v27 = vpop.f32.mrf.mxu1 }
 0x71b   : > { %6596 = vst [vmem:[%s12103_s24] sm:$0xff] %v6427_v28  ;;  %6598 = vst [vmem:[%s12103_s24 + $0x10] sm:$0xff] %v6468_v2  ;;  %v6429_v48 = vadd.f32 %v6428_v13, %v5618_v17  ;;  %v6470_v61 = vadd.f32 %v6469_v27, %v5626_v35 }
 0x71c   : > { %v6430_v33 = vpop.f32.mrf.mxu0  ;;  %v6471_v53 = vpop.f32.mrf.mxu1 }
 0x71d   : > { %6597 = vst [vmem:[%s12103_s24 + $0x8] sm:$0xff] %v6429_v48  ;;  %6599 = vst [vmem:[%s12103_s24 + $0x18] sm:$0xff] %v6470_v61 }
 0x71e   : > { %v6431_v60 = vpop.f32.mrf.mxu0  ;;  %v6472_v23 = vpop.f32.mrf.mxu1 }
 0x758   : > { %v6508_v22 = vpop.f32.mrf.mxu0  ;;  %v6549_v58 = vpop.f32.mrf.mxu1 }
 0x759   : > { %v6509_v21 = vadd.f32 %v6508_v22, %v5630_v41  ;;  %v6550_v55 = vadd.f32 %v6549_v58, %v5638_v52 }
 0x75a   : > { %v6510_v30 = vpop.f32.mrf.mxu0  ;;  %v6551_v20 = vpop.f32.mrf.mxu1 }
 0x75b   : > { %6600 = vst [vmem:[%s12103_s24 + $0x20] sm:$0xff] %v6509_v21  ;;  %6602 = vst [vmem:[%s12103_s24 + $0x30] sm:$0xff] %v6550_v55  ;;  %v6511_v5 = vadd.f32 %v6510_v30, %v5634_v44  ;;  %v6552_v11 = vadd.f32 %v6551_v20, %v5642_v57 }
 0x75c   : > { %v6512_v14 = vpop.f32.mrf.mxu0  ;;  %v6553_v40 = vpop.f32.mrf.mxu1 }
 0x75d   : > { %6601 = vst [vmem:[%s12103_s24 + $0x28] sm:$0xff] %v6511_v5  ;;  %6603 = vst [vmem:[%s12103_s24 + $0x38] sm:$0xff] %v6552_v11 }
 0x75e   : > { %v6513_v31 = vpop.f32.mrf.mxu0  ;;  %v6554_v7 = vpop.f32.mrf.mxu1 }
 0x778   : > { %v7735_v1 = vpop.f32.mrf.mxu0 }
 0x77a   : > { %v7736_v8 = vpop.f32.mrf.mxu0 }
 0x77b   : > { %v7737_v10 = vadd.f32 %v7736_v8, %v7735_v1 }
 0x77c   : > { %v7738_v12 = vpop.f32.mrf.mxu0 }
 0x77d   : > { %v6591_v56 = vadd.f32 %v7737_v10, %v7131_v6 }
 0x77e   : > { %v7739_v63 = vpop.f32.mrf.mxu0 }
 0x77f   : > { %6605 = vst.msk [vmem:[%s12103_s24 + $0x40] sm:$0xff] %vm6604_vm0, %v6591_v56 }
 0x780   : > { %8841 = shalt.err (!%p8838_p5)
}
 0x781   : > { %s8842_s24 = scalar_lea.hbm %s12125_s19, 1152  ;;  %s8846_s12 = scalar_lea.hbm %s12178_s10, 2304 }
 0x782   : > { %p8843_p6 = scmp.ne.s32.totalorder %s12125_s19, %s8842_s24  ;;  %p8847_p10 = scmp.lt.s32.totalorder %s12125_s19, %s12178_s10 }
 0x783   : > { %p8848_p11 = scmp.lt.s32.totalorder %s8846_s12, %s8842_s24 }
 0x784   : > { %p8844_p7 = pnand %p8843_p6, %p9023_p4 }
 0x785   : > { %p8849_p12 = por %p8848_p11, %p8847_p10 }
 0x786   : > { %p8845_p9 = pneg %p8844_p7 }
 0x788   : > { %p8850_p13 = pnand %p8849_p12, %p8845_p9 }
 0x78a   : > { %8853 = shalt.err (!%p8850_p13)
}
 0x78b   : > { %7779 = dma.vmem_to_hbm [thread:$0]  (%p9023_p4), %s6624_s29, 1152, %s12125_s19, %s6607_s16  }
 0x78c PF: > { %p7785_p0 = scmp.ge.s32.totalorder %s8904_s18, 2  ;;  %s6635_s30 = sand.u32 1, %s8884_s13  }
 0x78d   : > { %s6636_s27 = scalar_lea.sflag [#allocation3], %s6635_s30 }
 0x78e   : > { %p7782_p1 = pnand %p7785_p0, %p9030_p8 }
 0x790   : > { %p7783_p2 = pneg %p7782_p1 }
 0x792   : > { %8879 = dma.done.wait (%p7783_p2), %s6636_s27, 1152  }
 0x793   : > { %8881 = vsyncadd (%p7783_p2), %s6636_s27, 4294966144  ;;  %s23_s18 = sadd.s32 1, %s8904_s18   ;;  %s12261_s23 = sld [smem:[#allocation5_spill]] }
 0x794   : > { %p20_p3 = scmp.ge.s32.totalorder %s23_s18, 4   ;;  %s12262_s13 = smov %s8888_s14 }
 0x795   : > { %s12263_s14 = smov %s8892_s15  ;;  %s12264_s15 = smov %s9036_s26 }
 0x796   : > { %s12265_s16 = smov %s8900_s17  ;;  %22 = sbr.rel (!%p20_p3) target bundleno = 4 (0x4), region = 95 }
 0x799   : > { %s12266_s17 = smov %s12261_s23 }
 0x79b   :  { %6641 = vsyncpa [#allocation3], 1 }
 0x79c   :  { %6643 = vsyncpa [#allocation3 + $0x1], 1 }

</bundles_post_ra>
